<compile_context>
chip_gen: v7x
topology: tpu7x:2x2x1
jax: 0.10.0
libtpu: 0.0.40
codegen_flags: <defaults>
</compile_context>

<pallas_src>
import jax
import jax.numpy as jnp
from jax.experimental import pallas as pl
from jax.experimental.pallas import tpu as pltpu

# ---------------- configuration ----------------
B, C, H, W = 2, 3, 16, 16
PATCH = 4
EMBED = 32
DEPTH = 2
HEADS = 2
HEAD_DIM = EMBED // HEADS
MLP = 4 * EMBED
HIDDEN = 32            # args.hidden_size
NUM_CLASSES = 8        # args.num_classes
NPATCH = (H // PATCH) * (W // PATCH)   # 16
SEQ = NPATCH + 1                        # 17 = 16 patch tokens + cls token
SEQP = 24                               # padded seq length (multiple of 8 sublanes)
CLS_ROW = NPATCH                        # cls token lives at row 16 of each padded segment
ROWS = B * SEQP                         # 48


def _layernorm(x, g, b, eps):
    mu = jnp.mean(x, axis=-1, keepdims=True)
    var = jnp.mean(jnp.square(x - mu), axis=-1, keepdims=True)
    return (x - mu) * jax.lax.rsqrt(var + eps) * g + b


# ---------------- single fused Pallas kernel ----------------
def fused_vit_kernel(*refs):
    (patches_ref, pw_ref, pb_ref, clspe_ref, pospatch_ref) = refs[:5]
    nblk = DEPTH * 12
    blk_refs = refs[5:5 + nblk]
    (normw, normb, ltw, ltb, lnw, lnb, clw, clb) = refs[5 + nblk:5 + nblk + 8]
    o_ref = refs[5 + nblk + 8]      # (B, NUM_CLASSES) output
    tok_ref = refs[5 + nblk + 9]    # (ROWS, EMBED) VMEM scratch
    attn_ref = refs[5 + nblk + 10]  # (ROWS, EMBED) VMEM scratch

    # ---- patch embedding + token assembly (all batches, VMEM resident) ----
    emb = jnp.dot(patches_ref[...], pw_ref[...],
                  preferred_element_type=jnp.float32) + pb_ref[...]   # (B*NPATCH, EMBED)
    tok_ref[...] = jnp.zeros((ROWS, EMBED), jnp.float32)
    for b in range(B):
        r0 = b * SEQP
        # patch tokens at rows r0 .. r0+15 (aligned), cls token at row r0+16 (aligned)
        tok_ref[r0:r0 + NPATCH, :] = emb[b * NPATCH:(b + 1) * NPATCH, :] + pospatch_ref[...]
        tok_ref[r0 + CLS_ROW:r0 + CLS_ROW + 1, :] = clspe_ref[...]
    x = tok_ref[...]                                                   # (ROWS, EMBED)

    # padded key columns (>= SEQ) must never be attended to
    col = jax.lax.broadcasted_iota(jnp.int32, (SEQP, SEQP), 1)
    neg_mask = jnp.where(col < SEQ, 0.0, -1e30).astype(jnp.float32)

    # ---- transformer blocks (statically unrolled, weights VMEM resident) ----
    for d in range(DEPTH):
        (ln1w, ln1b, qkvw, qkvb, projw, projb,
         ln2w, ln2b, fc1w, fc1b, fc2w, fc2b) = blk_refs[d * 12:(d + 1) * 12]

        # pre-norm + qkv on all B*SEQP rows at once (scale already folded into qkvw/qkvb)
        h = _layernorm(x, ln1w[...], ln1b[...], 1e-6)
        qkv = jnp.dot(h, qkvw[...], preferred_element_type=jnp.float32) + qkvb[...]  # (ROWS, 3E)
        pw = projw[...]

        for b in range(B):                      # static, 8-aligned per-batch segments
            r0 = b * SEQP
            qkv_b = qkv[r0:r0 + SEQP, :]        # (SEQP, 3*EMBED)
            acc_b = jnp.zeros((SEQP, EMBED), jnp.float32)
            for hh in range(HEADS):             # static head loop, proj folded per head
                c0 = hh * HEAD_DIM
                qs = qkv_b[:, c0:c0 + HEAD_DIM]
                ks = qkv_b[:, EMBED + c0:EMBED + c0 + HEAD_DIM]
                vs = qkv_b[:, 2 * EMBED + c0:2 * EMBED + c0 + HEAD_DIM]
                s = jnp.dot(qs, ks.T, preferred_element_type=jnp.float32) + neg_mask
                s = s - jnp.max(s, axis=-1, keepdims=True)
                e = jnp.exp(s)
                p = e / jnp.sum(e, axis=-1, keepdims=True)
                oh = jnp.dot(p, vs, preferred_element_type=jnp.float32)     # (SEQP, HEAD_DIM)
                acc_b = acc_b + jnp.dot(oh, pw[c0:c0 + HEAD_DIM, :],
                                        preferred_element_type=jnp.float32)
            attn_ref[r0:r0 + SEQP, :] = acc_b
        x = x + attn_ref[...] + projb[...]

        # MLP (pre-norm), all rows at once
        h2 = _layernorm(x, ln2w[...], ln2b[...], 1e-6)
        h2 = jnp.dot(h2, fc1w[...], preferred_element_type=jnp.float32) + fc1b[...]
        h2 = 0.5 * h2 * (1.0 + jax.lax.erf(h2 * (2.0 ** -0.5)))   # exact GELU (timm default)
        h2 = jnp.dot(h2, fc2w[...], preferred_element_type=jnp.float32) + fc2b[...]
        x = x + h2

    # ---- final ViT norm + linear_transform + LayerNorm + linear_classification ----
    hN = _layernorm(x, normw[...], normb[...], 1e-6)                     # ViT norm eps=1e-6
    hN = jnp.dot(hN, ltw[...], preferred_element_type=jnp.float32) + ltb[...]
    hN = _layernorm(hN, lnw[...], lnb[...], 1e-5)                        # nn.LayerNorm eps=1e-5
    logits = jnp.dot(hN, clw[...], preferred_element_type=jnp.float32) + clb[...]  # (ROWS, NC)
    for b in range(B):
        o_ref[b:b + 1, :] = logits[b * SEQP + CLS_ROW:b * SEQP + CLS_ROW + 1, :]


# ---------------- parameter construction (deterministic) ----------------
def make_params():
    key = jax.random.PRNGKey(0)

    def nrm(k, shape, std=0.02):
        return (std * jax.random.normal(k, shape)).astype(jnp.float32)

    keys = iter(jax.random.split(key, 64))
    p = {}
    p["cls_token"] = nrm(next(keys), (1, 1, EMBED))
    p["pos_embed"] = nrm(next(keys), (1, SEQ, EMBED))
    # patch-embed conv weight (D, C, p, p) flattened to (C*p*p, D) "input-major"
    p["patch_w"] = nrm(next(keys), (C * PATCH * PATCH, EMBED))
    p["patch_b"] = jnp.zeros((1, EMBED), jnp.float32)

    blocks = []
    for _ in range(DEPTH):
        blk = (
            jnp.ones((1, EMBED), jnp.float32), jnp.zeros((1, EMBED), jnp.float32),        # ln1
            nrm(next(keys), (EMBED, 3 * EMBED)), jnp.zeros((1, 3 * EMBED), jnp.float32),  # qkv
            nrm(next(keys), (EMBED, EMBED)), jnp.zeros((1, EMBED), jnp.float32),          # proj
            jnp.ones((1, EMBED), jnp.float32), jnp.zeros((1, EMBED), jnp.float32),        # ln2
            nrm(next(keys), (EMBED, MLP)), jnp.zeros((1, MLP), jnp.float32),              # fc1
            nrm(next(keys), (MLP, EMBED)), jnp.zeros((1, EMBED), jnp.float32),            # fc2
        )
        blocks.append(blk)
    p["blocks"] = blocks

    # final ViT norm
    p["norm_w"] = jnp.ones((1, EMBED), jnp.float32)
    p["norm_b"] = jnp.zeros((1, EMBED), jnp.float32)
    # head: linear_transform -> layer_norm -> linear_classification
    p["lt_w"] = nrm(next(keys), (EMBED, HIDDEN))
    p["lt_b"] = jnp.zeros((1, HIDDEN), jnp.float32)
    p["ln_w"] = jnp.ones((1, HIDDEN), jnp.float32)
    p["ln_b"] = jnp.zeros((1, HIDDEN), jnp.float32)
    p["cls_w"] = nrm(next(keys), (HIDDEN, NUM_CLASSES))
    p["cls_b"] = jnp.zeros((1, NUM_CLASSES), jnp.float32)
    return p


def _fold_qkv_scale(blk):
    # softmax((q*s) k^T): with q = h@Wq + bq, scaling Wq and bq by s is exact.
    (ln1w, ln1b, qkvw, qkvb, projw, projb,
     ln2w, ln2b, fc1w, fc1b, fc2w, fc2b) = blk
    scale = HEAD_DIM ** -0.5
    col = jnp.concatenate([jnp.full((EMBED,), scale, jnp.float32),
                           jnp.ones((2 * EMBED,), jnp.float32)])
    return (ln1w, ln1b, qkvw * col[None, :], qkvb * col[None, :], projw, projb,
            ln2w, ln2b, fc1w, fc1b, fc2w, fc2b)


# ---------------- forward: tiny XLA glue + ONE pallas_call ----------------
def forward(x_nchw, params):
    Hp, Wp = H // PATCH, W // PATCH
    # patch extraction == stride-PATCH conv unfold; flatten as (C, ph, pw)
    patches = (
        x_nchw.reshape(B, C, Hp, PATCH, Wp, PATCH)
        .transpose(0, 2, 4, 1, 3, 5)
        .reshape(B * NPATCH, C * PATCH * PATCH)
    )
    pos = params["pos_embed"][0]                    # (SEQ, EMBED)
    cls_pe = params["cls_token"][0] + pos[0:1, :]   # cls token + its pos embedding, (1, EMBED)
    pos_patch = pos[1:, :]                          # (NPATCH, EMBED)

    flat = [patches, params["patch_w"], params["patch_b"], cls_pe, pos_patch]
    for blk in params["blocks"]:
        flat.extend(_fold_qkv_scale(blk))
    flat.extend([params["norm_w"], params["norm_b"],
                 params["lt_w"], params["lt_b"],
                 params["ln_w"], params["ln_b"],
                 params["cls_w"], params["cls_b"]])

    # is_test=True path of Vision_Transformers.forward: classification logits only
    return pl.pallas_call(
        fused_vit_kernel,
        out_shape=jax.ShapeDtypeStruct((B, NUM_CLASSES), jnp.float32),
        scratch_shapes=[pltpu.VMEM((ROWS, EMBED), jnp.float32),   # token buffer
                        pltpu.VMEM((ROWS, EMBED), jnp.float32)],  # attention output buffer
    )(*flat)


if __name__ == "__main__":
    params = make_params()
    x = jax.random.normal(jax.random.PRNGKey(0), (B, C, H, W), dtype=jnp.float32)
    fwd = jax.jit(forward)
    out = jax.block_until_ready(fwd(x, params))
    assert out.shape == (B, NUM_CLASSES) and out.dtype == jnp.float32
    print("KERNEL_OK")
</pallas_src>

<mosaic_0001>
module attributes {stable_mosaic.version = 11 : i64} {
  func.func @fused_vit_kernel(%arg0: memref<32x48xf32, #tpu.memory_space<vmem>>, %arg1: memref<48x32xf32, #tpu.memory_space<vmem>>, %arg2: memref<1x32xf32, #tpu.memory_space<vmem>>, %arg3: memref<1x32xf32, #tpu.memory_space<vmem>>, %arg4: memref<16x32xf32, #tpu.memory_space<vmem>>, %arg5: memref<1x32xf32, #tpu.memory_space<vmem>>, %arg6: memref<1x32xf32, #tpu.memory_space<vmem>>, %arg7: memref<32x96xf32, #tpu.memory_space<vmem>>, %arg8: memref<1x96xf32, #tpu.memory_space<vmem>>, %arg9: memref<32x32xf32, #tpu.memory_space<vmem>>, %arg10: memref<1x32xf32, #tpu.memory_space<vmem>>, %arg11: memref<1x32xf32, #tpu.memory_space<vmem>>, %arg12: memref<1x32xf32, #tpu.memory_space<vmem>>, %arg13: memref<32x128xf32, #tpu.memory_space<vmem>>, %arg14: memref<1x128xf32, #tpu.memory_space<vmem>>, %arg15: memref<128x32xf32, #tpu.memory_space<vmem>>, %arg16: memref<1x32xf32, #tpu.memory_space<vmem>>, %arg17: memref<1x32xf32, #tpu.memory_space<vmem>>, %arg18: memref<1x32xf32, #tpu.memory_space<vmem>>, %arg19: memref<32x96xf32, #tpu.memory_space<vmem>>, %arg20: memref<1x96xf32, #tpu.memory_space<vmem>>, %arg21: memref<32x32xf32, #tpu.memory_space<vmem>>, %arg22: memref<1x32xf32, #tpu.memory_space<vmem>>, %arg23: memref<1x32xf32, #tpu.memory_space<vmem>>, %arg24: memref<1x32xf32, #tpu.memory_space<vmem>>, %arg25: memref<32x128xf32, #tpu.memory_space<vmem>>, %arg26: memref<1x128xf32, #tpu.memory_space<vmem>>, %arg27: memref<128x32xf32, #tpu.memory_space<vmem>>, %arg28: memref<1x32xf32, #tpu.memory_space<vmem>>, %arg29: memref<1x32xf32, #tpu.memory_space<vmem>>, %arg30: memref<1x32xf32, #tpu.memory_space<vmem>>, %arg31: memref<32x32xf32, #tpu.memory_space<vmem>>, %arg32: memref<1x32xf32, #tpu.memory_space<vmem>>, %arg33: memref<1x32xf32, #tpu.memory_space<vmem>>, %arg34: memref<1x32xf32, #tpu.memory_space<vmem>>, %arg35: memref<32x8xf32, #tpu.memory_space<vmem>>, %arg36: memref<1x8xf32, #tpu.memory_space<vmem>>, %arg37: memref<2x8xf32, #tpu.memory_space<vmem>>, %arg38: memref<48x32xf32, #tpu.memory_space<vmem>>, %arg39: memref<48x32xf32, #tpu.memory_space<vmem>>) attributes {dimension_semantics = [], scalar_prefetch = 0 : i64, scratch_operands = 2 : i64, tpu.core_type = #tpu.core_type<tc>} {
    %c0 = arith.constant 0 : index
    %c0_0 = arith.constant 0 : index
    %0 = vector.load %arg0[%c0, %c0_0] : memref<32x48xf32, #tpu.memory_space<vmem>>, vector<32x48xf32>
    %c0_1 = arith.constant 0 : index
    %c0_2 = arith.constant 0 : index
    %1 = vector.load %arg1[%c0_1, %c0_2] : memref<48x32xf32, #tpu.memory_space<vmem>>, vector<48x32xf32>
    %cst = arith.constant dense<0.000000e+00> : vector<32x32xf32>
    %2 = tpu.matmul %0, %1, %cst {dimension_numbers = #tpu.dot_dimension_numbers<[1], [0], [0], [1], [0, 0, 1, 1], [], []>} : vector<32x48xf32>, vector<48x32xf32>, vector<32x32xf32> -> vector<32x32xf32>
    %c0_3 = arith.constant 0 : index
    %c0_4 = arith.constant 0 : index
    %3 = vector.load %arg2[%c0_3, %c0_4] : memref<1x32xf32, #tpu.memory_space<vmem>>, vector<1x32xf32>
    %4 = vector.broadcast %3 : vector<1x32xf32> to vector<32x32xf32>
    %5 = arith.addf %2, %4 : vector<32x32xf32>
    %cst_5 = arith.constant 0.000000e+00 : f32
    %6 = vector.broadcast %cst_5 : f32 to vector<48x32xf32>
    %c0_6 = arith.constant 0 : index
    %c0_7 = arith.constant 0 : index
    %7 = vector.load %arg38[%c0_6, %c0_7] : memref<48x32xf32, #tpu.memory_space<vmem>>, vector<48x32xf32>
    tpu.vector_store %arg38[%c0_6, %c0_7], %6 {strides = array<i32>} : memref<48x32xf32, #tpu.memory_space<vmem>>, vector<48x32xf32>,
    %8 = vector.extract_strided_slice %5 {offsets = [0, 0], sizes = [16, 32], strides = [1, 1]} : vector<32x32xf32> to vector<16x32xf32>
    %c0_8 = arith.constant 0 : index
    %c0_9 = arith.constant 0 : index
    %9 = vector.load %arg4[%c0_8, %c0_9] : memref<16x32xf32, #tpu.memory_space<vmem>>, vector<16x32xf32>
    %10 = arith.addf %8, %9 : vector<16x32xf32>
    %c0_10 = arith.constant 0 : index
    %c0_11 = arith.constant 0 : index
    %11 = vector.load %arg38[%c0_10, %c0_11] : memref<48x32xf32, #tpu.memory_space<vmem>>, vector<16x32xf32>
    tpu.vector_store %arg38[%c0_10, %c0_11], %10 {strides = array<i32>} : memref<48x32xf32, #tpu.memory_space<vmem>>, vector<16x32xf32>,
    %c0_12 = arith.constant 0 : index
    %c0_13 = arith.constant 0 : index
    %12 = vector.load %arg3[%c0_12, %c0_13] : memref<1x32xf32, #tpu.memory_space<vmem>>, vector<1x32xf32>
    %c16 = arith.constant 16 : index
    %c0_14 = arith.constant 0 : index
    %13 = vector.load %arg38[%c16, %c0_14] : memref<48x32xf32, #tpu.memory_space<vmem>>, vector<1x32xf32>
    tpu.vector_store %arg38[%c16, %c0_14], %12 {strides = array<i32>} : memref<48x32xf32, #tpu.memory_space<vmem>>, vector<1x32xf32>,
    %14 = vector.extract_strided_slice %5 {offsets = [16, 0], sizes = [16, 32], strides = [1, 1]} : vector<32x32xf32> to vector<16x32xf32>
    %c0_15 = arith.constant 0 : index
    %c0_16 = arith.constant 0 : index
    %15 = vector.load %arg4[%c0_15, %c0_16] : memref<16x32xf32, #tpu.memory_space<vmem>>, vector<16x32xf32>
    %16 = arith.addf %14, %15 : vector<16x32xf32>
    %c24 = arith.constant 24 : index
    %c0_17 = arith.constant 0 : index
    %17 = vector.load %arg38[%c24, %c0_17] : memref<48x32xf32, #tpu.memory_space<vmem>>, vector<16x32xf32>
    tpu.vector_store %arg38[%c24, %c0_17], %16 {strides = array<i32>} : memref<48x32xf32, #tpu.memory_space<vmem>>, vector<16x32xf32>,
    %c0_18 = arith.constant 0 : index
    %c0_19 = arith.constant 0 : index
    %18 = vector.load %arg3[%c0_18, %c0_19] : memref<1x32xf32, #tpu.memory_space<vmem>>, vector<1x32xf32>
    %c40 = arith.constant 40 : index
    %c0_20 = arith.constant 0 : index
    %19 = vector.load %arg38[%c40, %c0_20] : memref<48x32xf32, #tpu.memory_space<vmem>>, vector<1x32xf32>
    tpu.vector_store %arg38[%c40, %c0_20], %18 {strides = array<i32>} : memref<48x32xf32, #tpu.memory_space<vmem>>, vector<1x32xf32>,
    %c0_21 = arith.constant 0 : index
    %c0_22 = arith.constant 0 : index
    %20 = vector.load %arg38[%c0_21, %c0_22] : memref<48x32xf32, #tpu.memory_space<vmem>>, vector<48x32xf32>
    %21 = tpu.iota {dimensions = array<i32: 1>} : vector<24x24xi32>
    %c17_i32 = arith.constant 17 : i32
    %22 = vector.broadcast %c17_i32 : i32 to vector<24x24xi32>
    %23 = arith.cmpi slt, %21, %22 : vector<24x24xi32>
    %cst_23 = arith.constant 0.000000e+00 : f32
    %cst_24 = arith.constant -1.000000e+30 : f32
    %24 = vector.broadcast %cst_23 : f32 to vector<24x24xf32>
    %25 = vector.broadcast %cst_24 : f32 to vector<24x24xf32>
    %26 = arith.select %23, %24, %25 : vector<24x24xi1>, vector<24x24xf32>
    %c0_25 = arith.constant 0 : index
    %c0_26 = arith.constant 0 : index
    %27 = vector.load %arg5[%c0_25, %c0_26] : memref<1x32xf32, #tpu.memory_space<vmem>>, vector<1x32xf32>
    %c0_27 = arith.constant 0 : index
    %c0_28 = arith.constant 0 : index
    %28 = vector.load %arg6[%c0_27, %c0_28] : memref<1x32xf32, #tpu.memory_space<vmem>>, vector<1x32xf32>
    %cst_29 = arith.constant dense<0.000000e+00> : vector<48xf32>
    %29 = vector.multi_reduction <add>, %20, %cst_29 [1] : vector<48x32xf32> to vector<48xf32>
    %30 = vector.shape_cast %29 : vector<48xf32> to vector<48x1xf32>
    %cst_30 = arith.constant 3.200000e+01 : f32
    %31 = vector.broadcast %cst_30 : f32 to vector<48x1xf32>
    %32 = arith.divf %30, %31 : vector<48x1xf32>
    %33 = vector.broadcast %32 : vector<48x1xf32> to vector<48x32xf32>
    %34 = arith.subf %20, %33 : vector<48x32xf32>
    %35 = arith.mulf %34, %34 : vector<48x32xf32>
    %cst_31 = arith.constant dense<0.000000e+00> : vector<48xf32>
    %36 = vector.multi_reduction <add>, %35, %cst_31 [1] : vector<48x32xf32> to vector<48xf32>
    %37 = vector.shape_cast %36 : vector<48xf32> to vector<48x1xf32>
    %cst_32 = arith.constant 3.200000e+01 : f32
    %38 = vector.broadcast %cst_32 : f32 to vector<48x1xf32>
    %39 = arith.divf %37, %38 : vector<48x1xf32>
    %40 = vector.broadcast %32 : vector<48x1xf32> to vector<48x32xf32>
    %41 = arith.subf %20, %40 : vector<48x32xf32>
    %cst_33 = arith.constant 9.99999997E-7 : f32
    %42 = vector.broadcast %cst_33 : f32 to vector<48x1xf32>
    %43 = arith.addf %39, %42 : vector<48x1xf32>
    %44 = math.rsqrt %43 : vector<48x1xf32>
    %45 = vector.broadcast %44 : vector<48x1xf32> to vector<48x32xf32>
    %46 = arith.mulf %41, %45 : vector<48x32xf32>
    %47 = vector.broadcast %27 : vector<1x32xf32> to vector<48x32xf32>
    %48 = arith.mulf %46, %47 : vector<48x32xf32>
    %49 = vector.broadcast %28 : vector<1x32xf32> to vector<48x32xf32>
    %50 = arith.addf %48, %49 : vector<48x32xf32>
    %c0_34 = arith.constant 0 : index
    %c0_35 = arith.constant 0 : index
    %51 = vector.load %arg7[%c0_34, %c0_35] : memref<32x96xf32, #tpu.memory_space<vmem>>, vector<32x96xf32>
    %cst_36 = arith.constant dense<0.000000e+00> : vector<48x96xf32>
    %52 = tpu.matmul %50, %51, %cst_36 {dimension_numbers = #tpu.dot_dimension_numbers<[1], [0], [0], [1], [0, 0, 1, 1], [], []>} : vector<48x32xf32>, vector<32x96xf32>, vector<48x96xf32> -> vector<48x96xf32>
    %c0_37 = arith.constant 0 : index
    %c0_38 = arith.constant 0 : index
    %53 = vector.load %arg8[%c0_37, %c0_38] : memref<1x96xf32, #tpu.memory_space<vmem>>, vector<1x96xf32>
    %54 = vector.broadcast %53 : vector<1x96xf32> to vector<48x96xf32>
    %55 = arith.addf %52, %54 : vector<48x96xf32>
    %c0_39 = arith.constant 0 : index
    %c0_40 = arith.constant 0 : index
    %56 = vector.load %arg9[%c0_39, %c0_40] : memref<32x32xf32, #tpu.memory_space<vmem>>, vector<32x32xf32>
    %57 = vector.extract_strided_slice %55 {offsets = [0, 0], sizes = [24, 96], strides = [1, 1]} : vector<48x96xf32> to vector<24x96xf32>
    %cst_41 = arith.constant 0.000000e+00 : f32
    %58 = vector.broadcast %cst_41 : f32 to vector<24x32xf32>
    %59 = vector.extract_strided_slice %57 {offsets = [0, 0], sizes = [24, 16], strides = [1, 1]} : vector<24x96xf32> to vector<24x16xf32>
    %60 = vector.extract_strided_slice %57 {offsets = [0, 32], sizes = [24, 16], strides = [1, 1]} : vector<24x96xf32> to vector<24x16xf32>
    %61 = vector.extract_strided_slice %57 {offsets = [0, 64], sizes = [24, 16], strides = [1, 1]} : vector<24x96xf32> to vector<24x16xf32>
    %62 = tpu.transpose %60, [1, 0] : vector<24x16xf32> -> vector<16x24xf32>
    %cst_42 = arith.constant dense<0.000000e+00> : vector<24x24xf32>
    %63 = tpu.matmul %59, %62, %cst_42 {dimension_numbers = #tpu.dot_dimension_numbers<[1], [0], [0], [1], [0, 0, 1, 1], [], []>} : vector<24x16xf32>, vector<16x24xf32>, vector<24x24xf32> -> vector<24x24xf32>
    %64 = arith.addf %63, %26 : vector<24x24xf32>
    %cst_43 = arith.constant dense<0xFF800000> : vector<24xf32>
    %65 = vector.multi_reduction <maximumf>, %64, %cst_43 [1] : vector<24x24xf32> to vector<24xf32>
    %66 = vector.shape_cast %65 : vector<24xf32> to vector<24x1xf32>
    %67 = vector.broadcast %66 : vector<24x1xf32> to vector<24x24xf32>
    %68 = arith.subf %64, %67 : vector<24x24xf32>
    %69 = math.exp %68 : vector<24x24xf32>
    %cst_44 = arith.constant dense<0.000000e+00> : vector<24xf32>
    %70 = vector.multi_reduction <add>, %69, %cst_44 [1] : vector<24x24xf32> to vector<24xf32>
    %71 = vector.shape_cast %70 : vector<24xf32> to vector<24x1xf32>
    %72 = vector.broadcast %71 : vector<24x1xf32> to vector<24x24xf32>
    %73 = arith.divf %69, %72 : vector<24x24xf32>
    %cst_45 = arith.constant dense<0.000000e+00> : vector<24x16xf32>
    %74 = tpu.matmul %73, %61, %cst_45 {dimension_numbers = #tpu.dot_dimension_numbers<[1], [0], [0], [1], [0, 0, 1, 1], [], []>} : vector<24x24xf32>, vector<24x16xf32>, vector<24x16xf32> -> vector<24x16xf32>
    %75 = vector.extract_strided_slice %56 {offsets = [0, 0], sizes = [16, 32], strides = [1, 1]} : vector<32x32xf32> to vector<16x32xf32>
    %cst_46 = arith.constant dense<0.000000e+00> : vector<24x32xf32>
    %76 = tpu.matmul %74, %75, %cst_46 {dimension_numbers = #tpu.dot_dimension_numbers<[1], [0], [0], [1], [0, 0, 1, 1], [], []>} : vector<24x16xf32>, vector<16x32xf32>, vector<24x32xf32> -> vector<24x32xf32>
    %77 = arith.addf %58, %76 : vector<24x32xf32>
    %78 = vector.extract_strided_slice %57 {offsets = [0, 16], sizes = [24, 16], strides = [1, 1]} : vector<24x96xf32> to vector<24x16xf32>
    %79 = vector.extract_strided_slice %57 {offsets = [0, 48], sizes = [24, 16], strides = [1, 1]} : vector<24x96xf32> to vector<24x16xf32>
    %80 = vector.extract_strided_slice %57 {offsets = [0, 80], sizes = [24, 16], strides = [1, 1]} : vector<24x96xf32> to vector<24x16xf32>
    %81 = tpu.transpose %79, [1, 0] : vector<24x16xf32> -> vector<16x24xf32>
    %cst_47 = arith.constant dense<0.000000e+00> : vector<24x24xf32>
    %82 = tpu.matmul %78, %81, %cst_47 {dimension_numbers = #tpu.dot_dimension_numbers<[1], [0], [0], [1], [0, 0, 1, 1], [], []>} : vector<24x16xf32>, vector<16x24xf32>, vector<24x24xf32> -> vector<24x24xf32>
    %83 = arith.addf %82, %26 : vector<24x24xf32>
    %cst_48 = arith.constant dense<0xFF800000> : vector<24xf32>
    %84 = vector.multi_reduction <maximumf>, %83, %cst_48 [1] : vector<24x24xf32> to vector<24xf32>
    %85 = vector.shape_cast %84 : vector<24xf32> to vector<24x1xf32>
    %86 = vector.broadcast %85 : vector<24x1xf32> to vector<24x24xf32>
    %87 = arith.subf %83, %86 : vector<24x24xf32>
    %88 = math.exp %87 : vector<24x24xf32>
    %cst_49 = arith.constant dense<0.000000e+00> : vector<24xf32>
    %89 = vector.multi_reduction <add>, %88, %cst_49 [1] : vector<24x24xf32> to vector<24xf32>
    %90 = vector.shape_cast %89 : vector<24xf32> to vector<24x1xf32>
    %91 = vector.broadcast %90 : vector<24x1xf32> to vector<24x24xf32>
    %92 = arith.divf %88, %91 : vector<24x24xf32>
    %cst_50 = arith.constant dense<0.000000e+00> : vector<24x16xf32>
    %93 = tpu.matmul %92, %80, %cst_50 {dimension_numbers = #tpu.dot_dimension_numbers<[1], [0], [0], [1], [0, 0, 1, 1], [], []>} : vector<24x24xf32>, vector<24x16xf32>, vector<24x16xf32> -> vector<24x16xf32>
    %94 = vector.extract_strided_slice %56 {offsets = [16, 0], sizes = [16, 32], strides = [1, 1]} : vector<32x32xf32> to vector<16x32xf32>
    %cst_51 = arith.constant dense<0.000000e+00> : vector<24x32xf32>
    %95 = tpu.matmul %93, %94, %cst_51 {dimension_numbers = #tpu.dot_dimension_numbers<[1], [0], [0], [1], [0, 0, 1, 1], [], []>} : vector<24x16xf32>, vector<16x32xf32>, vector<24x32xf32> -> vector<24x32xf32>
    %96 = arith.addf %77, %95 : vector<24x32xf32>
    %c0_52 = arith.constant 0 : index
    %c0_53 = arith.constant 0 : index
    %97 = vector.load %arg39[%c0_52, %c0_53] : memref<48x32xf32, #tpu.memory_space<vmem>>, vector<24x32xf32>
    tpu.vector_store %arg39[%c0_52, %c0_53], %96 {strides = array<i32>} : memref<48x32xf32, #tpu.memory_space<vmem>>, vector<24x32xf32>,
    %98 = vector.extract_strided_slice %55 {offsets = [24, 0], sizes = [24, 96], strides = [1, 1]} : vector<48x96xf32> to vector<24x96xf32>
    %cst_54 = arith.constant 0.000000e+00 : f32
    %99 = vector.broadcast %cst_54 : f32 to vector<24x32xf32>
    %100 = vector.extract_strided_slice %98 {offsets = [0, 0], sizes = [24, 16], strides = [1, 1]} : vector<24x96xf32> to vector<24x16xf32>
    %101 = vector.extract_strided_slice %98 {offsets = [0, 32], sizes = [24, 16], strides = [1, 1]} : vector<24x96xf32> to vector<24x16xf32>
    %102 = vector.extract_strided_slice %98 {offsets = [0, 64], sizes = [24, 16], strides = [1, 1]} : vector<24x96xf32> to vector<24x16xf32>
    %103 = tpu.transpose %101, [1, 0] : vector<24x16xf32> -> vector<16x24xf32>
    %cst_55 = arith.constant dense<0.000000e+00> : vector<24x24xf32>
    %104 = tpu.matmul %100, %103, %cst_55 {dimension_numbers = #tpu.dot_dimension_numbers<[1], [0], [0], [1], [0, 0, 1, 1], [], []>} : vector<24x16xf32>, vector<16x24xf32>, vector<24x24xf32> -> vector<24x24xf32>
    %105 = arith.addf %104, %26 : vector<24x24xf32>
    %cst_56 = arith.constant dense<0xFF800000> : vector<24xf32>
    %106 = vector.multi_reduction <maximumf>, %105, %cst_56 [1] : vector<24x24xf32> to vector<24xf32>
    %107 = vector.shape_cast %106 : vector<24xf32> to vector<24x1xf32>
    %108 = vector.broadcast %107 : vector<24x1xf32> to vector<24x24xf32>
    %109 = arith.subf %105, %108 : vector<24x24xf32>
    %110 = math.exp %109 : vector<24x24xf32>
    %cst_57 = arith.constant dense<0.000000e+00> : vector<24xf32>
    %111 = vector.multi_reduction <add>, %110, %cst_57 [1] : vector<24x24xf32> to vector<24xf32>
    %112 = vector.shape_cast %111 : vector<24xf32> to vector<24x1xf32>
    %113 = vector.broadcast %112 : vector<24x1xf32> to vector<24x24xf32>
    %114 = arith.divf %110, %113 : vector<24x24xf32>
    %cst_58 = arith.constant dense<0.000000e+00> : vector<24x16xf32>
    %115 = tpu.matmul %114, %102, %cst_58 {dimension_numbers = #tpu.dot_dimension_numbers<[1], [0], [0], [1], [0, 0, 1, 1], [], []>} : vector<24x24xf32>, vector<24x16xf32>, vector<24x16xf32> -> vector<24x16xf32>
    %116 = vector.extract_strided_slice %56 {offsets = [0, 0], sizes = [16, 32], strides = [1, 1]} : vector<32x32xf32> to vector<16x32xf32>
    %cst_59 = arith.constant dense<0.000000e+00> : vector<24x32xf32>
    %117 = tpu.matmul %115, %116, %cst_59 {dimension_numbers = #tpu.dot_dimension_numbers<[1], [0], [0], [1], [0, 0, 1, 1], [], []>} : vector<24x16xf32>, vector<16x32xf32>, vector<24x32xf32> -> vector<24x32xf32>
    %118 = arith.addf %99, %117 : vector<24x32xf32>
    %119 = vector.extract_strided_slice %98 {offsets = [0, 16], sizes = [24, 16], strides = [1, 1]} : vector<24x96xf32> to vector<24x16xf32>
    %120 = vector.extract_strided_slice %98 {offsets = [0, 48], sizes = [24, 16], strides = [1, 1]} : vector<24x96xf32> to vector<24x16xf32>
    %121 = vector.extract_strided_slice %98 {offsets = [0, 80], sizes = [24, 16], strides = [1, 1]} : vector<24x96xf32> to vector<24x16xf32>
    %122 = tpu.transpose %120, [1, 0] : vector<24x16xf32> -> vector<16x24xf32>
    %cst_60 = arith.constant dense<0.000000e+00> : vector<24x24xf32>
    %123 = tpu.matmul %119, %122, %cst_60 {dimension_numbers = #tpu.dot_dimension_numbers<[1], [0], [0], [1], [0, 0, 1, 1], [], []>} : vector<24x16xf32>, vector<16x24xf32>, vector<24x24xf32> -> vector<24x24xf32>
    %124 = arith.addf %123, %26 : vector<24x24xf32>
    %cst_61 = arith.constant dense<0xFF800000> : vector<24xf32>
    %125 = vector.multi_reduction <maximumf>, %124, %cst_61 [1] : vector<24x24xf32> to vector<24xf32>
    %126 = vector.shape_cast %125 : vector<24xf32> to vector<24x1xf32>
    %127 = vector.broadcast %126 : vector<24x1xf32> to vector<24x24xf32>
    %128 = arith.subf %124, %127 : vector<24x24xf32>
    %129 = math.exp %128 : vector<24x24xf32>
    %cst_62 = arith.constant dense<0.000000e+00> : vector<24xf32>
    %130 = vector.multi_reduction <add>, %129, %cst_62 [1] : vector<24x24xf32> to vector<24xf32>
    %131 = vector.shape_cast %130 : vector<24xf32> to vector<24x1xf32>
    %132 = vector.broadcast %131 : vector<24x1xf32> to vector<24x24xf32>
    %133 = arith.divf %129, %132 : vector<24x24xf32>
    %cst_63 = arith.constant dense<0.000000e+00> : vector<24x16xf32>
    %134 = tpu.matmul %133, %121, %cst_63 {dimension_numbers = #tpu.dot_dimension_numbers<[1], [0], [0], [1], [0, 0, 1, 1], [], []>} : vector<24x24xf32>, vector<24x16xf32>, vector<24x16xf32> -> vector<24x16xf32>
    %135 = vector.extract_strided_slice %56 {offsets = [16, 0], sizes = [16, 32], strides = [1, 1]} : vector<32x32xf32> to vector<16x32xf32>
    %cst_64 = arith.constant dense<0.000000e+00> : vector<24x32xf32>
    %136 = tpu.matmul %134, %135, %cst_64 {dimension_numbers = #tpu.dot_dimension_numbers<[1], [0], [0], [1], [0, 0, 1, 1], [], []>} : vector<24x16xf32>, vector<16x32xf32>, vector<24x32xf32> -> vector<24x32xf32>
    %137 = arith.addf %118, %136 : vector<24x32xf32>
    %c24_65 = arith.constant 24 : index
    %c0_66 = arith.constant 0 : index
    %138 = vector.load %arg39[%c24_65, %c0_66] : memref<48x32xf32, #tpu.memory_space<vmem>>, vector<24x32xf32>
    tpu.vector_store %arg39[%c24_65, %c0_66], %137 {strides = array<i32>} : memref<48x32xf32, #tpu.memory_space<vmem>>, vector<24x32xf32>,
    %c0_67 = arith.constant 0 : index
    %c0_68 = arith.constant 0 : index
    %139 = vector.load %arg39[%c0_67, %c0_68] : memref<48x32xf32, #tpu.memory_space<vmem>>, vector<48x32xf32>
    %140 = arith.addf %20, %139 : vector<48x32xf32>
    %c0_69 = arith.constant 0 : index
    %c0_70 = arith.constant 0 : index
    %141 = vector.load %arg10[%c0_69, %c0_70] : memref<1x32xf32, #tpu.memory_space<vmem>>, vector<1x32xf32>
    %142 = vector.broadcast %141 : vector<1x32xf32> to vector<48x32xf32>
    %143 = arith.addf %140, %142 : vector<48x32xf32>
    %c0_71 = arith.constant 0 : index
    %c0_72 = arith.constant 0 : index
    %144 = vector.load %arg11[%c0_71, %c0_72] : memref<1x32xf32, #tpu.memory_space<vmem>>, vector<1x32xf32>
    %c0_73 = arith.constant 0 : index
    %c0_74 = arith.constant 0 : index
    %145 = vector.load %arg12[%c0_73, %c0_74] : memref<1x32xf32, #tpu.memory_space<vmem>>, vector<1x32xf32>
    %cst_75 = arith.constant dense<0.000000e+00> : vector<48xf32>
    %146 = vector.multi_reduction <add>, %143, %cst_75 [1] : vector<48x32xf32> to vector<48xf32>
    %147 = vector.shape_cast %146 : vector<48xf32> to vector<48x1xf32>
    %cst_76 = arith.constant 3.200000e+01 : f32
    %148 = vector.broadcast %cst_76 : f32 to vector<48x1xf32>
    %149 = arith.divf %147, %148 : vector<48x1xf32>
    %150 = vector.broadcast %149 : vector<48x1xf32> to vector<48x32xf32>
    %151 = arith.subf %143, %150 : vector<48x32xf32>
    %152 = arith.mulf %151, %151 : vector<48x32xf32>
    %cst_77 = arith.constant dense<0.000000e+00> : vector<48xf32>
    %153 = vector.multi_reduction <add>, %152, %cst_77 [1] : vector<48x32xf32> to vector<48xf32>
    %154 = vector.shape_cast %153 : vector<48xf32> to vector<48x1xf32>
    %cst_78 = arith.constant 3.200000e+01 : f32
    %155 = vector.broadcast %cst_78 : f32 to vector<48x1xf32>
    %156 = arith.divf %154, %155 : vector<48x1xf32>
    %157 = vector.broadcast %149 : vector<48x1xf32> to vector<48x32xf32>
    %158 = arith.subf %143, %157 : vector<48x32xf32>
    %cst_79 = arith.constant 9.99999997E-7 : f32
    %159 = vector.broadcast %cst_79 : f32 to vector<48x1xf32>
    %160 = arith.addf %156, %159 : vector<48x1xf32>
    %161 = math.rsqrt %160 : vector<48x1xf32>
    %162 = vector.broadcast %161 : vector<48x1xf32> to vector<48x32xf32>
    %163 = arith.mulf %158, %162 : vector<48x32xf32>
    %164 = vector.broadcast %144 : vector<1x32xf32> to vector<48x32xf32>
    %165 = arith.mulf %163, %164 : vector<48x32xf32>
    %166 = vector.broadcast %145 : vector<1x32xf32> to vector<48x32xf32>
    %167 = arith.addf %165, %166 : vector<48x32xf32>
    %c0_80 = arith.constant 0 : index
    %c0_81 = arith.constant 0 : index
    %168 = vector.load %arg13[%c0_80, %c0_81] : memref<32x128xf32, #tpu.memory_space<vmem>>, vector<32x128xf32>
    %cst_82 = arith.constant dense<0.000000e+00> : vector<48x128xf32>
    %169 = tpu.matmul %167, %168, %cst_82 {dimension_numbers = #tpu.dot_dimension_numbers<[1], [0], [0], [1], [0, 0, 1, 1], [], []>} : vector<48x32xf32>, vector<32x128xf32>, vector<48x128xf32> -> vector<48x128xf32>
    %c0_83 = arith.constant 0 : index
    %c0_84 = arith.constant 0 : index
    %170 = vector.load %arg14[%c0_83, %c0_84] : memref<1x128xf32, #tpu.memory_space<vmem>>, vector<1x128xf32>
    %171 = vector.broadcast %170 : vector<1x128xf32> to vector<48x128xf32>
    %172 = arith.addf %169, %171 : vector<48x128xf32>
    %cst_85 = arith.constant 5.000000e-01 : f32
    %173 = vector.broadcast %cst_85 : f32 to vector<48x128xf32>
    %174 = arith.mulf %173, %172 : vector<48x128xf32>
    %cst_86 = arith.constant 0.707106769 : f32
    %175 = vector.broadcast %cst_86 : f32 to vector<48x128xf32>
    %176 = arith.mulf %172, %175 : vector<48x128xf32>
    %177 = math.erf %176 : vector<48x128xf32>
    %cst_87 = arith.constant 1.000000e+00 : f32
    %178 = vector.broadcast %cst_87 : f32 to vector<48x128xf32>
    %179 = arith.addf %178, %177 : vector<48x128xf32>
    %180 = arith.mulf %174, %179 : vector<48x128xf32>
    %c0_88 = arith.constant 0 : index
    %c0_89 = arith.constant 0 : index
    %181 = vector.load %arg15[%c0_88, %c0_89] : memref<128x32xf32, #tpu.memory_space<vmem>>, vector<128x32xf32>
    %cst_90 = arith.constant dense<0.000000e+00> : vector<48x32xf32>
    %182 = tpu.matmul %180, %181, %cst_90 {dimension_numbers = #tpu.dot_dimension_numbers<[1], [0], [0], [1], [0, 0, 1, 1], [], []>} : vector<48x128xf32>, vector<128x32xf32>, vector<48x32xf32> -> vector<48x32xf32>
    %c0_91 = arith.constant 0 : index
    %c0_92 = arith.constant 0 : index
    %183 = vector.load %arg16[%c0_91, %c0_92] : memref<1x32xf32, #tpu.memory_space<vmem>>, vector<1x32xf32>
    %184 = vector.broadcast %183 : vector<1x32xf32> to vector<48x32xf32>
    %185 = arith.addf %182, %184 : vector<48x32xf32>
    %186 = arith.addf %143, %185 : vector<48x32xf32>
    %c0_93 = arith.constant 0 : index
    %c0_94 = arith.constant 0 : index
    %187 = vector.load %arg17[%c0_93, %c0_94] : memref<1x32xf32, #tpu.memory_space<vmem>>, vector<1x32xf32>
    %c0_95 = arith.constant 0 : index
    %c0_96 = arith.constant 0 : index
    %188 = vector.load %arg18[%c0_95, %c0_96] : memref<1x32xf32, #tpu.memory_space<vmem>>, vector<1x32xf32>
    %cst_97 = arith.constant dense<0.000000e+00> : vector<48xf32>
    %189 = vector.multi_reduction <add>, %186, %cst_97 [1] : vector<48x32xf32> to vector<48xf32>
    %190 = vector.shape_cast %189 : vector<48xf32> to vector<48x1xf32>
    %cst_98 = arith.constant 3.200000e+01 : f32
    %191 = vector.broadcast %cst_98 : f32 to vector<48x1xf32>
    %192 = arith.divf %190, %191 : vector<48x1xf32>
    %193 = vector.broadcast %192 : vector<48x1xf32> to vector<48x32xf32>
    %194 = arith.subf %186, %193 : vector<48x32xf32>
    %195 = arith.mulf %194, %194 : vector<48x32xf32>
    %cst_99 = arith.constant dense<0.000000e+00> : vector<48xf32>
    %196 = vector.multi_reduction <add>, %195, %cst_99 [1] : vector<48x32xf32> to vector<48xf32>
    %197 = vector.shape_cast %196 : vector<48xf32> to vector<48x1xf32>
    %cst_100 = arith.constant 3.200000e+01 : f32
    %198 = vector.broadcast %cst_100 : f32 to vector<48x1xf32>
    %199 = arith.divf %197, %198 : vector<48x1xf32>
    %200 = vector.broadcast %192 : vector<48x1xf32> to vector<48x32xf32>
    %201 = arith.subf %186, %200 : vector<48x32xf32>
    %cst_101 = arith.constant 9.99999997E-7 : f32
    %202 = vector.broadcast %cst_101 : f32 to vector<48x1xf32>
    %203 = arith.addf %199, %202 : vector<48x1xf32>
    %204 = math.rsqrt %203 : vector<48x1xf32>
    %205 = vector.broadcast %204 : vector<48x1xf32> to vector<48x32xf32>
    %206 = arith.mulf %201, %205 : vector<48x32xf32>
    %207 = vector.broadcast %187 : vector<1x32xf32> to vector<48x32xf32>
    %208 = arith.mulf %206, %207 : vector<48x32xf32>
    %209 = vector.broadcast %188 : vector<1x32xf32> to vector<48x32xf32>
    %210 = arith.addf %208, %209 : vector<48x32xf32>
    %c0_102 = arith.constant 0 : index
    %c0_103 = arith.constant 0 : index
    %211 = vector.load %arg19[%c0_102, %c0_103] : memref<32x96xf32, #tpu.memory_space<vmem>>, vector<32x96xf32>
    %cst_104 = arith.constant dense<0.000000e+00> : vector<48x96xf32>
    %212 = tpu.matmul %210, %211, %cst_104 {dimension_numbers = #tpu.dot_dimension_numbers<[1], [0], [0], [1], [0, 0, 1, 1], [], []>} : vector<48x32xf32>, vector<32x96xf32>, vector<48x96xf32> -> vector<48x96xf32>
    %c0_105 = arith.constant 0 : index
    %c0_106 = arith.constant 0 : index
    %213 = vector.load %arg20[%c0_105, %c0_106] : memref<1x96xf32, #tpu.memory_space<vmem>>, vector<1x96xf32>
    %214 = vector.broadcast %213 : vector<1x96xf32> to vector<48x96xf32>
    %215 = arith.addf %212, %214 : vector<48x96xf32>
    %c0_107 = arith.constant 0 : index
    %c0_108 = arith.constant 0 : index
    %216 = vector.load %arg21[%c0_107, %c0_108] : memref<32x32xf32, #tpu.memory_space<vmem>>, vector<32x32xf32>
    %217 = vector.extract_strided_slice %215 {offsets = [0, 0], sizes = [24, 96], strides = [1, 1]} : vector<48x96xf32> to vector<24x96xf32>
    %cst_109 = arith.constant 0.000000e+00 : f32
    %218 = vector.broadcast %cst_109 : f32 to vector<24x32xf32>
    %219 = vector.extract_strided_slice %217 {offsets = [0, 0], sizes = [24, 16], strides = [1, 1]} : vector<24x96xf32> to vector<24x16xf32>
    %220 = vector.extract_strided_slice %217 {offsets = [0, 32], sizes = [24, 16], strides = [1, 1]} : vector<24x96xf32> to vector<24x16xf32>
    %221 = vector.extract_strided_slice %217 {offsets = [0, 64], sizes = [24, 16], strides = [1, 1]} : vector<24x96xf32> to vector<24x16xf32>
    %222 = tpu.transpose %220, [1, 0] : vector<24x16xf32> -> vector<16x24xf32>
    %cst_110 = arith.constant dense<0.000000e+00> : vector<24x24xf32>
    %223 = tpu.matmul %219, %222, %cst_110 {dimension_numbers = #tpu.dot_dimension_numbers<[1], [0], [0], [1], [0, 0, 1, 1], [], []>} : vector<24x16xf32>, vector<16x24xf32>, vector<24x24xf32> -> vector<24x24xf32>
    %224 = arith.addf %223, %26 : vector<24x24xf32>
    %cst_111 = arith.constant dense<0xFF800000> : vector<24xf32>
    %225 = vector.multi_reduction <maximumf>, %224, %cst_111 [1] : vector<24x24xf32> to vector<24xf32>
    %226 = vector.shape_cast %225 : vector<24xf32> to vector<24x1xf32>
    %227 = vector.broadcast %226 : vector<24x1xf32> to vector<24x24xf32>
    %228 = arith.subf %224, %227 : vector<24x24xf32>
    %229 = math.exp %228 : vector<24x24xf32>
    %cst_112 = arith.constant dense<0.000000e+00> : vector<24xf32>
    %230 = vector.multi_reduction <add>, %229, %cst_112 [1] : vector<24x24xf32> to vector<24xf32>
    %231 = vector.shape_cast %230 : vector<24xf32> to vector<24x1xf32>
    %232 = vector.broadcast %231 : vector<24x1xf32> to vector<24x24xf32>
    %233 = arith.divf %229, %232 : vector<24x24xf32>
    %cst_113 = arith.constant dense<0.000000e+00> : vector<24x16xf32>
    %234 = tpu.matmul %233, %221, %cst_113 {dimension_numbers = #tpu.dot_dimension_numbers<[1], [0], [0], [1], [0, 0, 1, 1], [], []>} : vector<24x24xf32>, vector<24x16xf32>, vector<24x16xf32> -> vector<24x16xf32>
    %235 = vector.extract_strided_slice %216 {offsets = [0, 0], sizes = [16, 32], strides = [1, 1]} : vector<32x32xf32> to vector<16x32xf32>
    %cst_114 = arith.constant dense<0.000000e+00> : vector<24x32xf32>
    %236 = tpu.matmul %234, %235, %cst_114 {dimension_numbers = #tpu.dot_dimension_numbers<[1], [0], [0], [1], [0, 0, 1, 1], [], []>} : vector<24x16xf32>, vector<16x32xf32>, vector<24x32xf32> -> vector<24x32xf32>
    %237 = arith.addf %218, %236 : vector<24x32xf32>
    %238 = vector.extract_strided_slice %217 {offsets = [0, 16], sizes = [24, 16], strides = [1, 1]} : vector<24x96xf32> to vector<24x16xf32>
    %239 = vector.extract_strided_slice %217 {offsets = [0, 48], sizes = [24, 16], strides = [1, 1]} : vector<24x96xf32> to vector<24x16xf32>
    %240 = vector.extract_strided_slice %217 {offsets = [0, 80], sizes = [24, 16], strides = [1, 1]} : vector<24x96xf32> to vector<24x16xf32>
    %241 = tpu.transpose %239, [1, 0] : vector<24x16xf32> -> vector<16x24xf32>
    %cst_115 = arith.constant dense<0.000000e+00> : vector<24x24xf32>
    %242 = tpu.matmul %238, %241, %cst_115 {dimension_numbers = #tpu.dot_dimension_numbers<[1], [0], [0], [1], [0, 0, 1, 1], [], []>} : vector<24x16xf32>, vector<16x24xf32>, vector<24x24xf32> -> vector<24x24xf32>
    %243 = arith.addf %242, %26 : vector<24x24xf32>
    %cst_116 = arith.constant dense<0xFF800000> : vector<24xf32>
    %244 = vector.multi_reduction <maximumf>, %243, %cst_116 [1] : vector<24x24xf32> to vector<24xf32>
    %245 = vector.shape_cast %244 : vector<24xf32> to vector<24x1xf32>
    %246 = vector.broadcast %245 : vector<24x1xf32> to vector<24x24xf32>
    %247 = arith.subf %243, %246 : vector<24x24xf32>
    %248 = math.exp %247 : vector<24x24xf32>
    %cst_117 = arith.constant dense<0.000000e+00> : vector<24xf32>
    %249 = vector.multi_reduction <add>, %248, %cst_117 [1] : vector<24x24xf32> to vector<24xf32>
    %250 = vector.shape_cast %249 : vector<24xf32> to vector<24x1xf32>
    %251 = vector.broadcast %250 : vector<24x1xf32> to vector<24x24xf32>
    %252 = arith.divf %248, %251 : vector<24x24xf32>
    %cst_118 = arith.constant dense<0.000000e+00> : vector<24x16xf32>
    %253 = tpu.matmul %252, %240, %cst_118 {dimension_numbers = #tpu.dot_dimension_numbers<[1], [0], [0], [1], [0, 0, 1, 1], [], []>} : vector<24x24xf32>, vector<24x16xf32>, vector<24x16xf32> -> vector<24x16xf32>
    %254 = vector.extract_strided_slice %216 {offsets = [16, 0], sizes = [16, 32], strides = [1, 1]} : vector<32x32xf32> to vector<16x32xf32>
    %cst_119 = arith.constant dense<0.000000e+00> : vector<24x32xf32>
    %255 = tpu.matmul %253, %254, %cst_119 {dimension_numbers = #tpu.dot_dimension_numbers<[1], [0], [0], [1], [0, 0, 1, 1], [], []>} : vector<24x16xf32>, vector<16x32xf32>, vector<24x32xf32> -> vector<24x32xf32>
    %256 = arith.addf %237, %255 : vector<24x32xf32>
    %c0_120 = arith.constant 0 : index
    %c0_121 = arith.constant 0 : index
    %257 = vector.load %arg39[%c0_120, %c0_121] : memref<48x32xf32, #tpu.memory_space<vmem>>, vector<24x32xf32>
    tpu.vector_store %arg39[%c0_120, %c0_121], %256 {strides = array<i32>} : memref<48x32xf32, #tpu.memory_space<vmem>>, vector<24x32xf32>,
    %258 = vector.extract_strided_slice %215 {offsets = [24, 0], sizes = [24, 96], strides = [1, 1]} : vector<48x96xf32> to vector<24x96xf32>
    %cst_122 = arith.constant 0.000000e+00 : f32
    %259 = vector.broadcast %cst_122 : f32 to vector<24x32xf32>
    %260 = vector.extract_strided_slice %258 {offsets = [0, 0], sizes = [24, 16], strides = [1, 1]} : vector<24x96xf32> to vector<24x16xf32>
    %261 = vector.extract_strided_slice %258 {offsets = [0, 32], sizes = [24, 16], strides = [1, 1]} : vector<24x96xf32> to vector<24x16xf32>
    %262 = vector.extract_strided_slice %258 {offsets = [0, 64], sizes = [24, 16], strides = [1, 1]} : vector<24x96xf32> to vector<24x16xf32>
    %263 = tpu.transpose %261, [1, 0] : vector<24x16xf32> -> vector<16x24xf32>
    %cst_123 = arith.constant dense<0.000000e+00> : vector<24x24xf32>
    %264 = tpu.matmul %260, %263, %cst_123 {dimension_numbers = #tpu.dot_dimension_numbers<[1], [0], [0], [1], [0, 0, 1, 1], [], []>} : vector<24x16xf32>, vector<16x24xf32>, vector<24x24xf32> -> vector<24x24xf32>
    %265 = arith.addf %264, %26 : vector<24x24xf32>
    %cst_124 = arith.constant dense<0xFF800000> : vector<24xf32>
    %266 = vector.multi_reduction <maximumf>, %265, %cst_124 [1] : vector<24x24xf32> to vector<24xf32>
    %267 = vector.shape_cast %266 : vector<24xf32> to vector<24x1xf32>
    %268 = vector.broadcast %267 : vector<24x1xf32> to vector<24x24xf32>
    %269 = arith.subf %265, %268 : vector<24x24xf32>
    %270 = math.exp %269 : vector<24x24xf32>
    %cst_125 = arith.constant dense<0.000000e+00> : vector<24xf32>
    %271 = vector.multi_reduction <add>, %270, %cst_125 [1] : vector<24x24xf32> to vector<24xf32>
    %272 = vector.shape_cast %271 : vector<24xf32> to vector<24x1xf32>
    %273 = vector.broadcast %272 : vector<24x1xf32> to vector<24x24xf32>
    %274 = arith.divf %270, %273 : vector<24x24xf32>
    %cst_126 = arith.constant dense<0.000000e+00> : vector<24x16xf32>
    %275 = tpu.matmul %274, %262, %cst_126 {dimension_numbers = #tpu.dot_dimension_numbers<[1], [0], [0], [1], [0, 0, 1, 1], [], []>} : vector<24x24xf32>, vector<24x16xf32>, vector<24x16xf32> -> vector<24x16xf32>
    %276 = vector.extract_strided_slice %216 {offsets = [0, 0], sizes = [16, 32], strides = [1, 1]} : vector<32x32xf32> to vector<16x32xf32>
    %cst_127 = arith.constant dense<0.000000e+00> : vector<24x32xf32>
    %277 = tpu.matmul %275, %276, %cst_127 {dimension_numbers = #tpu.dot_dimension_numbers<[1], [0], [0], [1], [0, 0, 1, 1], [], []>} : vector<24x16xf32>, vector<16x32xf32>, vector<24x32xf32> -> vector<24x32xf32>
    %278 = arith.addf %259, %277 : vector<24x32xf32>
    %279 = vector.extract_strided_slice %258 {offsets = [0, 16], sizes = [24, 16], strides = [1, 1]} : vector<24x96xf32> to vector<24x16xf32>
    %280 = vector.extract_strided_slice %258 {offsets = [0, 48], sizes = [24, 16], strides = [1, 1]} : vector<24x96xf32> to vector<24x16xf32>
    %281 = vector.extract_strided_slice %258 {offsets = [0, 80], sizes = [24, 16], strides = [1, 1]} : vector<24x96xf32> to vector<24x16xf32>
    %282 = tpu.transpose %280, [1, 0] : vector<24x16xf32> -> vector<16x24xf32>
    %cst_128 = arith.constant dense<0.000000e+00> : vector<24x24xf32>
    %283 = tpu.matmul %279, %282, %cst_128 {dimension_numbers = #tpu.dot_dimension_numbers<[1], [0], [0], [1], [0, 0, 1, 1], [], []>} : vector<24x16xf32>, vector<16x24xf32>, vector<24x24xf32> -> vector<24x24xf32>
    %284 = arith.addf %283, %26 : vector<24x24xf32>
    %cst_129 = arith.constant dense<0xFF800000> : vector<24xf32>
    %285 = vector.multi_reduction <maximumf>, %284, %cst_129 [1] : vector<24x24xf32> to vector<24xf32>
    %286 = vector.shape_cast %285 : vector<24xf32> to vector<24x1xf32>
    %287 = vector.broadcast %286 : vector<24x1xf32> to vector<24x24xf32>
    %288 = arith.subf %284, %287 : vector<24x24xf32>
    %289 = math.exp %288 : vector<24x24xf32>
    %cst_130 = arith.constant dense<0.000000e+00> : vector<24xf32>
    %290 = vector.multi_reduction <add>, %289, %cst_130 [1] : vector<24x24xf32> to vector<24xf32>
    %291 = vector.shape_cast %290 : vector<24xf32> to vector<24x1xf32>
    %292 = vector.broadcast %291 : vector<24x1xf32> to vector<24x24xf32>
    %293 = arith.divf %289, %292 : vector<24x24xf32>
    %cst_131 = arith.constant dense<0.000000e+00> : vector<24x16xf32>
    %294 = tpu.matmul %293, %281, %cst_131 {dimension_numbers = #tpu.dot_dimension_numbers<[1], [0], [0], [1], [0, 0, 1, 1], [], []>} : vector<24x24xf32>, vector<24x16xf32>, vector<24x16xf32> -> vector<24x16xf32>
    %295 = vector.extract_strided_slice %216 {offsets = [16, 0], sizes = [16, 32], strides = [1, 1]} : vector<32x32xf32> to vector<16x32xf32>
    %cst_132 = arith.constant dense<0.000000e+00> : vector<24x32xf32>
    %296 = tpu.matmul %294, %295, %cst_132 {dimension_numbers = #tpu.dot_dimension_numbers<[1], [0], [0], [1], [0, 0, 1, 1], [], []>} : vector<24x16xf32>, vector<16x32xf32>, vector<24x32xf32> -> vector<24x32xf32>
    %297 = arith.addf %278, %296 : vector<24x32xf32>
    %c24_133 = arith.constant 24 : index
    %c0_134 = arith.constant 0 : index
    %298 = vector.load %arg39[%c24_133, %c0_134] : memref<48x32xf32, #tpu.memory_space<vmem>>, vector<24x32xf32>
    tpu.vector_store %arg39[%c24_133, %c0_134], %297 {strides = array<i32>} : memref<48x32xf32, #tpu.memory_space<vmem>>, vector<24x32xf32>,
    %c0_135 = arith.constant 0 : index
    %c0_136 = arith.constant 0 : index
    %299 = vector.load %arg39[%c0_135, %c0_136] : memref<48x32xf32, #tpu.memory_space<vmem>>, vector<48x32xf32>
    %300 = arith.addf %186, %299 : vector<48x32xf32>
    %c0_137 = arith.constant 0 : index
    %c0_138 = arith.constant 0 : index
    %301 = vector.load %arg22[%c0_137, %c0_138] : memref<1x32xf32, #tpu.memory_space<vmem>>, vector<1x32xf32>
    %302 = vector.broadcast %301 : vector<1x32xf32> to vector<48x32xf32>
    %303 = arith.addf %300, %302 : vector<48x32xf32>
    %c0_139 = arith.constant 0 : index
    %c0_140 = arith.constant 0 : index
    %304 = vector.load %arg23[%c0_139, %c0_140] : memref<1x32xf32, #tpu.memory_space<vmem>>, vector<1x32xf32>
    %c0_141 = arith.constant 0 : index
    %c0_142 = arith.constant 0 : index
    %305 = vector.load %arg24[%c0_141, %c0_142] : memref<1x32xf32, #tpu.memory_space<vmem>>, vector<1x32xf32>
    %cst_143 = arith.constant dense<0.000000e+00> : vector<48xf32>
    %306 = vector.multi_reduction <add>, %303, %cst_143 [1] : vector<48x32xf32> to vector<48xf32>
    %307 = vector.shape_cast %306 : vector<48xf32> to vector<48x1xf32>
    %cst_144 = arith.constant 3.200000e+01 : f32
    %308 = vector.broadcast %cst_144 : f32 to vector<48x1xf32>
    %309 = arith.divf %307, %308 : vector<48x1xf32>
    %310 = vector.broadcast %309 : vector<48x1xf32> to vector<48x32xf32>
    %311 = arith.subf %303, %310 : vector<48x32xf32>
    %312 = arith.mulf %311, %311 : vector<48x32xf32>
    %cst_145 = arith.constant dense<0.000000e+00> : vector<48xf32>
    %313 = vector.multi_reduction <add>, %312, %cst_145 [1] : vector<48x32xf32> to vector<48xf32>
    %314 = vector.shape_cast %313 : vector<48xf32> to vector<48x1xf32>
    %cst_146 = arith.constant 3.200000e+01 : f32
    %315 = vector.broadcast %cst_146 : f32 to vector<48x1xf32>
    %316 = arith.divf %314, %315 : vector<48x1xf32>
    %317 = vector.broadcast %309 : vector<48x1xf32> to vector<48x32xf32>
    %318 = arith.subf %303, %317 : vector<48x32xf32>
    %cst_147 = arith.constant 9.99999997E-7 : f32
    %319 = vector.broadcast %cst_147 : f32 to vector<48x1xf32>
    %320 = arith.addf %316, %319 : vector<48x1xf32>
    %321 = math.rsqrt %320 : vector<48x1xf32>
    %322 = vector.broadcast %321 : vector<48x1xf32> to vector<48x32xf32>
    %323 = arith.mulf %318, %322 : vector<48x32xf32>
    %324 = vector.broadcast %304 : vector<1x32xf32> to vector<48x32xf32>
    %325 = arith.mulf %323, %324 : vector<48x32xf32>
    %326 = vector.broadcast %305 : vector<1x32xf32> to vector<48x32xf32>
    %327 = arith.addf %325, %326 : vector<48x32xf32>
    %c0_148 = arith.constant 0 : index
    %c0_149 = arith.constant 0 : index
    %328 = vector.load %arg25[%c0_148, %c0_149] : memref<32x128xf32, #tpu.memory_space<vmem>>, vector<32x128xf32>
    %cst_150 = arith.constant dense<0.000000e+00> : vector<48x128xf32>
    %329 = tpu.matmul %327, %328, %cst_150 {dimension_numbers = #tpu.dot_dimension_numbers<[1], [0], [0], [1], [0, 0, 1, 1], [], []>} : vector<48x32xf32>, vector<32x128xf32>, vector<48x128xf32> -> vector<48x128xf32>
    %c0_151 = arith.constant 0 : index
    %c0_152 = arith.constant 0 : index
    %330 = vector.load %arg26[%c0_151, %c0_152] : memref<1x128xf32, #tpu.memory_space<vmem>>, vector<1x128xf32>
    %331 = vector.broadcast %330 : vector<1x128xf32> to vector<48x128xf32>
    %332 = arith.addf %329, %331 : vector<48x128xf32>
    %cst_153 = arith.constant 5.000000e-01 : f32
    %333 = vector.broadcast %cst_153 : f32 to vector<48x128xf32>
    %334 = arith.mulf %333, %332 : vector<48x128xf32>
    %cst_154 = arith.constant 0.707106769 : f32
    %335 = vector.broadcast %cst_154 : f32 to vector<48x128xf32>
    %336 = arith.mulf %332, %335 : vector<48x128xf32>
    %337 = math.erf %336 : vector<48x128xf32>
    %cst_155 = arith.constant 1.000000e+00 : f32
    %338 = vector.broadcast %cst_155 : f32 to vector<48x128xf32>
    %339 = arith.addf %338, %337 : vector<48x128xf32>
    %340 = arith.mulf %334, %339 : vector<48x128xf32>
    %c0_156 = arith.constant 0 : index
    %c0_157 = arith.constant 0 : index
    %341 = vector.load %arg27[%c0_156, %c0_157] : memref<128x32xf32, #tpu.memory_space<vmem>>, vector<128x32xf32>
    %cst_158 = arith.constant dense<0.000000e+00> : vector<48x32xf32>
    %342 = tpu.matmul %340, %341, %cst_158 {dimension_numbers = #tpu.dot_dimension_numbers<[1], [0], [0], [1], [0, 0, 1, 1], [], []>} : vector<48x128xf32>, vector<128x32xf32>, vector<48x32xf32> -> vector<48x32xf32>
    %c0_159 = arith.constant 0 : index
    %c0_160 = arith.constant 0 : index
    %343 = vector.load %arg28[%c0_159, %c0_160] : memref<1x32xf32, #tpu.memory_space<vmem>>, vector<1x32xf32>
    %344 = vector.broadcast %343 : vector<1x32xf32> to vector<48x32xf32>
    %345 = arith.addf %342, %344 : vector<48x32xf32>
    %346 = arith.addf %303, %345 : vector<48x32xf32>
    %c0_161 = arith.constant 0 : index
    %c0_162 = arith.constant 0 : index
    %347 = vector.load %arg29[%c0_161, %c0_162] : memref<1x32xf32, #tpu.memory_space<vmem>>, vector<1x32xf32>
    %c0_163 = arith.constant 0 : index
    %c0_164 = arith.constant 0 : index
    %348 = vector.load %arg30[%c0_163, %c0_164] : memref<1x32xf32, #tpu.memory_space<vmem>>, vector<1x32xf32>
    %cst_165 = arith.constant dense<0.000000e+00> : vector<48xf32>
    %349 = vector.multi_reduction <add>, %346, %cst_165 [1] : vector<48x32xf32> to vector<48xf32>
    %350 = vector.shape_cast %349 : vector<48xf32> to vector<48x1xf32>
    %cst_166 = arith.constant 3.200000e+01 : f32
    %351 = vector.broadcast %cst_166 : f32 to vector<48x1xf32>
    %352 = arith.divf %350, %351 : vector<48x1xf32>
    %353 = vector.broadcast %352 : vector<48x1xf32> to vector<48x32xf32>
    %354 = arith.subf %346, %353 : vector<48x32xf32>
    %355 = arith.mulf %354, %354 : vector<48x32xf32>
    %cst_167 = arith.constant dense<0.000000e+00> : vector<48xf32>
    %356 = vector.multi_reduction <add>, %355, %cst_167 [1] : vector<48x32xf32> to vector<48xf32>
    %357 = vector.shape_cast %356 : vector<48xf32> to vector<48x1xf32>
    %cst_168 = arith.constant 3.200000e+01 : f32
    %358 = vector.broadcast %cst_168 : f32 to vector<48x1xf32>
    %359 = arith.divf %357, %358 : vector<48x1xf32>
    %360 = vector.broadcast %352 : vector<48x1xf32> to vector<48x32xf32>
    %361 = arith.subf %346, %360 : vector<48x32xf32>
    %cst_169 = arith.constant 9.99999997E-7 : f32
    %362 = vector.broadcast %cst_169 : f32 to vector<48x1xf32>
    %363 = arith.addf %359, %362 : vector<48x1xf32>
    %364 = math.rsqrt %363 : vector<48x1xf32>
    %365 = vector.broadcast %364 : vector<48x1xf32> to vector<48x32xf32>
    %366 = arith.mulf %361, %365 : vector<48x32xf32>
    %367 = vector.broadcast %347 : vector<1x32xf32> to vector<48x32xf32>
    %368 = arith.mulf %366, %367 : vector<48x32xf32>
    %369 = vector.broadcast %348 : vector<1x32xf32> to vector<48x32xf32>
    %370 = arith.addf %368, %369 : vector<48x32xf32>
    %c0_170 = arith.constant 0 : index
    %c0_171 = arith.constant 0 : index
    %371 = vector.load %arg31[%c0_170, %c0_171] : memref<32x32xf32, #tpu.memory_space<vmem>>, vector<32x32xf32>
    %cst_172 = arith.constant dense<0.000000e+00> : vector<48x32xf32>
    %372 = tpu.matmul %370, %371, %cst_172 {dimension_numbers = #tpu.dot_dimension_numbers<[1], [0], [0], [1], [0, 0, 1, 1], [], []>} : vector<48x32xf32>, vector<32x32xf32>, vector<48x32xf32> -> vector<48x32xf32>
    %c0_173 = arith.constant 0 : index
    %c0_174 = arith.constant 0 : index
    %373 = vector.load %arg32[%c0_173, %c0_174] : memref<1x32xf32, #tpu.memory_space<vmem>>, vector<1x32xf32>
    %374 = vector.broadcast %373 : vector<1x32xf32> to vector<48x32xf32>
    %375 = arith.addf %372, %374 : vector<48x32xf32>
    %c0_175 = arith.constant 0 : index
    %c0_176 = arith.constant 0 : index
    %376 = vector.load %arg33[%c0_175, %c0_176] : memref<1x32xf32, #tpu.memory_space<vmem>>, vector<1x32xf32>
    %c0_177 = arith.constant 0 : index
    %c0_178 = arith.constant 0 : index
    %377 = vector.load %arg34[%c0_177, %c0_178] : memref<1x32xf32, #tpu.memory_space<vmem>>, vector<1x32xf32>
    %cst_179 = arith.constant dense<0.000000e+00> : vector<48xf32>
    %378 = vector.multi_reduction <add>, %375, %cst_179 [1] : vector<48x32xf32> to vector<48xf32>
    %379 = vector.shape_cast %378 : vector<48xf32> to vector<48x1xf32>
    %cst_180 = arith.constant 3.200000e+01 : f32
    %380 = vector.broadcast %cst_180 : f32 to vector<48x1xf32>
    %381 = arith.divf %379, %380 : vector<48x1xf32>
    %382 = vector.broadcast %381 : vector<48x1xf32> to vector<48x32xf32>
    %383 = arith.subf %375, %382 : vector<48x32xf32>
    %384 = arith.mulf %383, %383 : vector<48x32xf32>
    %cst_181 = arith.constant dense<0.000000e+00> : vector<48xf32>
    %385 = vector.multi_reduction <add>, %384, %cst_181 [1] : vector<48x32xf32> to vector<48xf32>
    %386 = vector.shape_cast %385 : vector<48xf32> to vector<48x1xf32>
    %cst_182 = arith.constant 3.200000e+01 : f32
    %387 = vector.broadcast %cst_182 : f32 to vector<48x1xf32>
    %388 = arith.divf %386, %387 : vector<48x1xf32>
    %389 = vector.broadcast %381 : vector<48x1xf32> to vector<48x32xf32>
    %390 = arith.subf %375, %389 : vector<48x32xf32>
    %cst_183 = arith.constant 9.99999974E-6 : f32
    %391 = vector.broadcast %cst_183 : f32 to vector<48x1xf32>
    %392 = arith.addf %388, %391 : vector<48x1xf32>
    %393 = math.rsqrt %392 : vector<48x1xf32>
    %394 = vector.broadcast %393 : vector<48x1xf32> to vector<48x32xf32>
    %395 = arith.mulf %390, %394 : vector<48x32xf32>
    %396 = vector.broadcast %376 : vector<1x32xf32> to vector<48x32xf32>
    %397 = arith.mulf %395, %396 : vector<48x32xf32>
    %398 = vector.broadcast %377 : vector<1x32xf32> to vector<48x32xf32>
    %399 = arith.addf %397, %398 : vector<48x32xf32>
    %c0_184 = arith.constant 0 : index
    %c0_185 = arith.constant 0 : index
    %400 = vector.load %arg35[%c0_184, %c0_185] : memref<32x8xf32, #tpu.memory_space<vmem>>, vector<32x8xf32>
    %cst_186 = arith.constant dense<0.000000e+00> : vector<48x8xf32>
    %401 = tpu.matmul %399, %400, %cst_186 {dimension_numbers = #tpu.dot_dimension_numbers<[1], [0], [0], [1], [0, 0, 1, 1], [], []>} : vector<48x32xf32>, vector<32x8xf32>, vector<48x8xf32> -> vector<48x8xf32>
    %c0_187 = arith.constant 0 : index
    %c0_188 = arith.constant 0 : index
    %402 = vector.load %arg36[%c0_187, %c0_188] : memref<1x8xf32, #tpu.memory_space<vmem>>, vector<1x8xf32>
    %403 = vector.broadcast %402 : vector<1x8xf32> to vector<48x8xf32>
    %404 = arith.addf %401, %403 : vector<48x8xf32>
    %405 = vector.extract_strided_slice %404 {offsets = [16, 0], sizes = [1, 8], strides = [1, 1]} : vector<48x8xf32> to vector<1x8xf32>
    %c0_189 = arith.constant 0 : index
    %c0_190 = arith.constant 0 : index
    %406 = vector.load %arg37[%c0_189, %c0_190] : memref<2x8xf32, #tpu.memory_space<vmem>>, vector<1x8xf32>
    tpu.vector_store %arg37[%c0_189, %c0_190], %405 {strides = array<i32>} : memref<2x8xf32, #tpu.memory_space<vmem>>, vector<1x8xf32>,
    %407 = vector.extract_strided_slice %404 {offsets = [40, 0], sizes = [1, 8], strides = [1, 1]} : vector<48x8xf32> to vector<1x8xf32>
    %c1 = arith.constant 1 : index
    %c0_191 = arith.constant 0 : index
    %408 = vector.load %arg37[%c1, %c0_191] : memref<2x8xf32, #tpu.memory_space<vmem>>, vector<1x8xf32>
    tpu.vector_store %arg37[%c1, %c0_191], %407 {strides = array<i32>} : memref<2x8xf32, #tpu.memory_space<vmem>>, vector<1x8xf32>,
    return
  }
}

</mosaic_0001>

<bundles_post_ra>
// kernel: forward.1
= control target key start
LH: loop header
LB: loop body
LE: loop exit
PB: predicated region body
PF: predicated region fallthrough
CT: control target
= control target key end

     0   :  { %s6213_s6 = smov 1   ;;  %s6214_s10 = smov 2   ;;  %s7499_s0 = inlined_call_operand.smem [shape: u32[38], index: -1, kind: input, shape index: {}] }
   0x1   :  { %s6268_s5 = sld [smem:[%s7499_s0]]   ;;  %s6215_s14 = smov 3  }
   0x2   :  { %s6273_s9 = sld [smem:[%s7499_s0 + %s6213_s6]]   ;;  %s6216_s18 = smov 4  }
   0x3   :  { %s6278_s13 = sld [smem:[%s7499_s0 + %s6214_s10]]   ;;  %s6217_s22 = smov 5  }
   0x4   :  { %s6283_s17 = sld [smem:[%s7499_s0 + %s6215_s14]]   ;;  %s6218_s26 = smov 6  }
   0x5   :  { %s6288_s21 = sld [smem:[%s7499_s0 + %s6216_s18]]   ;;  %s6219_s30 = smov 7  }
   0x6   :  { %s6293_s25 = sld [smem:[%s7499_s0 + %s6217_s22]]   ;;  %s6220_s4 = smov 8  }
   0x7   :  { %s6298_s29 = sld [smem:[%s7499_s0 + %s6218_s26]]   ;;  %s6221_s10 = smov 9  }
   0x8   :  { %s6303_s3 = sld [smem:[%s7499_s0 + %s6219_s30]]   ;;  %s6222_s15 = smov 10  }
   0x9   :  { %s6308_s8 = sld [smem:[%s7499_s0 + %s6220_s4]]   ;;  %s6223_s20 = smov 11  }
   0xa   :  { %s6313_s14 = sld [smem:[%s7499_s0 + %s6221_s10]]   ;;  %s6224_s26 = smov 12  }
   0xb   :  { %s6318_s19 = sld [smem:[%s7499_s0 + %s6222_s15]]   ;;  %s6225_s1 = smov 13  }
   0xc   :  { %s6323_s24 = sld [smem:[%s7499_s0 + %s6223_s20]]   ;;  %s6226_s7 = smov 14  }
   0xd   :  { %s6328_s30 = sld [smem:[%s7499_s0 + %s6224_s26]]   ;;  %s6227_s15 = smov 15  }
   0xe   :  { %s6333_s6 = sld [smem:[%s7499_s0 + %s6225_s1]]   ;;  %s6228_s22 = smov 16  }
   0xf   :  { %s6338_s12 = sld [smem:[%s7499_s0 + %s6226_s7]]   ;;  %s6229_s28 = smov 17  }
  0x10   :  { %s6343_s20 = sld [smem:[%s7499_s0 + %s6227_s15]]   ;;  %s6230_s7 = smov 18  }
  0x11   :  { %s6348_s27 = sld [smem:[%s7499_s0 + %s6228_s22]]   ;;  %s6231_s15 = smov 19  }
  0x12   :  { %s6353_s4 = sld [smem:[%s7499_s0 + %s6229_s28]]   ;;  %s6232_s22 = smov 20  }
  0x13   :  { %s6233_s28 = smov 21  }
  0x15   :  { %7506 = sst [smem:[#allocation7_spill]] %s6338_s12 }
  0x16   :  { %7507 = sst [smem:[#allocation8_spill]] %s6343_s20 }
  0x17   :  { %7508 = sst [smem:[#allocation9_spill]] %s6348_s27 }
  0x18   :  { %7509 = sst [smem:[#allocation10_spill]] %s6353_s4 }
  0x19   :  { %s6358_s12 = sld [smem:[%s7499_s0 + %s6230_s7]]   ;;  %s6234_s7 = smov 22  }
  0x1a   :  { %s6363_s20 = sld [smem:[%s7499_s0 + %s6231_s15]]   ;;  %s6235_s15 = smov 23  }
  0x1b   :  { %s6368_s27 = sld [smem:[%s7499_s0 + %s6232_s22]]   ;;  %s6236_s22 = smov 24  }
  0x1c   :  { %s6373_s4 = sld [smem:[%s7499_s0 + %s6233_s28]]   ;;  %s6237_s28 = smov 25  }
  0x1f   :  { %7510 = sst [smem:[#allocation11_spill]] %s6358_s12 }
  0x20   :  { %7511 = sst [smem:[#allocation12_spill]] %s6363_s20 }
  0x21   :  { %7512 = sst [smem:[#allocation13_spill]] %s6368_s27 }
  0x22   :  { %7513 = sst [smem:[#allocation14_spill]] %s6373_s4 }
  0x23   :  { %s6378_s12 = sld [smem:[%s7499_s0 + %s6234_s7]]   ;;  %s6238_s7 = smov 26  }
  0x24   :  { %s6383_s20 = sld [smem:[%s7499_s0 + %s6235_s15]]   ;;  %s6239_s15 = smov 27  }
  0x25   :  { %s6388_s27 = sld [smem:[%s7499_s0 + %s6236_s22]]   ;;  %s6240_s22 = smov 28  }
  0x26   :  { %s6393_s4 = sld [smem:[%s7499_s0 + %s6237_s28]]   ;;  %s6241_s28 = smov 29  }
  0x29   :  { %7514 = sst [smem:[#allocation15_spill]] %s6378_s12 }
  0x2a   :  { %7515 = sst [smem:[#allocation16_spill]] %s6383_s20 }
  0x2b   :  { %7516 = sst [smem:[#allocation17_spill]] %s6388_s27 }
  0x2c   :  { %7517 = sst [smem:[#allocation18_spill]] %s6393_s4 }
  0x2d   :  { %s6398_s12 = sld [smem:[%s7499_s0 + %s6238_s7]]   ;;  %s6242_s7 = smov 30  }
  0x2e   :  { %s6403_s20 = sld [smem:[%s7499_s0 + %s6239_s15]]   ;;  %s6243_s15 = smov 31  }
  0x2f   :  { %s6408_s27 = sld [smem:[%s7499_s0 + %s6240_s22]]   ;;  %s6244_s22 = smov 32  }
  0x30   :  { %s6413_s4 = sld [smem:[%s7499_s0 + %s6241_s28]]   ;;  %s6245_s28 = smov 33  }
  0x33   :  { %7518 = sst [smem:[#allocation19_spill]] %s6398_s12 }
  0x34   :  { %7519 = sst [smem:[#allocation20_spill]] %s6403_s20 }
  0x35   :  { %7520 = sst [smem:[#allocation21_spill]] %s6408_s27 }
  0x36   :  { %7521 = sst [smem:[#allocation22_spill]] %s6413_s4 }
  0x37   :  { %s6418_s12 = sld [smem:[%s7499_s0 + %s6242_s7]]   ;;  %s6246_s7 = smov 34  }
  0x38   :  { %s6423_s20 = sld [smem:[%s7499_s0 + %s6243_s15]]   ;;  %s6247_s15 = smov 35  }
  0x39   :  { %s6428_s27 = sld [smem:[%s7499_s0 + %s6244_s22]]   ;;  %s6248_s22 = smov 36  }
  0x3a   :  { %s6433_s4 = sld [smem:[%s7499_s0 + %s6245_s28]]   ;;  %s6249_s28 = smov 37  }
  0x3d   :  { %7522 = sst [smem:[#allocation23_spill]] %s6418_s12 }
  0x3e   :  { %7523 = sst [smem:[#allocation24_spill]] %s6423_s20 }
  0x3f   :  { %7524 = sst [smem:[#allocation25_spill]] %s6428_s27 }
  0x40   :  { %7525 = sst [smem:[#allocation26_spill]] %s6433_s4 }
  0x41   :  { %s6438_s12 = sld [smem:[%s7499_s0 + %s6246_s7]]  }
  0x42   :  { %s6443_s20 = sld [smem:[%s7499_s0 + %s6247_s15]]  }
  0x43   :  { %s6448_s27 = sld [smem:[%s7499_s0 + %s6248_s22]]  }
  0x44   :  { %s6453_s4 = sld [smem:[%s7499_s0 + %s6249_s28]]  }
  0x45   :  { %v159_v0 = vld [vmem:[%s6273_s9] sm:$0xff]  ;;  %v160_v1 = vld [vmem:[%s6273_s9 + $0x8] sm:$0xff]  ;;  %v161_v2 = vld [vmem:[%s6273_s9 + $0x10] sm:$0xff]  ;;  %vm172_vm0 = vcmask 392192  }
  0x46   :  { %v5638_v3 = vpack.c.bf16 %v160_v1, %v159_v0  ;;  %v162_v4 = vld [vmem:[%s6273_s9 + $0x18] sm:$0xff]  ;;  %v163_v6 = vld [vmem:[%s6273_s9 + $0x20] sm:$0xff]  ;;  %v164_v7 = vld [vmem:[%s6273_s9 + $0x28] sm:$0xff] }
  0x47   :  { %v5642_v5 = vpack.c.bf16 %v162_v4, %v161_v2  ;;  %v155_v8 = vld [vmem:[%s6268_s5] sm:$0xff] }
  0x48   :  { %5639 = vmatprep.subr.bf16.mxu0 %v5638_v3  ;;  %5104 = vmatprep.mubr.msk.f32.mxu0 %vm172_vm0, %v155_v8 }
  0x49   :  { %80 = vsyncpa [#allocation5], 0  ;;  %5641 = vmatpush3.bf16.msra.mxu0 %v5638_v3  ;;  %v5646_v9 = vpack.c.bf16 %v164_v7, %v163_v6  ;;  %v156_v10 = vld [vmem:[%s6268_s5 + $0x8] sm:$0xff]  ;;  %v157_v11 = vld [vmem:[%s6268_s5 + $0x10] sm:$0xff]  ;;  %vm270_vm1 = vcmask 261120   ;;  %v6250_v13 = vmov 0.0  }
  0x4a   :  { %5643 = vmatprep.subr.bf16.mxu0 %v5642_v5  ;;  %v158_v12 = vld [vmem:[%s6268_s5 + $0x18] sm:$0xff]  ;;  %272 = vst.msk [vmem:[#allocation2 + $0x8] sm:$0xff] %vm270_vm1, %v6250_v13  ;;  %271 = vst.msk [vmem:[#allocation2] sm:$0xff] %vm270_vm1, %v6250_v13  ;;  %v283_v14 = vld [vmem:[%s6283_s17] sm:$0x1]  ;;  %vm284_vm2 = vcmask 253952  }
  0x4b   :  { %273 = vst.msk [vmem:[#allocation2 + $0x10] sm:$0xff] %vm270_vm1, %v6250_v13  ;;  %274 = vst.msk [vmem:[#allocation2 + $0x18] sm:$0xff] %vm270_vm1, %v6250_v13  ;;  %v4683_v17 = vld [vmem:[%s6278_s13] ss:$0 sm:$0xff]  ;;  %v278_v19 = vld [vmem:[%s6288_s21 + $0x8] sm:$0xff]  ;;  %s6252_s0 = smov 96  }
  0x4c   :  { %275 = vst.msk [vmem:[#allocation2 + $0x20] sm:$0xff] %vm270_vm1, %v6250_v13  ;;  %276 = vst.msk [vmem:[#allocation2 + $0x28] sm:$0xff] %vm270_vm1, %v6250_v13  ;;  %v277_v22 = vld [vmem:[%s6288_s21] sm:$0xff]  ;;  %v410_v0 = vld [vmem:[%s6303_s3 + $0x8] sm:$0xff]  ;;  %vm6253_vm3 = vmmov 0   ;;  %vm546_vm4 = vcmask 130048  }
  0x4d   :  { %5645 = vmatpush3.bf16.msra.mxu0 %v5642_v5  ;;  %285 = vst.msk [vmem:[#allocation2 + $0x10] sm:$0x1] %vm284_vm2, %v283_v14  ;;  %v292_v38 = vld [vmem:[%s6283_s17] sm:$0x1]  ;;  %v411_v2 = vld [vmem:[%s6303_s3 + $0x10] sm:$0xff]  ;;  %v412_v3 = vld [vmem:[%s6303_s3 + $0x18] sm:$0xff] }
  0x4e   :  { %5647 = vmatprep.subr.bf16.mxu0 %v5646_v9  ;;  %293 = vst.msk [vmem:[#allocation2 + $0x28] sm:$0x1] %vm284_vm2, %v292_v38  ;;  %v409_v63 = vld [vmem:[%s6303_s3] sm:$0xff]  ;;  %v5654_v4 = vpack.c.bf16 %v412_v3, %v411_v2  ;;  %vm6569_vm5 = vmpackc.low %vm546_vm4, %vm546_vm4  ;;  %vm639_vm7 = vcmask 195584   ;;  %s6255_s5 = smov 64   ;;  %s6256_s9 = smov 80  }
  0x4f   :  { %v5650_v1 = vpack.c.bf16 %v410_v0, %v409_v63  ;;  %v6542_v63 = vld [vmem:[%s6308_s8] ss:$0 sm:$0xff]  ;;  %s6257_s13 = smov 112   ;;  %s6258_s17 = smov 48   ;;  %vm4629_vm8 = vcmask 57344  }
  0x50   :  { %s7528_s21 = sld [smem:[#allocation8_spill]]  ;;  %s7531_s3 = sld [smem:[#allocation12_spill]] }
  0x51   :  { %5649 = vmatpush3.bf16.msra.mxu0 %v5646_v9  ;;  %5651 = vmatprep.subr.bf16.mxu1 %v5650_v1  ;;  %s7532_s8 = sld [smem:[#allocation10_spill]]  ;;  %s7538_s7 = sld [smem:[#allocation16_spill]] }
  0x52   :  { %5653 = vmatpush3.bf16.msra.mxu1 %v5650_v1  ;;  %s7539_s10 = sld [smem:[#allocation17_spill]]  ;;  %s7540_s11 = sld [smem:[#allocation20_spill]] }
  0x53   :  { %5655 = vmatprep.subr.bf16.mxu1 %v5654_v4  ;;  %s7541_s15 = sld [smem:[#allocation19_spill]]  ;;  %s7542_s16 = sld [smem:[#allocation21_spill]] }
  0x54   :  { %5105 = vmatmul.mubr.msk.f32.vlgmr.msra.gmra.mrb[0].mxu0 %vm172_vm0, %v156_v10  ;;  %v296_v15 = vld [vmem:[#allocation2 + $0x10] sm:$0xff]  ;;  %s7543_s18 = sld [smem:[#allocation24_spill]]  ;;  %s7544_s22 = sld [smem:[#allocation22_spill]] }
  0x55   :  { %5107 = vmatprep.mubr.msk.f32.mxu0 %vm172_vm0, %v157_v11  ;;  %v312_v16 = vsel %vm270_vm1, %v296_v15, 0.0  ;;  %v299_v59 = vld [vmem:[#allocation2 + $0x28] sm:$0xff]  ;;  %s7545_s23 = sld [smem:[#allocation23_spill]]  ;;  %s7546_s26 = sld [smem:[#allocation25_spill]] }
  0x56   :  { %313 = vadd.xlane.f32.xlu1 %v312_v16  ;;  %v321_v62 = vsel %vm270_vm1, %v299_v59, 0.0  ;;  %5657 = vmatpush3.bf16.msra.mxu1 %v5654_v4 }
  0x58   :  { %5108 = vmatmul.mubr.msk.f32.gmra.mrb[2].mxu0 %vm172_vm0, %v158_v12 }
  0x59   :  { %5148 = vmatprep.mubr.msk.f32.mxu0 %vm6253_vm3, %v6250_v13 }
  0xe3   :  { %v314_v39 = vpop.xlane.xlu1 %313 }
  0xe4   :  { %v327_v40 = vmul.f32 0.03125, %v314_v39 }
  0xe6   :  { %v6502_v42 = vsub.f32 %v296_v15, %v327_v40 }
  0xe8   :  { %v339_v50 = vmul.f32 %v6502_v42, %v6502_v42 }
  0xea   :  { %v349_v54 = vsel %vm270_vm1, %v339_v50, 0.0 }
 0x127   :  { %v5106_v18 = vpop.f32.mrb[0].mxu0 }
 0x128   :  { %v257_v20 = vadd.f32 %v5106_v18, %v4683_v17  ;;  %v251_v21 = vpop.f32.mrb[1].mxu0 }
 0x129   :  { %v252_v23 = vadd.f32 %v4683_v17, %v251_v21 }
 0x12a   :  { %v280_v24 = vadd.f32 %v278_v19, %v257_v20 }
 0x12b   :  { %v279_v25 = vadd.f32 %v277_v22, %v252_v23  ;;  %v5109_v26 = vpop.f32.mrb[2].mxu0 }
 0x12c   :  { %282 = vst.msk [vmem:[#allocation2 + $0x8] sm:$0xff] %vm270_vm1, %v280_v24  ;;  %v267_v27 = vadd.f32 %v5109_v26, %v4683_v17  ;;  %v261_v28 = vpop.f32.mrb[3].mxu0 }
 0x12d   :  { %281 = vst.msk [vmem:[#allocation2] sm:$0xff] %vm270_vm1, %v279_v25  ;;  %v262_v29 = vadd.f32 %v4683_v17, %v261_v28 }
 0x12e   :  { %v289_v30 = vadd.f32 %v278_v19, %v267_v27  ;;  %v4688_v27 = vld [vmem:[%s6293_s25] ss:$0 sm:$0xff]  ;;  %s7529_s25 = sld [smem:[#allocation7_spill]] }
 0x12f   :  { %v288_v31 = vadd.f32 %v277_v22, %v262_v29 }
 0x130   :  { %291 = vst.msk [vmem:[#allocation2 + $0x20] sm:$0xff] %vm270_vm1, %v289_v30  ;;  %v4689_v30 = vld [vmem:[%s6298_s29] ss:$0 sm:$0xff]  ;;  %s7530_s29 = sld [smem:[#allocation9_spill]] }
 0x131   :  { %290 = vst.msk [vmem:[#allocation2 + $0x18] sm:$0xff] %vm270_vm1, %v288_v31 }
 0x133   :  { %v6495_v34 = vld [vmem:[#allocation2 + $0x8] sm:$0xff] }
 0x134   :  { %v6491_v32 = vld [vmem:[#allocation2] sm:$0xff]  ;;  %v309_v37 = vsel %vm270_vm1, %v6495_v34, 0.0 }
 0x135   :  { %v306_v33 = vsel %vm270_vm1, %v6491_v32, 0.0 }
 0x136   :  { %307 = vadd.xlane.f32.xlu0 %v306_v33 }
 0x137   :  { %v298_v58 = vld [vmem:[#allocation2 + $0x20] sm:$0xff] }
 0x138   :  { %v297_v35 = vld [vmem:[#allocation2 + $0x18] sm:$0xff]  ;;  %v318_v60 = vsel %vm270_vm1, %v298_v58, 0.0 }
 0x139   :  { %v315_v36 = vsel %vm270_vm1, %v297_v35, 0.0 }
 0x13a   :  { %316 = vadd.xlane.f32.xlu1 %v315_v36  ;;  %310 = vadd.xlane.f32.xlu0 %v309_v37 }
 0x1c3   :  { %v308_v41 = vpop.xlane.xlu0 %307 }
 0x1c4   :  { %v325_v43 = vmul.f32 0.03125, %v308_v41 }
 0x1c6   :  { %v331_v44 = vsub.f32 %v6491_v32, %v325_v43 }
 0x1c7   :  { %v317_v45 = vpop.xlane.xlu1 %316  ;;  %v311_v46 = vpop.xlane.xlu0 %310 }
 0x1c8   :  { %v328_v47 = vmul.f32 0.03125, %v317_v45  ;;  %v326_v48 = vmul.f32 0.03125, %v311_v46  ;;  %v337_v49 = vmul.f32 %v331_v44, %v331_v44 }
 0x1ca   :  { %v6507_v51 = vsub.f32 %v297_v35, %v328_v47  ;;  %v6510_v52 = vsub.f32 %v6495_v34, %v326_v48  ;;  %v343_v53 = vsel %vm270_vm1, %v337_v49, 0.0 }
 0x1cb   :  { %344 = vadd.xlane.f32.xlu0 %v343_v53 }
 0x1cc   :  { %v338_v55 = vmul.f32 %v6510_v52, %v6510_v52  ;;  %v340_v57 = vmul.f32 %v6507_v51, %v6507_v51 }
 0x1ce   :  { %v346_v56 = vsel %vm270_vm1, %v338_v55, 0.0  ;;  %v352_v61 = vsel %vm270_vm1, %v340_v57, 0.0 }
 0x1cf   :  { %350 = vadd.xlane.f32.xlu0 %v349_v54  ;;  %347 = vadd.xlane.f32.xlu1 %v346_v56 }
 0x1d3   :  { %319 = vadd.xlane.f32.xlu0 %v318_v60  ;;  %353 = vadd.xlane.f32.xlu1 %v352_v61 }
 0x1d7   :  { %322 = vadd.xlane.f32.xlu1 %v321_v62  ;;  %v6251_v62 = vmov 0.0|0.0  }
 0x1d8   :  { %5658 = vmatprep.subr.bf16.mxu1 %v6251_v62  ;;  %5662 = vmatprep.subr.bf16.mxu0 %v6251_v62 }
 0x258   :  { %v345_v5 = vpop.xlane.xlu0 %344 }
 0x259   :  { %v361_v6 = vmul.f32 0.03125, %v345_v5 }
 0x25b   :  { %v367_v7 = vadd.f32 1e-06, %v361_v6 }
 0x25c   :  { %v348_v8 = vpop.xlane.xlu1 %347  ;;  %v351_v9 = vpop.xlane.xlu0 %350 }
 0x25d   :  { %5993 = vrsqrt.f32 %v367_v7  ;;  %v362_v10 = vmul.f32 0.03125, %v348_v8  ;;  %v363_v11 = vmul.f32 0.03125, %v351_v9 }
 0x25f   :  { %v368_v12 = vadd.f32 1e-06, %v362_v10  ;;  %v369_v14 = vadd.f32 1e-06, %v363_v11 }
 0x260   :  { %v354_v15 = vpop.xlane.xlu1 %353  ;;  %v320_v16 = vpop.xlane.xlu0 %319 }
 0x261   :  { %5995 = vrsqrt.f32 %v368_v12  ;;  %v364_v17 = vmul.f32 0.03125, %v354_v15  ;;  %v329_v18 = vmul.f32 0.03125, %v320_v16 }
 0x262   :  { %5997 = vrsqrt.f32 %v369_v14 }
 0x263   :  { %v370_v19 = vadd.f32 1e-06, %v364_v17  ;;  %v335_v20 = vsub.f32 %v298_v58, %v329_v18  ;;  %v300_v17 = vlaneseq }
 0x264   :  { %v323_v21 = vpop.xlane.xlu1 %322 }
 0x265   :  { %5999 = vrsqrt.f32 %v370_v19  ;;  %v330_v22 = vmul.f32 0.03125, %v323_v21  ;;  %v341_v23 = vmul.f32 %v335_v20, %v335_v20  ;;  %v301_v18 = vand.u32 127, %v300_v17 }
 0x266   :  { %v6254_v19 = vmov -1e+30  }
 0x267   :  { %v5994_v24 = vpop.eup %5993  ;;  %v336_v25 = vsub.f32 %v299_v59, %v330_v22  ;;  %v355_v26 = vsel %vm270_vm1, %v341_v23, 0.0  ;;  %vm302_vm6 = vcmp.lt.s32.totalorder %v301_v18, 17 }
 0x268   :  { %356 = vadd.xlane.f32.xlu0 %v355_v26  ;;  %v379_v28 = vmul.f32 %v5994_v24, %v331_v44 }
 0x269   :  { %v342_v29 = vmul.f32 %v336_v25, %v336_v25 }
 0x26a   :  { %v391_v31 = vmul.f32 %v4688_v27, %v379_v28 }
 0x26b   :  { %v5996_v33 = vpop.eup %5995  ;;  %v358_v35 = vsel %vm270_vm1, %v342_v29, 0.0 }
 0x26c   :  { %v5998_v36 = vpop.eup %5997  ;;  %359 = vadd.xlane.f32.xlu1 %v358_v35  ;;  %v403_v37 = vadd.f32 %v4689_v30, %v391_v31  ;;  %v380_v38 = vmul.f32 %v5996_v33, %v6510_v52 }
 0x26d   :  { %v381_v39 = vmul.f32 %v5998_v36, %v6502_v42 }
 0x26e   :  { %5118 = vmatprep.mubr.msk.f32.mxu1 %vm270_vm1, %v403_v37  ;;  %v392_v40 = vmul.f32 %v4688_v27, %v380_v38 }
 0x26f   :  { %v6000_v41 = vpop.eup %5999  ;;  %v393_v43 = vmul.f32 %v4688_v27, %v381_v39 }
 0x270   :  { %v404_v45 = vadd.f32 %v4689_v30, %v392_v40  ;;  %v382_v44 = vmul.f32 %v6000_v41, %v6507_v51 }
 0x271   :  { %v405_v46 = vadd.f32 %v4689_v30, %v393_v43 }
 0x272   :  { %5119 = vmatmul.mubr.msk.f32.vlgmr.msra.gmra.mrb[0].mxu1 %vm270_vm1, %v404_v45  ;;  %v394_v47 = vmul.f32 %v4688_v27, %v382_v44 }
 0x273   :  { %5121 = vmatprep.mubr.msk.f32.mxu1 %vm270_vm1, %v405_v46 }
 0x274   :  { %v406_v48 = vadd.f32 %v4689_v30, %v394_v47 }
 0x276   :  { %5122 = vmatmul.mubr.msk.f32.gmra.mrb[2].mxu1 %vm270_vm1, %v406_v48 }
 0x2f5   :  { %v357_v49 = vpop.xlane.xlu0 %356 }
 0x2f6   :  { %v365_v50 = vmul.f32 0.03125, %v357_v49 }
 0x2f8   :  { %v371_v42 = vadd.f32 1e-06, %v365_v50 }
 0x2f9   :  { %v360_v52 = vpop.xlane.xlu1 %359 }
 0x2fa   :  { %6001 = vrsqrt.f32 %v371_v42  ;;  %v366_v53 = vmul.f32 0.03125, %v360_v52 }
 0x2fc   :  { %v372_v54 = vadd.f32 1e-06, %v366_v53 }
 0x2fe   :  { %6003 = vrsqrt.f32 %v372_v54 }
 0x304   :  { %v6002_v55 = vpop.eup %6001 }
 0x305   :  { %v383_v51 = vmul.f32 %v6002_v55, %v335_v20  ;;  %v6594_v20 = vsel %vm302_vm6, 0.0, %v6254_v19 }
 0x307   :  { %v395_v56 = vmul.f32 %v4688_v27, %v383_v51 }
 0x308   :  { %v6004_v57 = vpop.eup %6003 }
 0x309   :  { %v407_v58 = vadd.f32 %v4689_v30, %v395_v56  ;;  %v384_v59 = vmul.f32 %v6004_v57, %v336_v25 }
 0x30b   :  { %5124 = vmatprep.mubr.msk.f32.mxu1 %vm270_vm1, %v407_v58  ;;  %v396_v60 = vmul.f32 %v4688_v27, %v384_v59 }
 0x30d   :  { %v408_v61 = vadd.f32 %v4689_v30, %v396_v60 }
 0x30f   :  { %5125 = vmatmul.mubr.msk.f32.gmra.mrb[4].mxu1 %vm270_vm1, %v408_v61 }
 0x310   :  { %5133 = vmatprep.mubr.msk.f32.mxu1 %vm6253_vm3, %v6250_v13 }
 0x345   :  { %v5120_v0 = vpop.f32.mrb[0].mxu1 }
 0x346   :  { %v6545_v1 = vadd.f32 %v5120_v0, %v6542_v63  ;;  %v504_v2 = vpop.f32.mrb[1].mxu1 }
 0x347   :  { %v6548_v3 = vadd.f32 %v6542_v63, %v504_v2 }
 0x349   :  { %v6550_v4 = vpop.f32.mrb[2].mxu1  ;;  %v6554_v5 = vpack.i.bf16 %v6545_v1, %v6548_v3 }
 0x34a   :  { %v514_v6 = vpop.f32.mrb[3].mxu1 }
 0x34b   :  { %v6557_v7 = vadd.f32 %v6542_v63, %v514_v6  ;;  %5914 = vrot.lane.b32.xlu0 %v6554_v5, %s6252_s0 }
 0x34d   :  { %544 = vrot.lane.b32.xlu1 %v6557_v7, %s6252_s0 }
 0x3bd   :  { %v5915_v8 = vpop.permute.xlu0 %5914 }
 0x3be   :  { %v5917_v9 = vunpack.i.h.bf16 %v5915_v8  ;;  %v5916_v10 = vunpack.i.l.bf16 %v5915_v8 }
 0x3bf   :  { %v545_v14 = vpop.permute.xlu1 %544 }
 0x3c0   :  { %v5659_v12 = vpack.c.bf16 %v5917_v9, %v5916_v10 }
 0x3c2   :  { %5661 = vmatpush3.bf16.xpose.msk.msra.mxu1 %vm6569_vm5, %v5659_v12 }
 0x3c3   :  { %5131 = vmatprep.subr.mxu1 %v6250_v13 }
 0x3ca   :  { %5132 = vmatpush3.xpose.msk.msra.mxu1 %vm546_vm4, %v545_v14 }
 0x3cb   :  { %5669 = vmatprep.subr.bf16.mxu1 %v6251_v62 }
 0x3cd   :  { %5134 = vmatmul.mubr.msk.f32.vlgmr.msra.gmra.mrb[6].mxu1 %vm546_vm4, %v6548_v3 }
 0x3ce   :  { %5136 = vmatprep.mubr.msk.f32.mxu1 %vm6253_vm3, %v6250_v13 }
 0x3d1   :  { %5137 = vmatmul.mubr.msk.f32.gmra.mrb[8].mxu1 %vm546_vm4, %v6545_v1 }
 0x3d2   :  { %5139 = vmatprep.mubr.msk.f32.mxu1 %vm6253_vm3, %v6250_v13 }
 0x3d5   :  { %5140 = vmatmul.mubr.msk.f32.gmra.mrb[10].mxu1 %vm546_vm4, %v6557_v7 }
 0x3d6   :  { %5178 = vmatprep.mubr.msk.f32.mxu1 %vm6253_vm3, %v6250_v13 }
 0x3e2   :  { %v6590_v15 = vpop.f32.mrb[4].mxu1 }
 0x3e3   :  { %v6592_v16 = vpop.f32.mrb[5].mxu1 }
 0x4a0   :  { %v625_v21 = vpop.f32.mrb[6].mxu1 }
 0x4a1   :  { %v626_v22 = vadd.f32 %v625_v21, %v6594_v20  ;;  %v5135_v23 = vpop.f32.mrb[7].mxu1 }
 0x4a3   :  { %v640_v24 = vsel %vm639_vm7, %v626_v22, -inf }
 0x4a4   :  { %641 = vmax.xlane.f32.xlu1 %v640_v24  ;;  %v630_v25 = vpop.f32.mrb[8].mxu1 }
 0x4a5   :  { %v631_v26 = vadd.f32 %v630_v25, %v6594_v20  ;;  %v5138_v27 = vpop.f32.mrb[9].mxu1 }
 0x4a7   :  { %v643_v28 = vsel %vm639_vm7, %v631_v26, -inf }
 0x4a8   :  { %644 = vmax.xlane.f32.xlu0 %v643_v28  ;;  %v635_v29 = vpop.f32.mrb[10].mxu1 }
 0x4a9   :  { %v636_v30 = vadd.f32 %v635_v29, %v6594_v20  ;;  %v5141_v31 = vpop.f32.mrb[11].mxu1 }
 0x4ab   :  { %v646_v33 = vsel %vm639_vm7, %v636_v30, -inf }
 0x4ac   :  { %647 = vmax.xlane.f32.xlu0 %v646_v33 }
 0x531   :  { %v642_v35 = vpop.xlane.xlu1 %641 }
 0x532   :  { %v649_v36 = vsub.f32 %v626_v22, %v642_v35 }
 0x534   :  { %v652_v37 = vmul.f32 1.442695, %v649_v36 }
 0x535   :  { %v645_v38 = vpop.xlane.xlu0 %644 }
 0x536   :  { %6005 = vpow2.f32 %v652_v37  ;;  %v650_v39 = vsub.f32 %v631_v26, %v645_v38 }
 0x538   :  { %v654_v40 = vmul.f32 1.442695, %v650_v39 }
 0x539   :  { %v648_v46 = vpop.xlane.xlu0 %647 }
 0x53a   :  { %6007 = vpow2.f32 %v654_v40  ;;  %v651_v47 = vsub.f32 %v636_v30, %v648_v46 }
 0x53c   :  { %v656_v48 = vmul.f32 1.442695, %v651_v47 }
 0x53e   :  { %6009 = vpow2.f32 %v656_v48 }
 0x540   :  { %v6006_v41 = vpop.eup %6005 }
 0x541   :  { %v658_v43 = vsel %vm639_vm7, %v6006_v41, 0.0 }
 0x542   :  { %659 = vadd.xlane.f32.xlu1 %v658_v43 }
 0x544   :  { %v6008_v45 = vpop.eup %6007 }
 0x545   :  { %v661_v44 = vsel %vm639_vm7, %v6008_v45, 0.0 }
 0x546   :  { %662 = vadd.xlane.f32.xlu0 %v661_v44 }
 0x548   :  { %v6010_v49 = vpop.eup %6009 }
 0x549   :  { %v664_v50 = vsel %vm639_vm7, %v6010_v49, 0.0 }
 0x553   :  { %677 = vrot.lane.b32.xlu1 %v6557_v7, %s6255_s5 }
 0x557   :  { %5924 = vrot.lane.b32.xlu1 %v6554_v5, %s6256_s9 }
 0x55b   :  { %781 = vrot.lane.b32.xlu1 %v6557_v7, %s6256_s9 }
 0x55c   :  { %5919 = vrot.lane.b32.xlu0 %v6554_v5, %s6255_s5 }
 0x560   :  { %771 = vrot.lane.b32.xlu0 %v6548_v3, %s6257_s13 }
 0x564   :  { %775 = vrot.lane.b32.xlu0 %v6557_v7, %s6257_s13 }
 0x57f   :  { %665 = vadd.xlane.f32.xlu1 %v664_v50 }
 0x590   :  { %773 = vrot.lane.b32.xlu1 %v6545_v1, %s6257_s13 }
 0x5cf   :  { %v660_v42 = vpop.xlane.xlu1 %659 }
 0x5d0   :  { %6011 = vrcp.f32 %v660_v42 }
 0x5d3   :  { %v663_v52 = vpop.xlane.xlu0 %662  ;;  %v678_v54 = vpop.permute.xlu1 %677 }
 0x5d4   :  { %6013 = vrcp.f32 %v663_v52 }
 0x5d7   :  { %v5920_v53 = vpop.permute.xlu0 %5919  ;;  %v5925_v58 = vpop.permute.xlu1 %5924 }
 0x5d8   :  { %v5922_v55 = vunpack.i.h.bf16 %v5920_v53  ;;  %v5921_v51 = vunpack.i.l.bf16 %v5920_v53  ;;  %v5927_v61 = vunpack.i.h.bf16 %v5925_v58  ;;  %v5926_v0 = vunpack.i.l.bf16 %v5925_v58 }
 0x5da   :  { %v5663_v56 = vpack.c.bf16 %v5922_v55, %v5921_v51  ;;  %v6012_v57 = vpop.eup %6011  ;;  %v5666_v2 = vpack.c.bf16 %v5927_v61, %v5926_v0  ;;  %v520_v55 = vadd.f32 %v6550_v4, %v6542_v63  ;;  %v536_v4 = vld [vmem:[%s6313_s14 + $0x18] sm:$0xff] }
 0x5db   :  { %v668_v59 = vmul.f32 %v6012_v57, %v6006_v41  ;;  %v782_v3 = vpop.permute.xlu1 %781  ;;  %v772_v10 = vpop.permute.xlu0 %771 }
 0x5dc   :  { %5664 = vmatpush3.bf16.msra.mxu0 %v5663_v56  ;;  %v6671_v56 = vadd.f32 %v6590_v15, %v6542_v63 }
 0x5dd   :  { %5146 = vmatprep.subr.mxu0 %v6250_v13 }
 0x5de   :  { %v6014_v60 = vpop.eup %6013 }
 0x5df   :  { %v670_v1 = vmul.f32 %v6014_v60, %v6008_v45  ;;  %v776_v14 = vpop.permute.xlu0 %775 }
 0x5e0   :  { %5147 = vmatpush3.msra.mxu0 %v678_v54  ;;  %v525_v54 = vadd.f32 %v6542_v63, %v6592_v16  ;;  %v535_v63 = vld [vmem:[%s6313_s14 + $0x10] sm:$0xff] }
 0x5e1   :  { %5149 = vmatmul.mubr.msk.f32.vlgmr.msra.gmra.mrb[4].mxu0 %vm639_vm7, %v668_v59  ;;  %5665 = vmatprep.subr.bf16.mxu0 %v6251_v62 }
 0x5e2   :  { %5151 = vmatprep.mubr.msk.f32.mxu0 %vm6253_vm3, %v6250_v13  ;;  %v6665_v51 = vpack.i.bf16 %v525_v54, %v520_v55 }
 0x5e5   :  { %5152 = vmatmul.mubr.msk.f32.gmra.mrb[6].mxu0 %vm639_vm7, %v670_v1 }
 0x5e6   :  { %5154 = vmatprep.mubr.msk.f32.mxu0 %vm6253_vm3, %v6250_v13 }
 0x5e7   :  { %5668 = vmatpush3.bf16.xpose.msk.msra.mxu0 %vm6569_vm5, %v5666_v2 }
 0x5e8   :  { %5161 = vmatprep.subr.mxu0 %v6250_v13 }
 0x5ef   :  { %5162 = vmatpush3.xpose.msk.msra.mxu0 %vm546_vm4, %v782_v3 }
 0x5f0   :  { %5672 = vmatprep.subr.bf16.mxu0 %v6251_v62 }
 0x60c   :  { %v666_v6 = vpop.xlane.xlu1 %665 }
 0x60d   :  { %6015 = vrcp.f32 %v666_v6 }
 0x610   :  { %v774_v12 = vpop.permute.xlu1 %773 }
 0x617   :  { %v6016_v8 = vpop.eup %6015 }
 0x618   :  { %v672_v9 = vmul.f32 %v6016_v8, %v6010_v49 }
 0x61a   :  { %5155 = vmatmul.mubr.msk.f32.gmra.mrb[8].mxu0 %vm639_vm7, %v672_v9 }
 0x61b   :  { %5163 = vmatprep.mubr.msk.f32.mxu0 %vm6253_vm3, %v6250_v13 }
 0x61e   :  { %5164 = vmatmul.mubr.msk.f32.vlgmr.msra.gmra.mrb[10].mxu0 %vm546_vm4, %v772_v10 }
 0x61f   :  { %5166 = vmatprep.mubr.msk.f32.mxu0 %vm6253_vm3, %v6250_v13 }
 0x622   :  { %5167 = vmatmul.mubr.msk.f32.gmra.mrb[12].mxu0 %vm546_vm4, %v774_v12 }
 0x623   :  { %5169 = vmatprep.mubr.msk.f32.mxu0 %vm6253_vm3, %v6250_v13 }
 0x626   :  { %5170 = vmatmul.mubr.msk.f32.gmra.mrb[14].mxu0 %vm546_vm4, %v776_v14 }
 0x627   :  { %5191 = vmatprep.mubr.msk.f32.mxu0 %vm6253_vm3, %v6250_v13 }
 0x6b4   :  { %v6644_v17 = vpop.f32.mrb[4].mxu0 }
 0x6b5   :  { %v5150_v18 = vpop.f32.mrb[5].mxu0 }
 0x6b8   :  { %v6646_v19 = vpop.f32.mrb[6].mxu0 }
 0x6b9   :  { %v5153_v21 = vpop.f32.mrb[7].mxu0 }
 0x6ba   :  { %v533_v21 = vld [vmem:[%s6313_s14] sm:$0xff] }
 0x6ed   :  { %v6648_v22 = vpop.f32.mrb[8].mxu0 }
 0x6ee   :  { %v5156_v23 = vpop.f32.mrb[9].mxu0 }
 0x6ef   :  { %v534_v23 = vld [vmem:[%s6313_s14 + $0x8] sm:$0xff]  ;;  %s7533_s14 = sld [smem:[#allocation11_spill]] }
 0x6f1   :  { %v861_v24 = vpop.f32.mrb[10].mxu0 }
 0x6f2   :  { %v862_v25 = vadd.f32 %v861_v24, %v6594_v20  ;;  %v5165_v26 = vpop.f32.mrb[11].mxu0  ;;  %v6719_v24 = vpack.c.bf16 %v534_v23, %v533_v21 }
 0x6f4   :  { %v875_v27 = vsel %vm639_vm7, %v862_v25, -inf }
 0x6f5   :  { %876 = vmax.xlane.f32.xlu1 %v875_v27  ;;  %v866_v28 = vpop.f32.mrb[12].mxu0 }
 0x6f6   :  { %v867_v29 = vadd.f32 %v866_v28, %v6594_v20  ;;  %v5168_v30 = vpop.f32.mrb[13].mxu0 }
 0x6f8   :  { %v878_v31 = vsel %vm639_vm7, %v867_v29, -inf }
 0x6f9   :  { %879 = vmax.xlane.f32.xlu0 %v878_v31  ;;  %v871_v33 = vpop.f32.mrb[14].mxu0 }
 0x6fa   :  { %v872_v35 = vadd.f32 %v871_v33, %v6594_v20  ;;  %v5171_v36 = vpop.f32.mrb[15].mxu0 }
 0x6fc   :  { %v881_v37 = vsel %vm639_vm7, %v872_v35, -inf }
 0x6fd   :  { %882 = vmax.xlane.f32.xlu0 %v881_v37 }
 0x782   :  { %v877_v38 = vpop.xlane.xlu1 %876 }
 0x783   :  { %v884_v39 = vsub.f32 %v862_v25, %v877_v38 }
 0x785   :  { %v887_v40 = vmul.f32 1.442695, %v884_v39 }
 0x786   :  { %v880_v41 = vpop.xlane.xlu0 %879 }
 0x787   :  { %6017 = vpow2.f32 %v887_v40  ;;  %v885_v43 = vsub.f32 %v867_v29, %v880_v41 }
 0x789   :  { %v889_v45 = vmul.f32 1.442695, %v885_v43 }
 0x78a   :  { %v883_v44 = vpop.xlane.xlu0 %882 }
 0x78b   :  { %6019 = vpow2.f32 %v889_v45  ;;  %v886_v46 = vsub.f32 %v872_v35, %v883_v44 }
 0x78d   :  { %v891_v47 = vmul.f32 1.442695, %v886_v46 }
 0x78f   :  { %6021 = vpow2.f32 %v891_v47 }
 0x791   :  { %v6018_v48 = vpop.eup %6017 }
 0x792   :  { %v893_v49 = vsel %vm639_vm7, %v6018_v48, 0.0 }
 0x793   :  { %894 = vadd.xlane.f32.xlu0 %v893_v49 }
 0x795   :  { %v6020_v50 = vpop.eup %6019 }
 0x796   :  { %v896_v42 = vsel %vm639_vm7, %v6020_v50, 0.0 }
 0x797   :  { %897 = vadd.xlane.f32.xlu1 %v896_v42 }
 0x799   :  { %v6022_v52 = vpop.eup %6021 }
 0x79a   :  { %v899_v53 = vsel %vm639_vm7, %v6022_v52, 0.0 }
 0x79b   :  { %900 = vadd.xlane.f32.xlu0 %v899_v53 }
 0x7a8   :  { %5929 = vrot.lane.b32.xlu1 %v6554_v5, %s6258_s17  ;;  %v6687_v5 = vpack.c.bf16 %v536_v4, %v535_v63 }
 0x7aa   :  { %5674 = vmatpush3.bf16.msra.mxu0 %v6687_v5 }
 0x7ab   :  { %5675 = vmatprep.subr.bf16.mxu0 %v6251_v62 }
 0x7ac   :  { %5934 = vrot.lane.b32.xlu1 %v6665_v51, %s6252_s0 }
 0x7b0   :  { %1194 = vrot.lane.b32.xlu1 %v6671_v56, %s6252_s0 }
 0x7b1   :  { %912 = vrot.lane.b32.xlu0 %v6557_v7, %s6258_s17 }
 0x7b4   :  { %5939 = vrot.lane.b32.xlu1 %v6665_v51, %s6256_s9 }
 0x7b5   :  { %1429 = vrot.lane.b32.xlu0 %v6671_v56, %s6256_s9 }
 0x7b8   :  { %1419 = vrot.lane.b32.xlu1 %v520_v55, %s6257_s13 }
 0x7b9   :  { %1421 = vrot.lane.b32.xlu0 %v525_v54, %s6257_s13 }
 0x7bc   :  { %1423 = vrot.lane.b32.xlu1 %v6671_v56, %s6257_s13 }
 0x820   :  { %v895_v7 = vpop.xlane.xlu0 %894 }
 0x821   :  { %6023 = vrcp.f32 %v895_v7 }
 0x824   :  { %v898_v15 = vpop.xlane.xlu1 %897 }
 0x825   :  { %6025 = vrcp.f32 %v898_v15 }
 0x828   :  { %v5930_v16 = vpop.permute.xlu1 %5929  ;;  %v901_v57 = vpop.xlane.xlu0 %900 }
 0x829   :  { %v5932_v58 = vunpack.i.h.bf16 %v5930_v16  ;;  %v5931_v59 = vunpack.i.l.bf16 %v5930_v16  ;;  %6027 = vrcp.f32 %v901_v57 }
 0x82b   :  { %v5670_v60 = vpack.c.bf16 %v5932_v58, %v5931_v59  ;;  %v6024_v61 = vpop.eup %6023 }
 0x82c   :  { %v5935_v0 = vpop.permute.xlu1 %5934  ;;  %v903_v1 = vmul.f32 %v6024_v61, %v6018_v48  ;;  %v913_v2 = vpop.permute.xlu0 %912 }
 0x82d   :  { %5671 = vmatpush3.bf16.msra.mxu1 %v5670_v60  ;;  %v5937_v6 = vunpack.i.h.bf16 %v5935_v0  ;;  %v5936_v8 = vunpack.i.l.bf16 %v5935_v0 }
 0x82e   :  { %5176 = vmatprep.subr.mxu1 %v6250_v13 }
 0x82f   :  { %v6026_v3 = vpop.eup %6025  ;;  %v5679_v12 = vpack.c.bf16 %v5937_v6, %v5936_v8 }
 0x830   :  { %v905_v9 = vmul.f32 %v6026_v3, %v6020_v50  ;;  %v1195_v18 = vpop.permute.xlu1 %1194  ;;  %v1430_v40 = vpop.permute.xlu0 %1429 }
 0x831   :  { %5177 = vmatpush3.msra.mxu1 %v913_v2 }
 0x832   :  { %5179 = vmatmul.mubr.msk.f32.vlgmr.msra.gmra.mrb[12].mxu1 %vm639_vm7, %v903_v1  ;;  %5678 = vmatprep.subr.bf16.mxu1 %v6251_v62 }
 0x833   :  { %5181 = vmatprep.mubr.msk.f32.mxu1 %vm6253_vm3, %v6250_v13  ;;  %v6028_v10 = vpop.eup %6027 }
 0x834   :  { %v907_v14 = vmul.f32 %v6028_v10, %v6022_v52  ;;  %v5940_v28 = vpop.permute.xlu1 %5939  ;;  %v1422_v48 = vpop.permute.xlu0 %1421 }
 0x835   :  { %v5942_v30 = vunpack.i.h.bf16 %v5940_v28  ;;  %v5941_v31 = vunpack.i.l.bf16 %v5940_v28 }
 0x836   :  { %5182 = vmatmul.mubr.msk.f32.gmra.mrb[14].mxu1 %vm639_vm7, %v905_v9 }
 0x837   :  { %5184 = vmatprep.mubr.msk.f32.mxu1 %vm6253_vm3, %v6250_v13  ;;  %v5686_v36 = vpack.c.bf16 %v5942_v30, %v5941_v31 }
 0x838   :  { %5681 = vmatpush3.bf16.xpose.msk.msra.mxu1 %vm6569_vm5, %v5679_v12  ;;  %v1420_v45 = vpop.permute.xlu1 %1419 }
 0x839   :  { %5217 = vmatprep.subr.mxu1 %v6250_v13 }
 0x83a   :  { %5185 = vmatmul.mubr.msk.f32.gmra.mrb[16].mxu1 %vm639_vm7, %v907_v14 }
 0x83b   :  { %5219 = vmatprep.mubr.msk.f32.mxu1 %vm6253_vm3, %v6250_v13 }
 0x83c   :  { %v1424_v50 = vpop.permute.xlu1 %1423 }
 0x840   :  { %5218 = vmatpush3.xpose.msk.msra.mxu1 %vm546_vm4, %v1195_v18 }
 0x841   :  { %5682 = vmatprep.subr.bf16.mxu1 %v6251_v62 }
 0x843   :  { %5220 = vmatmul.mubr.msk.f32.vlgmr.msra.gmra.mrb[18].mxu1 %vm546_vm4, %v520_v55 }
 0x844   :  { %5222 = vmatprep.mubr.msk.f32.mxu1 %vm6253_vm3, %v6250_v13 }
 0x847   :  { %5223 = vmatmul.mubr.msk.f32.gmra.mrb[20].mxu1 %vm546_vm4, %v525_v54 }
 0x848   :  { %5225 = vmatprep.mubr.msk.f32.mxu1 %vm6253_vm3, %v6250_v13 }
 0x84b   :  { %5226 = vmatmul.mubr.msk.f32.gmra.mrb[22].mxu1 %vm546_vm4, %v6671_v56 }
 0x84c   :  { %5234 = vmatprep.mubr.msk.f32.mxu1 %vm6253_vm3, %v6250_v13 }
 0x905   :  { %v992_v25 = vpop.f32.mrb[12].mxu1 }
 0x906   :  { %v5180_v26 = vpop.f32.mrb[13].mxu1  ;;  %5192 = vmatmul.mubr.msk.f32.vlgmr.msra.gmra.mrb[16].mxu0 %vm546_vm4, %v992_v25 }
 0x907   :  { %5194 = vmatprep.mubr.msk.f32.mxu0 %vm6253_vm3, %v6250_v13  ;;  %5677 = vmatpush3.bf16.msra.mxu0 %v6719_v24 }
 0x908   :  { %5685 = vmatprep.subr.bf16.mxu0 %v6251_v62 }
 0x909   :  { %v997_v27 = vpop.f32.mrb[14].mxu1 }
 0x90a   :  { %v5183_v29 = vpop.f32.mrb[15].mxu1  ;;  %5195 = vmatmul.mubr.msk.f32.gmra.mrb[18].mxu0 %vm546_vm4, %v997_v27 }
 0x90b   :  { %5197 = vmatprep.mubr.msk.f32.mxu0 %vm6253_vm3, %v6250_v13 }
 0x90d   :  { %v1002_v33 = vpop.f32.mrb[16].mxu1 }
 0x90e   :  { %v5186_v35 = vpop.f32.mrb[17].mxu1  ;;  %5198 = vmatmul.mubr.msk.f32.gmra.mrb[20].mxu0 %vm546_vm4, %v1002_v33 }
 0x90f   :  { %5204 = vmatprep.mubr.msk.f32.mxu0 %vm6253_vm3, %v6250_v13 }
 0x912   :  { %5205 = vmatmul.mubr.msk.f32.vlgmr.msra.gmra.mrb[16].mxu0 %vm546_vm4, %v6644_v17 }
 0x913   :  { %5688 = vmatpush3.bf16.xpose.msk.msra.mxu0 %vm6569_vm5, %v5686_v36  ;;  %5207 = vmatprep.mubr.msk.f32.mxu0 %vm6253_vm3, %v6250_v13 }
 0x914   :  { %5247 = vmatprep.subr.mxu0 %v6250_v13 }
 0x916   :  { %5208 = vmatmul.mubr.msk.f32.gmra.mrb[18].mxu0 %vm546_vm4, %v6646_v19  ;;  %v1274_v37 = vpop.f32.mrb[18].mxu1 }
 0x917   :  { %v1275_v38 = vadd.f32 %v1274_v37, %v6594_v20  ;;  %v5221_v39 = vpop.f32.mrb[19].mxu1  ;;  %5210 = vmatprep.mubr.msk.f32.mxu0 %vm6253_vm3, %v6250_v13 }
 0x919   :  { %v1288_v17 = vsel %vm639_vm7, %v1275_v38, -inf }
 0x91a   :  { %5211 = vmatmul.mubr.msk.f32.gmra.mrb[20].mxu0 %vm546_vm4, %v6648_v22  ;;  %1289 = vmax.xlane.f32.xlu0 %v1288_v17  ;;  %v1279_v41 = vpop.f32.mrb[20].mxu1 }
 0x91b   :  { %5248 = vmatpush3.xpose.msk.msra.mxu0 %vm546_vm4, %v1430_v40  ;;  %v1280_v43 = vadd.f32 %v1279_v41, %v6594_v20  ;;  %v5224_v19 = vpop.f32.mrb[21].mxu1  ;;  %5249 = vmatprep.mubr.msk.f32.mxu0 %vm6253_vm3, %v6250_v13 }
 0x91c   :  { %5692 = vmatprep.subr.bf16.mxu0 %v6251_v62 }
 0x91d   :  { %v1291_v44 = vsel %vm639_vm7, %v1280_v43, -inf }
 0x91e   :  { %5250 = vmatmul.mubr.msk.f32.vlgmr.msra.gmra.mrb[22].mxu0 %vm546_vm4, %v1420_v45  ;;  %1292 = vmax.xlane.f32.xlu1 %v1291_v44  ;;  %v1284_v46 = vpop.f32.mrb[22].mxu1 }
 0x91f   :  { %v1285_v22 = vadd.f32 %v1284_v46, %v6594_v20  ;;  %v5227_v47 = vpop.f32.mrb[23].mxu1  ;;  %5252 = vmatprep.mubr.msk.f32.mxu0 %vm6253_vm3, %v6250_v13  ;;  %5694 = vmatpush3.bf16.msra.mxu0 %v6687_v5 }
 0x920   :  { %5695 = vmatprep.subr.bf16.mxu0 %v6251_v62 }
 0x921   :  { %v1294_v49 = vsel %vm639_vm7, %v1285_v22, -inf }
 0x922   :  { %5253 = vmatmul.mubr.msk.f32.gmra.mrb[24].mxu0 %vm546_vm4, %v1422_v48  ;;  %1295 = vmax.xlane.f32.xlu0 %v1294_v49 }
 0x923   :  { %5255 = vmatprep.mubr.msk.f32.mxu0 %vm6253_vm3, %v6250_v13 }
 0x926   :  { %5256 = vmatmul.mubr.msk.f32.gmra.mrb[26].mxu0 %vm546_vm4, %v1424_v50 }
 0x927   :  { %5277 = vmatprep.mubr.msk.f32.mxu0 %vm6253_vm3, %v6250_v13 }
 0x9a7   :  { %v1290_v42 = vpop.xlane.xlu0 %1289 }
 0x9a8   :  { %v1297_v54 = vsub.f32 %v1275_v38, %v1290_v42  ;;  %v6810_v42 = vld [vmem:[%s6318_s19] ss:$0 sm:$0xff]  ;;  %s7534_s19 = sld [smem:[#allocation13_spill]] }
 0x9aa   :  { %v1300_v15 = vmul.f32 1.442695, %v1297_v54 }
 0x9ab   :  { %v1293_v55 = vpop.xlane.xlu1 %1292 }
 0x9ac   :  { %v1298_v5 = vsub.f32 %v1280_v43, %v1293_v55  ;;  %6029 = vpow2.f32 %v1300_v15 }
 0x9ae   :  { %v1302_v58 = vmul.f32 1.442695, %v1298_v5 }
 0x9af   :  { %v1296_v63 = vpop.xlane.xlu0 %1295 }
 0x9b0   :  { %v1299_v16 = vsub.f32 %v1285_v22, %v1296_v63  ;;  %6031 = vpow2.f32 %v1302_v58 }
 0x9b2   :  { %v1304_v60 = vmul.f32 1.442695, %v1299_v16 }
 0x9b4   :  { %6033 = vpow2.f32 %v1304_v60 }
 0x9b6   :  { %v6773_v10 = vpop.eup %6029 }
 0x9b7   :  { %v1306_v25 = vsel %vm639_vm7, %v6773_v10, 0.0 }
 0x9ba   :  { %v6776_v21 = vpop.eup %6031 }
 0x9bb   :  { %v1309_v27 = vsel %vm639_vm7, %v6776_v21, 0.0 }
 0x9be   :  { %v6781_v26 = vpop.eup %6033 }
 0x9bf   :  { %v1312_v28 = vsel %vm639_vm7, %v6781_v26, 0.0 }
 0x9e5   :  { %v1170_v52 = vpop.f32.mrb[16].mxu0 }
 0x9e6   :  { %1184 = vst.msk [vmem:[#allocation3] sm:$0xff] %vm270_vm1, %v1170_v52  ;;  %v5206_v53 = vpop.f32.mrb[17].mxu0 }
 0x9e9   :  { %v1175_v4 = vpop.f32.mrb[18].mxu0 }
 0x9ea   :  { %1185 = vst.msk [vmem:[#allocation3 + $0x8] sm:$0xff] %vm270_vm1, %v1175_v4  ;;  %v5209_v7 = vpop.f32.mrb[19].mxu0  ;;  %v6185_v4 = vld [vmem:[#allocation2 + $0x10] sm:$0xff] }
 0x9ed   :  { %v1180_v57 = vpop.f32.mrb[20].mxu0  ;;  %v1835_v49 = vld [vmem:[#allocation3] sm:$0xff] }
 0x9ee   :  { %1186 = vst.msk [vmem:[#allocation3 + $0x10] sm:$0xff] %vm270_vm1, %v1180_v57  ;;  %v5212_v59 = vpop.f32.mrb[21].mxu0  ;;  %v1841_v50 = vadd.f32 %v1835_v49, %v6491_v32 }
 0x9f0   :  { %v6813_v53 = vadd.f32 %v6810_v42, %v1841_v50 }
 0x9f1   :  { %v1509_v61 = vpop.f32.mrb[22].mxu0  ;;  %v1836_v52 = vld [vmem:[#allocation3 + $0x8] sm:$0xff] }
 0x9f2   :  { %v1510_v0 = vadd.f32 %v1509_v61, %v6594_v20  ;;  %v5251_v1 = vpop.f32.mrb[23].mxu0  ;;  %v1842_v54 = vadd.f32 %v1836_v52, %v6495_v34 }
 0x9f4   :  { %v1523_v2 = vsel %vm639_vm7, %v1510_v0, -inf  ;;  %v6819_v63 = vadd.f32 %v6810_v42, %v1842_v54 }
 0x9f5   :  { %v1514_v3 = vpop.f32.mrb[24].mxu0  ;;  %1524 = vmax.xlane.f32.xlu0 %v1523_v2  ;;  %v1837_v55 = vld [vmem:[#allocation3 + $0x10] sm:$0xff] }
 0x9f6   :  { %v1515_v6 = vadd.f32 %v1514_v3, %v6594_v20  ;;  %v5254_v8 = vpop.f32.mrb[25].mxu0  ;;  %v1865_v32 = vsel %vm270_vm1, %v6819_v63, 0.0 }
 0x9f8   :  { %v1526_v9 = vsel %vm639_vm7, %v1515_v6, -inf }
 0x9f9   :  { %v1519_v12 = vpop.f32.mrb[26].mxu0  ;;  %1527 = vmax.xlane.f32.xlu0 %v1526_v9 }
 0x9fa   :  { %v1520_v14 = vadd.f32 %v1519_v12, %v6594_v20  ;;  %v5257_v18 = vpop.f32.mrb[27].mxu0 }
 0x9fc   :  { %v1529_v23 = vsel %vm639_vm7, %v1520_v14, -inf }
 0x9fd   :  { %1530 = vmax.xlane.f32.xlu1 %v1529_v23  ;;  %1307 = vadd.xlane.f32.xlu0 %v1306_v25 }
 0xa01   :  { %1310 = vadd.xlane.f32.xlu1 %v1309_v27  ;;  %1313 = vadd.xlane.f32.xlu0 %v1312_v28 }
 0xa12   :  { %5944 = vrot.lane.b32.xlu1 %v6665_v51, %s6255_s5 }
 0xa82   :  { %v1525_v29 = vpop.xlane.xlu0 %1524 }
 0xa83   :  { %v1532_v30 = vsub.f32 %v1510_v0, %v1525_v29 }
 0xa85   :  { %v1535_v31 = vmul.f32 1.442695, %v1532_v30 }
 0xa86   :  { %v1528_v33 = vpop.xlane.xlu0 %1527 }
 0xa87   :  { %6035 = vpow2.f32 %v1535_v31  ;;  %v1533_v35 = vsub.f32 %v1515_v6, %v1528_v33 }
 0xa89   :  { %v1537_v36 = vmul.f32 1.442695, %v1533_v35 }
 0xa8a   :  { %v1531_v37 = vpop.xlane.xlu1 %1530  ;;  %v1308_v7 = vpop.xlane.xlu0 %1307 }
 0xa8b   :  { %6037 = vpow2.f32 %v1537_v36  ;;  %v1534_v38 = vsub.f32 %v1520_v14, %v1531_v37 }
 0xa8d   :  { %v1539_v39 = vmul.f32 1.442695, %v1534_v38 }
 0xa8e   :  { %v1311_v17 = vpop.xlane.xlu1 %1310  ;;  %v1314_v15 = vpop.xlane.xlu0 %1313 }
 0xa8f   :  { %6039 = vpow2.f32 %v1539_v39 }
 0xa90   :  { %6041 = vrcp.f32 %v1308_v7 }
 0xa91   :  { %v6789_v40 = vpop.eup %6035  ;;  %6043 = vrcp.f32 %v1311_v17 }
 0xa92   :  { %v5945_v41 = vpop.permute.xlu1 %5944  ;;  %v1541_v43 = vsel %vm639_vm7, %v6789_v40, 0.0  ;;  %6045 = vrcp.f32 %v1314_v15 }
 0xa93   :  { %v5947_v19 = vunpack.i.h.bf16 %v5945_v41  ;;  %v5946_v45 = vunpack.i.l.bf16 %v5945_v41  ;;  %1542 = vadd.xlane.f32.xlu1 %v1541_v43 }
 0xa95   :  { %v6793_v44 = vpop.eup %6037  ;;  %v5683_v46 = vpack.c.bf16 %v5947_v19, %v5946_v45  ;;  %v6861_v19 = vld [vmem:[%s6323_s24] ss:$0 sm:$0xff]  ;;  %s7535_s24 = sld [smem:[#allocation14_spill]] }
 0xa96   :  { %v1544_v22 = vsel %vm639_vm7, %v6793_v44, 0.0 }
 0xa97   :  { %5684 = vmatpush3.bf16.msra.mxu1 %v5683_v46  ;;  %1545 = vadd.xlane.f32.xlu0 %v1544_v22 }
 0xa98   :  { %5232 = vmatprep.subr.mxu1 %v6250_v13 }
 0xa99   :  { %v6798_v47 = vpop.eup %6039 }
 0xa9a   :  { %v1547_v48 = vsel %vm639_vm7, %v6798_v47, 0.0  ;;  %v6042_v60 = vpop.eup %6041 }
 0xa9b   :  { %1548 = vadd.xlane.f32.xlu0 %v1547_v48  ;;  %v1316_v1 = vmul.f32 %v6042_v60, %v6773_v10  ;;  %v6044_v3 = vpop.eup %6043 }
 0xa9c   :  { %v1318_v8 = vmul.f32 %v6044_v3, %v6776_v21  ;;  %v6046_v9 = vpop.eup %6045 }
 0xa9d   :  { %v1320_v10 = vmul.f32 %v6046_v9, %v6781_v26  ;;  %v6187_v9 = vld [vmem:[#allocation2 + $0x20] sm:$0xff] }
 0xaa4   :  { %5949 = vrot.lane.b32.xlu1 %v6665_v51, %s6258_s17  ;;  %v1862_v51 = vsel %vm270_vm1, %v6813_v53, 0.0 }
 0xaa8   :  { %1560 = vrot.lane.b32.xlu1 %v6671_v56, %s6258_s17 }
 0xab1   :  { %1325 = vrot.lane.b32.xlu0 %v6671_v56, %s6255_s5  ;;  %v1843_v56 = vadd.f32 %v6185_v4, %v1837_v55 }
 0xab3   :  { %v6824_v5 = vadd.f32 %v6810_v42, %v1843_v56 }
 0xab5   :  { %v1868_v34 = vsel %vm270_vm1, %v6824_v5, 0.0 }
 0xacc   :  { %1863 = vadd.xlane.f32.xlu1 %v1862_v51 }
 0xad0   :  { %1866 = vadd.xlane.f32.xlu0 %v1865_v32 }
 0xad4   :  { %1869 = vadd.xlane.f32.xlu0 %v1868_v34 }
 0xb20   :  { %v1543_v16 = vpop.xlane.xlu1 %1542 }
 0xb21   :  { %6047 = vrcp.f32 %v1543_v16 }
 0xb24   :  { %v1546_v57 = vpop.xlane.xlu0 %1545  ;;  %v5950_v58 = vpop.permute.xlu1 %5949 }
 0xb25   :  { %v5952_v61 = vunpack.i.h.bf16 %v5950_v58  ;;  %v5951_v0 = vunpack.i.l.bf16 %v5950_v58  ;;  %6049 = vrcp.f32 %v1546_v57 }
 0xb27   :  { %v5690_v6 = vpack.c.bf16 %v5952_v61, %v5951_v0  ;;  %v6186_v0 = vld [vmem:[#allocation2 + $0x18] sm:$0xff] }
 0xb28   :  { %v1549_v59 = vpop.xlane.xlu0 %1548  ;;  %v1561_v12 = vpop.permute.xlu1 %1560 }
 0xb29   :  { %6051 = vrcp.f32 %v1549_v59 }
 0xb2b   :  { %v6048_v14 = vpop.eup %6047 }
 0xb2c   :  { %v1326_v2 = vpop.permute.xlu0 %1325  ;;  %v1551_v18 = vmul.f32 %v6048_v14, %v6789_v40 }
 0xb2d   :  { %5233 = vmatpush3.msra.mxu1 %v1326_v2 }
 0xb2e   :  { %5235 = vmatmul.mubr.msk.f32.vlgmr.msra.gmra.mrb[24].mxu1 %vm639_vm7, %v1316_v1  ;;  %5689 = vmatprep.subr.bf16.mxu1 %v6251_v62 }
 0xb2f   :  { %5691 = vmatpush3.bf16.msra.mxu1 %v5690_v6  ;;  %5237 = vmatprep.mubr.msk.f32.mxu1 %vm6253_vm3, %v6250_v13  ;;  %v6050_v21 = vpop.eup %6049 }
 0xb30   :  { %5262 = vmatprep.subr.mxu1 %v6250_v13  ;;  %v1553_v23 = vmul.f32 %v6050_v21, %v6793_v44  ;;  %v6864_v44 = vld [vmem:[%s6328_s30] ss:$0 sm:$0xff]  ;;  %s7536_s30 = sld [smem:[#allocation15_spill]] }
 0xb31   :  { %v1964_v21 = vld [vmem:[%s6333_s6] sm:$0xff] }
 0xb32   :  { %5238 = vmatmul.mubr.msk.f32.gmra.mrb[26].mxu1 %vm639_vm7, %v1318_v8 }
 0xb33   :  { %5263 = vmatpush3.msra.mxu1 %v1561_v12  ;;  %5240 = vmatprep.mubr.msk.f32.mxu1 %vm6253_vm3, %v6250_v13  ;;  %v6052_v25 = vpop.eup %6051 }
 0xb34   :  { %v1555_v26 = vmul.f32 %v6052_v25, %v6798_v47 }
 0xb36   :  { %5241 = vmatmul.mubr.msk.f32.gmra.mrb[28].mxu1 %vm639_vm7, %v1320_v10 }
 0xb37   :  { %5264 = vmatprep.mubr.msk.f32.mxu1 %vm6253_vm3, %v6250_v13 }
 0xb3a   :  { %5265 = vmatmul.mubr.msk.f32.vlgmr.msra.gmra.mrb[30].mxu1 %vm639_vm7, %v1551_v18 }
 0xb3b   :  { %5267 = vmatprep.mubr.msk.f32.mxu1 %vm6253_vm3, %v6250_v13 }
 0xb3e   :  { %5268 = vmatmul.mubr.msk.f32.gmra.mrb[32].mxu1 %vm639_vm7, %v1553_v23  ;;  %v1965_v23 = vld [vmem:[%s6333_s6 + $0x8] sm:$0xff] }
 0xb3f   :  { %5270 = vmatprep.mubr.msk.f32.mxu1 %vm6253_vm3, %v6250_v13  ;;  %v5698_v25 = vpack.c.bf16 %v1965_v23, %v1964_v21 }
 0xb41   :  { %5699 = vmatprep.subr.bf16.mxu1 %v5698_v25 }
 0xb42   :  { %5271 = vmatmul.mubr.msk.f32.gmra.mrb[34].mxu1 %vm639_vm7, %v1555_v26  ;;  %v1966_v26 = vld [vmem:[%s6333_s6 + $0x10] sm:$0xff] }
 0xb43   :  { %5701 = vmatpush3.bf16.msra.mxu1 %v5698_v25 }
 0xb59   :  { %v1864_v27 = vpop.xlane.xlu1 %1863 }
 0xb5a   :  { %v1880_v28 = vmul.f32 0.03125, %v1864_v27  ;;  %v1967_v27 = vld [vmem:[%s6333_s6 + $0x18] sm:$0xff]  ;;  %s7537_s6 = sld [smem:[#allocation18_spill]] }
 0xb5c   :  { %v1886_v29 = vsub.f32 %v6813_v53, %v1880_v28  ;;  %v5702_v28 = vpack.c.bf16 %v1967_v27, %v1966_v26 }
 0xb5d   :  { %v1867_v30 = vpop.xlane.xlu0 %1866 }
 0xb5e   :  { %v1892_v31 = vmul.f32 %v1886_v29, %v1886_v29  ;;  %v1881_v16 = vmul.f32 0.03125, %v1867_v30  ;;  %5703 = vmatprep.subr.bf16.mxu1 %v5702_v28 }
 0xb5f   :  { %5705 = vmatpush3.bf16.msra.mxu1 %v5702_v28 }
 0xb60   :  { %v1898_v33 = vsel %vm270_vm1, %v1892_v31, 0.0  ;;  %v1887_v60 = vsub.f32 %v6819_v63, %v1881_v16  ;;  %v2120_v16 = vld [vmem:[%s7528_s21 + $0x10] sm:$0xff] }
 0xb61   :  { %1899 = vadd.xlane.f32.xlu0 %v1898_v33  ;;  %v1870_v35 = vpop.xlane.xlu0 %1869 }
 0xb62   :  { %v1882_v36 = vmul.f32 0.03125, %v1870_v35  ;;  %v1893_v8 = vmul.f32 %v1887_v60, %v1887_v60 }
 0xb64   :  { %v6855_v37 = vsub.f32 %v6824_v5, %v1882_v36  ;;  %v1901_v14 = vsel %vm270_vm1, %v1893_v8, 0.0 }
 0xb66   :  { %v1894_v38 = vmul.f32 %v6855_v37, %v6855_v37 }
 0xb68   :  { %v1904_v39 = vsel %vm270_vm1, %v1894_v38, 0.0 }
 0xb69   :  { %1905 = vadd.xlane.f32.xlu0 %v1904_v39  ;;  %v6188_v39 = vld [vmem:[#allocation2 + $0x28] sm:$0xff] }
 0xbee   :  { %v1900_v17 = vpop.xlane.xlu0 %1899 }
 0xbef   :  { %v1916_v40 = vmul.f32 0.03125, %v1900_v17 }
 0xbf1   :  { %v1922_v41 = vadd.f32 1e-06, %v1916_v40 }
 0xbf3   :  { %6053 = vrsqrt.f32 %v1922_v41 }
 0xbfd   :  { %v6054_v43 = vpop.eup %6053 }
 0xbfe   :  { %v1934_v45 = vmul.f32 %v6054_v43, %v1886_v29  ;;  %v1906_v29 = vpop.xlane.xlu0 %1905 }
 0xbff   :  { %v1918_v30 = vmul.f32 0.03125, %v1906_v29 }
 0xc00   :  { %v1946_v46 = vmul.f32 %v6861_v19, %v1934_v45 }
 0xc01   :  { %v1405_v22 = vpop.f32.mrb[24].mxu1  ;;  %v1924_v31 = vadd.f32 1e-06, %v1918_v30  ;;  %v2122_v30 = vld [vmem:[%s7528_s21 + $0x20] sm:$0xff] }
 0xc02   :  { %v5236_v47 = vpop.f32.mrb[25].mxu1  ;;  %v1958_v48 = vadd.f32 %v6864_v44, %v1946_v46 }
 0xc03   :  { %6055 = vrsqrt.f32 %v1924_v31  ;;  %v2123_v31 = vld [vmem:[%s7528_s21 + $0x28] sm:$0xff] }
 0xc04   :  { %5307 = vmatprep.mubr.msk.f32.mxu1 %vm270_vm1, %v1958_v48 }
 0xc05   :  { %v1410_v49 = vpop.f32.mrb[26].mxu1 }
 0xc06   :  { %v5239_v50 = vpop.f32.mrb[27].mxu1 }
 0xc09   :  { %v1415_v52 = vpop.f32.mrb[28].mxu1 }
 0xc0a   :  { %v5242_v54 = vpop.f32.mrb[29].mxu1 }
 0xc0d   :  { %v1640_v55 = vpop.f32.mrb[30].mxu1 }
 0xc0e   :  { %v5266_v51 = vpop.f32.mrb[31].mxu1  ;;  %5278 = vmatmul.mubr.msk.f32.vlgmr.msra.gmra.mrb[28].mxu0 %vm546_vm4, %v1640_v55  ;;  %v6056_v55 = vpop.eup %6055 }
 0xc0f   :  { %5280 = vmatprep.mubr.msk.f32.mxu0 %vm6253_vm3, %v6250_v13  ;;  %5697 = vmatpush3.bf16.msra.mxu0 %v6719_v24  ;;  %v1936_v51 = vmul.f32 %v6056_v55, %v6855_v37 }
 0xc11   :  { %v1645_v4 = vpop.f32.mrb[32].mxu1 }
 0xc12   :  { %v5269_v56 = vpop.f32.mrb[33].mxu1  ;;  %5281 = vmatmul.mubr.msk.f32.gmra.mrb[30].mxu0 %vm546_vm4, %v1645_v4 }
 0xc13   :  { %5283 = vmatprep.mubr.msk.f32.mxu0 %vm6253_vm3, %v6250_v13  ;;  %v1948_v56 = vmul.f32 %v6861_v19, %v1936_v51  ;;  %v4748_v51 = vld [vmem:[%s7529_s25] ss:$0 sm:$0xff] }
 0xc15   :  { %v1650_v32 = vpop.f32.mrb[34].mxu1 }
 0xc16   :  { %v5272_v34 = vpop.f32.mrb[35].mxu1  ;;  %5284 = vmatmul.mubr.msk.f32.gmra.mrb[32].mxu0 %vm546_vm4, %v1650_v32 }
 0xc17   :  { %5290 = vmatprep.mubr.msk.f32.mxu0 %vm6253_vm3, %v6250_v13 }
 0xc1a   :  { %5291 = vmatmul.mubr.msk.f32.vlgmr.msra.gmra.mrb[28].mxu0 %vm546_vm4, %v1405_v22 }
 0xc1b   :  { %5293 = vmatprep.mubr.msk.f32.mxu0 %vm6253_vm3, %v6250_v13 }
 0xc1e   :  { %5294 = vmatmul.mubr.msk.f32.gmra.mrb[30].mxu0 %vm546_vm4, %v1410_v49 }
 0xc1f   :  { %5296 = vmatprep.mubr.msk.f32.mxu0 %vm6253_vm3, %v6250_v13 }
 0xc22   :  { %5297 = vmatmul.mubr.msk.f32.gmra.mrb[32].mxu0 %vm546_vm4, %v1415_v52 }
 0xced   :  { %v1818_v24 = vpop.f32.mrb[28].mxu0 }
 0xcee   :  { %1832 = vst.msk [vmem:[#allocation3 + $0x18] sm:$0xff] %vm270_vm1, %v1818_v24  ;;  %v5292_v7 = vpop.f32.mrb[29].mxu0  ;;  %v1960_v24 = vadd.f32 %v6864_v44, %v1948_v56 }
 0xcef   :  { %v2118_v7 = vld [vmem:[%s7528_s21] sm:$0xff] }
 0xcf1   :  { %v1823_v15 = vpop.f32.mrb[30].mxu0 }
 0xcf2   :  { %1833 = vst.msk [vmem:[#allocation3 + $0x20] sm:$0xff] %vm270_vm1, %v1823_v15  ;;  %v5295_v57 = vpop.f32.mrb[31].mxu0  ;;  %v2119_v15 = vld [vmem:[%s7528_s21 + $0x8] sm:$0xff] }
 0xcf3   :  { %v5706_v57 = vpack.c.bf16 %v2119_v15, %v2118_v7 }
 0xcf5   :  { %v1828_v58 = vpop.f32.mrb[32].mxu0  ;;  %v1838_v59 = vld [vmem:[#allocation3 + $0x18] sm:$0xff]  ;;  %5707 = vmatprep.subr.bf16.mxu1 %v5706_v57 }
 0xcf6   :  { %1834 = vst.msk [vmem:[#allocation3 + $0x28] sm:$0xff] %vm270_vm1, %v1828_v58  ;;  %v5298_v61 = vpop.f32.mrb[33].mxu0  ;;  %v1844_v1 = vadd.f32 %v6186_v0, %v1838_v59  ;;  %v2121_v58 = vld [vmem:[%s7528_s21 + $0x18] sm:$0xff] }
 0xcf7   :  { %v5710_v37 = vpack.c.bf16 %v2121_v58, %v2120_v16 }
 0xcf8   :  { %v6891_v2 = vadd.f32 %v6810_v42, %v1844_v1 }
 0xcf9   :  { %v1839_v3 = vld [vmem:[#allocation3 + $0x20] sm:$0xff] }
 0xcfa   :  { %v1871_v6 = vsel %vm270_vm1, %v6891_v2, 0.0  ;;  %v1845_v12 = vadd.f32 %v6187_v9, %v1839_v3 }
 0xcfb   :  { %1872 = vadd.xlane.f32.xlu1 %v1871_v6 }
 0xcfc   :  { %v6896_v10 = vadd.f32 %v6810_v42, %v1845_v12 }
 0xcfd   :  { %v1840_v35 = vld [vmem:[#allocation3 + $0x28] sm:$0xff] }
 0xcfe   :  { %v1874_v18 = vsel %vm270_vm1, %v6896_v10, 0.0  ;;  %v1846_v17 = vadd.f32 %v6188_v39, %v1840_v35  ;;  %v2124_v35 = vld [vmem:[%s7528_s21 + $0x30] sm:$0xff] }
 0xcff   :  { %1902 = vadd.xlane.f32.xlu1 %v1901_v14  ;;  %1875 = vadd.xlane.f32.xlu0 %v1874_v18 }
 0xd00   :  { %v6909_v49 = vadd.f32 %v6810_v42, %v1846_v17  ;;  %v2127_v17 = vld [vmem:[%s7528_s21 + $0x48] sm:$0xff] }
 0xd02   :  { %v1877_v54 = vsel %vm270_vm1, %v6909_v49, 0.0 }
 0xd88   :  { %v1873_v33 = vpop.xlane.xlu1 %1872 }
 0xd89   :  { %v1883_v36 = vmul.f32 0.03125, %v1873_v33  ;;  %v5714_v33 = vpack.c.bf16 %v2123_v31, %v2122_v30 }
 0xd8b   :  { %v1889_v38 = vsub.f32 %v6891_v2, %v1883_v36  ;;  %v2125_v36 = vld [vmem:[%s7528_s21 + $0x38] sm:$0xff] }
 0xd8c   :  { %v1903_v40 = vpop.xlane.xlu1 %1902  ;;  %v1876_v41 = vpop.xlane.xlu0 %1875  ;;  %v5718_v39 = vpack.c.bf16 %v2125_v36, %v2124_v35  ;;  %v6951_v36 = vld [vmem:[%s7530_s29] ss:$0 sm:$0xff] }
 0xd8d   :  { %v1917_v43 = vmul.f32 0.03125, %v1903_v40  ;;  %v1884_v45 = vmul.f32 0.03125, %v1876_v41  ;;  %v1895_v46 = vmul.f32 %v1889_v38, %v1889_v38  ;;  %v2128_v41 = vld [vmem:[%s7528_s21 + $0x50] sm:$0xff] }
 0xd8f   :  { %v1923_v22 = vadd.f32 1e-06, %v1917_v43  ;;  %v1890_v47 = vsub.f32 %v6896_v10, %v1884_v45  ;;  %v1907_v48 = vsel %vm270_vm1, %v1895_v46, 0.0  ;;  %v2129_v43 = vld [vmem:[%s7528_s21 + $0x58] sm:$0xff]  ;;  %v2130_v46 = vld [vmem:[%s7528_s21 + $0x60] sm:$0xff] }
 0xd90   :  { %1908 = vadd.xlane.f32.xlu1 %v1907_v48  ;;  %v5726_v45 = vpack.c.bf16 %v2129_v43, %v2128_v41  ;;  %v2132_v48 = vld [vmem:[%s7528_s21 + $0x70] sm:$0xff] }
 0xd91   :  { %6057 = vrsqrt.f32 %v1923_v22  ;;  %v1896_v50 = vmul.f32 %v1890_v47, %v1890_v47  ;;  %v2131_v22 = vld [vmem:[%s7528_s21 + $0x68] sm:$0xff] }
 0xd93   :  { %v1910_v52 = vsel %vm270_vm1, %v1896_v50, 0.0  ;;  %v2133_v50 = vld [vmem:[%s7528_s21 + $0x78] sm:$0xff] }
 0xd94   :  { %1911 = vadd.xlane.f32.xlu0 %v1910_v52  ;;  %1878 = vadd.xlane.f32.xlu1 %v1877_v54  ;;  %v5734_v52 = vpack.c.bf16 %v2133_v50, %v2132_v48 }
 0xd9b   :  { %v6058_v4 = vpop.eup %6057 }
 0xd9c   :  { %v1935_v42 = vmul.f32 %v6058_v4, %v1887_v60 }
 0xd9e   :  { %v1947_v32 = vmul.f32 %v6861_v19, %v1935_v42 }
 0xda0   :  { %v1959_v34 = vadd.f32 %v6864_v44, %v1947_v32 }
 0xda2   :  { %5308 = vmatmul.mubr.msk.f32.vlgmr.msra.gmra.mrb[36].mxu1 %vm270_vm1, %v1959_v34 }
 0xda3   :  { %5310 = vmatprep.mubr.msk.f32.mxu1 %vm270_vm1, %v1960_v24  ;;  %5709 = vmatpush3.bf16.msra.mxu1 %v5706_v57 }
 0xda4   :  { %5711 = vmatprep.subr.bf16.mxu1 %v5710_v37 }
 0xda7   :  { %5713 = vmatpush3.bf16.msra.mxu1 %v5710_v37 }
 0xda8   :  { %5715 = vmatprep.subr.bf16.mxu1 %v5714_v33 }
 0xdab   :  { %5717 = vmatpush3.bf16.msra.mxu1 %v5714_v33 }
 0xdac   :  { %5719 = vmatprep.subr.bf16.mxu1 %v5718_v39 }
 0xdaf   :  { %5721 = vmatpush3.bf16.msra.mxu1 %v5718_v39 }
 0xe1d   :  { %v1909_v59 = vpop.xlane.xlu1 %1908 }
 0xe1e   :  { %v1919_v60 = vmul.f32 0.03125, %v1909_v59 }
 0xe20   :  { %v1925_v61 = vadd.f32 1e-06, %v1919_v60 }
 0xe21   :  { %v1912_v0 = vpop.xlane.xlu0 %1911  ;;  %v1879_v1 = vpop.xlane.xlu1 %1878 }
 0xe22   :  { %6059 = vrsqrt.f32 %v1925_v61  ;;  %v1920_v3 = vmul.f32 0.03125, %v1912_v0  ;;  %v1885_v6 = vmul.f32 0.03125, %v1879_v1 }
 0xe24   :  { %v1926_v8 = vadd.f32 1e-06, %v1920_v3  ;;  %v1891_v9 = vsub.f32 %v6909_v49, %v1885_v6 }
 0xe26   :  { %6061 = vrsqrt.f32 %v1926_v8  ;;  %v1897_v12 = vmul.f32 %v1891_v9, %v1891_v9 }
 0xe28   :  { %v1913_v14 = vsel %vm270_vm1, %v1897_v12, 0.0 }
 0xe29   :  { %1914 = vadd.xlane.f32.xlu1 %v1913_v14 }
 0xe2c   :  { %v6060_v18 = vpop.eup %6059 }
 0xe2d   :  { %v1937_v21 = vmul.f32 %v6060_v18, %v1889_v38  ;;  %v2126_v38 = vld [vmem:[%s7528_s21 + $0x40] sm:$0xff] }
 0xe2e   :  { %v5722_v40 = vpack.c.bf16 %v2127_v17, %v2126_v38 }
 0xe2f   :  { %v1949_v23 = vmul.f32 %v6861_v19, %v1937_v21 }
 0xe30   :  { %v6062_v25 = vpop.eup %6061  ;;  %5723 = vmatprep.subr.bf16.mxu1 %v5722_v40 }
 0xe31   :  { %v1961_v26 = vadd.f32 %v6864_v44, %v1949_v23  ;;  %v1938_v27 = vmul.f32 %v6062_v25, %v1890_v47  ;;  %5725 = vmatpush3.bf16.msra.mxu1 %v5722_v40  ;;  %v5730_v47 = vpack.c.bf16 %v2131_v22, %v2130_v46 }
 0xe32   :  { %5727 = vmatprep.subr.bf16.mxu1 %v5726_v45 }
 0xe33   :  { %5311 = vmatmul.mubr.msk.f32.gmra.mrb[38].mxu1 %vm270_vm1, %v1961_v26  ;;  %v1950_v28 = vmul.f32 %v6861_v19, %v1938_v27 }
 0xe35   :  { %v1962_v29 = vadd.f32 %v6864_v44, %v1950_v28  ;;  %5729 = vmatpush3.bf16.msra.mxu1 %v5726_v45 }
 0xe36   :  { %5731 = vmatprep.subr.bf16.mxu1 %v5730_v47 }
 0xe37   :  { %5313 = vmatprep.mubr.msk.f32.mxu1 %vm270_vm1, %v1962_v29 }
 0xe39   :  { %5733 = vmatpush3.bf16.msra.mxu1 %v5730_v47 }
 0xe3a   :  { %5735 = vmatprep.subr.bf16.mxu1 %v5734_v52 }
 0xe3d   :  { %5737 = vmatpush3.bf16.msra.mxu1 %v5734_v52 }
 0xe3e   :  { %5750 = vmatprep.subr.bf16.mxu1 %v6251_v62 }
 0xe75   :  { %v5309_v54 = vpop.f32.mrb[36].mxu1 }
 0xe76   :  { %v2059_v55 = vpop.f32.mrb[37].mxu1  ;;  %v2065_v42 = vadd.f32 %v5309_v54, %v4748_v51 }
 0xe77   :  { %v2060_v4 = vadd.f32 %v4748_v51, %v2059_v55 }
 0xe78   :  { %v2095_v24 = vmul.f32 0.70710677, %v2065_v42  ;;  %v2089_v3 = vmul.f32 0.5, %v2065_v42 }
 0xe79   :  { %v2094_v56 = vmul.f32 0.70710677, %v2060_v4  ;;  %v2088_v60 = vmul.f32 0.5, %v2060_v4 }
 0xe7b   :  { %6063 = verf.f32 %v2094_v56 }
 0xe85   :  { %v6064_v15 = vpop.eup %6063 }
 0xe86   :  { %v2106_v37 = vadd.f32 1.0, %v6064_v15 }
 0xe88   :  { %v2112_v1 = vmul.f32 %v2106_v37, %v2088_v60 }
 0xeb6   :  { %v1915_v32 = vpop.xlane.xlu1 %1914 }
 0xeb7   :  { %v1921_v34 = vmul.f32 0.03125, %v1915_v32 }
 0xeb9   :  { %v1927_v7 = vadd.f32 1e-06, %v1921_v34 }
 0xebb   :  { %6065 = vrsqrt.f32 %v1927_v7 }
 0xebc   :  { %6067 = verf.f32 %v2095_v24 }
 0xec5   :  { %v6066_v16 = vpop.eup %6065 }
 0xec6   :  { %v1939_v57 = vmul.f32 %v6066_v16, %v1891_v9  ;;  %v6068_v58 = vpop.eup %6067 }
 0xec7   :  { %v2107_v61 = vadd.f32 1.0, %v6068_v58 }
 0xec8   :  { %v1951_v59 = vmul.f32 %v6861_v19, %v1939_v57 }
 0xec9   :  { %v2113_v6 = vmul.f32 %v2107_v61, %v2089_v3  ;;  %v2347_v3 = vld [vmem:[%s7531_s3 + $0x8] sm:$0xff] }
 0xeca   :  { %v1963_v0 = vadd.f32 %v6864_v44, %v1951_v59 }
 0xecc   :  { %5314 = vmatmul.mubr.msk.f32.gmra.mrb[40].mxu1 %vm270_vm1, %v1963_v0 }
 0xecd   :  { %5348 = vmatprep.mubr.f32.mxu1 %v2112_v1  ;;  %v2346_v1 = vld [vmem:[%s7531_s3] sm:$0xff] }
 0xed0   :  { %5349 = vmatmul.mubr.f32.vlgmr.msra.gmra.mrb[42].mxu1 %v2113_v6  ;;  %v5738_v6 = vpack.c.bf16 %v2347_v3, %v2346_v1 }
 0xed2   :  { %5739 = vmatprep.subr.bf16.mxu0 %v5738_v6 }
 0xed3   :  { %5741 = vmatpush3.bf16.msra.mxu0 %v5738_v6 }
 0xf06   :  { %v5312_v8 = vpop.f32.mrb[38].mxu1 }
 0xf07   :  { %v2075_v12 = vadd.f32 %v5312_v8, %v4748_v51  ;;  %v2069_v14 = vpop.f32.mrb[39].mxu1  ;;  %v2348_v8 = vld [vmem:[%s7531_s3 + $0x10] sm:$0xff] }
 0xf08   :  { %v2070_v18 = vadd.f32 %v4748_v51, %v2069_v14 }
 0xf09   :  { %v2097_v9 = vmul.f32 0.70710677, %v2075_v12  ;;  %v2091_v27 = vmul.f32 0.5, %v2075_v12  ;;  %v2349_v12 = vld [vmem:[%s7531_s3 + $0x18] sm:$0xff] }
 0xf0a   :  { %v2096_v21 = vmul.f32 0.70710677, %v2070_v18  ;;  %v2090_v44 = vmul.f32 0.5, %v2070_v18  ;;  %v5742_v14 = vpack.c.bf16 %v2349_v12, %v2348_v8 }
 0xf0b   :  { %6069 = verf.f32 %v2097_v9 }
 0xf0c   :  { %6071 = verf.f32 %v2096_v21  ;;  %5743 = vmatprep.subr.bf16.mxu0 %v5742_v14 }
 0xf0d   :  { %5745 = vmatpush3.bf16.msra.mxu0 %v5742_v14 }
 0xf0e   :  { %5746 = vmatprep.subr.bf16.mxu0 %v6251_v62 }
 0xf15   :  { %v6070_v19 = vpop.eup %6069 }
 0xf16   :  { %v6072_v23 = vpop.eup %6071  ;;  %v2109_v25 = vadd.f32 1.0, %v6070_v19 }
 0xf17   :  { %v2108_v26 = vadd.f32 1.0, %v6072_v23 }
 0xf18   :  { %v2115_v29 = vmul.f32 %v2109_v25, %v2091_v27 }
 0xf19   :  { %v2114_v28 = vmul.f32 %v2108_v26, %v2090_v44 }
 0xf1b   :  { %5351 = vmatprep.mubr.f32.mxu1 %v2114_v28 }
 0xf1c   :  { %5352 = vmatmul.mubr.f32.gmra.mrb[44].mxu1 %v2115_v29 }
 0xf9f   :  { %v5315_v30 = vpop.f32.mrb[40].mxu1 }
 0xfa0   :  { %v2085_v31 = vadd.f32 %v5315_v30, %v4748_v51  ;;  %v2079_v33 = vpop.f32.mrb[41].mxu1 }
 0xfa1   :  { %v2080_v35 = vadd.f32 %v4748_v51, %v2079_v33 }
 0xfa2   :  { %v2099_v38 = vmul.f32 0.70710677, %v2085_v31  ;;  %v2093_v51 = vmul.f32 0.5, %v2085_v31 }
 0xfa3   :  { %v2098_v39 = vmul.f32 0.70710677, %v2080_v35  ;;  %v5350_v17 = vpop.f32.mrb[42].mxu1  ;;  %v2092_v54 = vmul.f32 0.5, %v2080_v35 }
 0xfa4   :  { %6073 = verf.f32 %v2099_v38  ;;  %v2213_v40 = vadd.f32 %v5350_v17, %v6951_v36  ;;  %v2207_v41 = vpop.f32.mrb[43].mxu1 }
 0xfa5   :  { %6075 = verf.f32 %v2098_v39  ;;  %v2208_v43 = vadd.f32 %v6951_v36, %v2207_v41 }
 0xfa6   :  { %v6956_v45 = vadd.f32 %v2213_v40, %v6819_v63 }
 0xfa7   :  { %v6959_v46 = vadd.f32 %v2208_v43, %v6813_v53 }
 0xfa8   :  { %v2247_v22 = vsel %vm270_vm1, %v6956_v45, 0.0 }
 0xfa9   :  { %2248 = vadd.xlane.f32.xlu1 %v2247_v22  ;;  %v2244_v47 = vsel %vm270_vm1, %v6959_v46, 0.0 }
 0xfaa   :  { %2245 = vadd.xlane.f32.xlu0 %v2244_v47 }
 0xfae   :  { %v6074_v48 = vpop.eup %6073 }
 0xfaf   :  { %v6076_v50 = vpop.eup %6075  ;;  %v2111_v52 = vadd.f32 1.0, %v6074_v48 }
 0xfb0   :  { %v2110_v55 = vadd.f32 1.0, %v6076_v50 }
 0xfb1   :  { %v2117_v63 = vmul.f32 %v2111_v52, %v2093_v51 }
 0xfb2   :  { %v2116_v4 = vmul.f32 %v2110_v55, %v2092_v54  ;;  %v4757_v54 = vld [vmem:[%s7533_s14] ss:$0 sm:$0xff] }
 0xfb4   :  { %5354 = vmatprep.mubr.f32.mxu1 %v2116_v4 }
 0xfb5   :  { %5355 = vmatmul.mubr.f32.gmra.mrb[46].mxu1 %v2117_v63 }
 0xfb6   :  { %5395 = vmatprep.mubr.msk.f32.mxu1 %vm6253_vm3, %v6250_v13 }
 0xfef   :  { %v5353_v53 = vpop.f32.mrb[44].mxu1 }
 0xff0   :  { %v2223_v42 = vadd.f32 %v5353_v53, %v6951_v36  ;;  %v2217_v56 = vpop.f32.mrb[45].mxu1 }
 0xff1   :  { %v2218_v32 = vadd.f32 %v6951_v36, %v2217_v56 }
 0xff2   :  { %v6970_v34 = vadd.f32 %v2223_v42, %v6891_v2 }
 0xff3   :  { %v6973_v24 = vadd.f32 %v2218_v32, %v6824_v5 }
 0xff4   :  { %v2253_v7 = vsel %vm270_vm1, %v6970_v34, 0.0 }
 0xff5   :  { %2254 = vadd.xlane.f32.xlu1 %v2253_v7  ;;  %v2250_v15 = vsel %vm270_vm1, %v6973_v24, 0.0 }
 0xff6   :  { %2251 = vadd.xlane.f32.xlu0 %v2250_v15 }
0x1036   :  { %v2249_v16 = vpop.xlane.xlu1 %2248 }
0x1037   :  { %v2263_v57 = vmul.f32 0.03125, %v2249_v16  ;;  %v2246_v58 = vpop.xlane.xlu0 %2245 }
0x1038   :  { %v2262_v2 = vmul.f32 0.03125, %v2246_v58 }
0x1039   :  { %v2269_v37 = vsub.f32 %v6956_v45, %v2263_v57 }
0x103a   :  { %v2268_v5 = vsub.f32 %v6959_v46, %v2262_v2 }
0x103b   :  { %v2275_v59 = vmul.f32 %v2269_v37, %v2269_v37 }
0x103c   :  { %v2274_v60 = vmul.f32 %v2268_v5, %v2268_v5 }
0x103d   :  { %v2283_v61 = vsel %vm270_vm1, %v2275_v59, 0.0 }
0x103e   :  { %2284 = vadd.xlane.f32.xlu1 %v2283_v61  ;;  %v2280_v0 = vsel %vm270_vm1, %v2274_v60, 0.0 }
0x103f   :  { %2281 = vadd.xlane.f32.xlu0 %v2280_v0 }
0x1082   :  { %v2255_v18 = vpop.xlane.xlu1 %2254 }
0x1083   :  { %v2265_v9 = vmul.f32 0.03125, %v2255_v18  ;;  %v2252_v21 = vpop.xlane.xlu0 %2251 }
0x1084   :  { %v2264_v19 = vmul.f32 0.03125, %v2252_v21 }
0x1085   :  { %v2271_v23 = vsub.f32 %v6970_v34, %v2265_v9 }
0x1086   :  { %v2270_v25 = vsub.f32 %v6973_v24, %v2264_v19 }
0x1087   :  { %v2277_v44 = vmul.f32 %v2271_v23, %v2271_v23 }
0x1088   :  { %v5356_v26 = vpop.f32.mrb[46].mxu1  ;;  %v2276_v27 = vmul.f32 %v2270_v25, %v2270_v25 }
0x1089   :  { %v2233_v28 = vadd.f32 %v5356_v26, %v6951_v36  ;;  %v2227_v29 = vpop.f32.mrb[47].mxu1  ;;  %v2289_v30 = vsel %vm270_vm1, %v2277_v44, 0.0 }
0x108a   :  { %v2228_v31 = vadd.f32 %v6951_v36, %v2227_v29  ;;  %2290 = vadd.xlane.f32.xlu1 %v2289_v30  ;;  %v2286_v33 = vsel %vm270_vm1, %v2276_v27, 0.0  ;;  %v7015_v29 = vld [vmem:[%s7534_s19] ss:$0 sm:$0xff] }
0x108b   :  { %v6995_v35 = vadd.f32 %v2233_v28, %v6909_v49  ;;  %2287 = vadd.xlane.f32.xlu0 %v2286_v33 }
0x108c   :  { %v6998_v38 = vadd.f32 %v2228_v31, %v6896_v10  ;;  %v4756_v10 = vld [vmem:[%s7532_s8] ss:$0 sm:$0xff] }
0x108d   :  { %v2259_v39 = vsel %vm270_vm1, %v6995_v35, 0.0 }
0x108e   :  { %2260 = vadd.xlane.f32.xlu1 %v2259_v39  ;;  %v2256_v17 = vsel %vm270_vm1, %v6998_v38, 0.0 }
0x108f   :  { %2257 = vadd.xlane.f32.xlu0 %v2256_v17 }
0x10cb   :  { %v2285_v36 = vpop.xlane.xlu1 %2284 }
0x10cc   :  { %v2299_v40 = vmul.f32 0.03125, %v2285_v36  ;;  %v2282_v41 = vpop.xlane.xlu0 %2281 }
0x10cd   :  { %v2298_v43 = vmul.f32 0.03125, %v2282_v41 }
0x10ce   :  { %v2305_v49 = vadd.f32 1e-06, %v2299_v40 }
0x10cf   :  { %v2304_v22 = vadd.f32 1e-06, %v2298_v43 }
0x10d0   :  { %6077 = vrsqrt.f32 %v2305_v49 }
0x10d1   :  { %6079 = vrsqrt.f32 %v2304_v22 }
0x10da   :  { %v6078_v47 = vpop.eup %6077 }
0x10db   :  { %v6080_v48 = vpop.eup %6079  ;;  %v2317_v50 = vmul.f32 %v6078_v47, %v2269_v37 }
0x10dc   :  { %v2316_v52 = vmul.f32 %v6080_v48, %v2268_v5 }
0x10dd   :  { %v2329_v55 = vmul.f32 %v4756_v10, %v2317_v50 }
0x10de   :  { %v2328_v51 = vmul.f32 %v4756_v10, %v2316_v52 }
0x10df   :  { %v2341_v63 = vadd.f32 %v4757_v54, %v2329_v55 }
0x10e0   :  { %v2340_v4 = vadd.f32 %v4757_v54, %v2328_v51 }
0x10e2   :  { %5365 = vmatprep.mubr.msk.f32.mxu0 %vm270_vm1, %v2340_v4 }
0x10e3   :  { %5366 = vmatmul.mubr.msk.f32.vlgmr.msra.gmra.mrb[34].mxu0 %vm270_vm1, %v2341_v63 }
0x1117   :  { %v2291_v53 = vpop.xlane.xlu1 %2290 }
0x1118   :  { %v2301_v42 = vmul.f32 0.03125, %v2291_v53  ;;  %v2288_v56 = vpop.xlane.xlu0 %2287 }
0x1119   :  { %v2300_v32 = vmul.f32 0.03125, %v2288_v56 }
0x111a   :  { %v2307_v7 = vadd.f32 1e-06, %v2301_v42 }
0x111b   :  { %v2306_v15 = vadd.f32 1e-06, %v2300_v32  ;;  %v2261_v16 = vpop.xlane.xlu1 %2260 }
0x111c   :  { %6081 = vrsqrt.f32 %v2307_v7  ;;  %v2267_v57 = vmul.f32 0.03125, %v2261_v16  ;;  %v2258_v58 = vpop.xlane.xlu0 %2257 }
0x111d   :  { %6083 = vrsqrt.f32 %v2306_v15  ;;  %v2266_v2 = vmul.f32 0.03125, %v2258_v58 }
0x111e   :  { %v2273_v37 = vsub.f32 %v6995_v35, %v2267_v57 }
0x111f   :  { %v2272_v5 = vsub.f32 %v6998_v38, %v2266_v2 }
0x1120   :  { %v2279_v59 = vmul.f32 %v2273_v37, %v2273_v37 }
0x1121   :  { %v2278_v60 = vmul.f32 %v2272_v5, %v2272_v5 }
0x1122   :  { %v2295_v61 = vsel %vm270_vm1, %v2279_v59, 0.0 }
0x1123   :  { %2296 = vadd.xlane.f32.xlu1 %v2295_v61  ;;  %v2292_v0 = vsel %vm270_vm1, %v2278_v60, 0.0 }
0x1124   :  { %2293 = vadd.xlane.f32.xlu0 %v2292_v0 }
0x1126   :  { %v6082_v1 = vpop.eup %6081 }
0x1127   :  { %v6084_v3 = vpop.eup %6083  ;;  %v2319_v6 = vmul.f32 %v6082_v1, %v2271_v23 }
0x1128   :  { %v2318_v8 = vmul.f32 %v6084_v3, %v2270_v25 }
0x1129   :  { %v2331_v12 = vmul.f32 %v4756_v10, %v2319_v6 }
0x112a   :  { %v2330_v14 = vmul.f32 %v4756_v10, %v2318_v8 }
0x112b   :  { %v2343_v9 = vadd.f32 %v4757_v54, %v2331_v12 }
0x112c   :  { %v2342_v18 = vadd.f32 %v4757_v54, %v2330_v14 }
0x112e   :  { %5368 = vmatprep.mubr.msk.f32.mxu0 %vm270_vm1, %v2342_v18 }
0x112f   :  { %5369 = vmatmul.mubr.msk.f32.gmra.mrb[36].mxu0 %vm270_vm1, %v2343_v9 }
0x11b0   :  { %v2297_v21 = vpop.xlane.xlu1 %2296 }
0x11b1   :  { %v2303_v19 = vmul.f32 0.03125, %v2297_v21  ;;  %v2294_v44 = vpop.xlane.xlu0 %2293 }
0x11b2   :  { %v2302_v26 = vmul.f32 0.03125, %v2294_v44 }
0x11b3   :  { %v2309_v27 = vadd.f32 1e-06, %v2303_v19 }
0x11b4   :  { %v2308_v28 = vadd.f32 1e-06, %v2302_v26 }
0x11b5   :  { %6085 = vrsqrt.f32 %v2309_v27 }
0x11b6   :  { %6087 = vrsqrt.f32 %v2308_v28  ;;  %v5367_v23 = vpop.f32.mrb[34].mxu0 }
0x11b7   :  { %v2447_v25 = vadd.f32 %v5367_v23, %v7015_v29  ;;  %v2441_v30 = vpop.f32.mrb[35].mxu0 }
0x11b8   :  { %v2442_v31 = vadd.f32 %v7015_v29, %v2441_v30 }
0x11ba   :  { %v7019_v33 = vpack.i.bf16 %v2447_v25, %v2442_v31 }
0x11bc   :  { %5954 = vrot.lane.b32.xlu0 %v7019_v33, %s6252_s0 }
0x11bf   :  { %v6086_v39 = vpop.eup %6085 }
0x11c0   :  { %v6088_v17 = vpop.eup %6087  ;;  %2706 = vrot.lane.b32.xlu0 %v2442_v31, %s6257_s13  ;;  %v2321_v36 = vmul.f32 %v6086_v39, %v2273_v37 }
0x11c1   :  { %v2320_v40 = vmul.f32 %v6088_v17, %v2272_v5 }
0x11c2   :  { %v2333_v41 = vmul.f32 %v4756_v10, %v2321_v36 }
0x11c3   :  { %v2332_v43 = vmul.f32 %v4756_v10, %v2320_v40 }
0x11c4   :  { %v2345_v22 = vadd.f32 %v4757_v54, %v2333_v41 }
0x11c5   :  { %v2344_v49 = vadd.f32 %v4757_v54, %v2332_v43 }
0x11c7   :  { %5371 = vmatprep.mubr.msk.f32.mxu0 %vm270_vm1, %v2344_v49 }
0x11c8   :  { %5372 = vmatmul.mubr.msk.f32.gmra.mrb[38].mxu0 %vm270_vm1, %v2345_v22 }
0x11c9   :  { %5380 = vmatprep.mubr.msk.f32.mxu0 %vm6253_vm3, %v6250_v13 }
0x1202   :  { %v7028_v47 = vpop.f32.mrb[36].mxu0 }
0x1203   :  { %v2451_v48 = vpop.f32.mrb[37].mxu0 }
0x1204   :  { %v7031_v50 = vadd.f32 %v7015_v29, %v2451_v48 }
0x1206   :  { %2481 = vrot.lane.b32.xlu1 %v7031_v50, %s6252_s0  ;;  %2710 = vrot.lane.b32.xlu0 %v7031_v50, %s6257_s13 }
0x120a   :  { %5959 = vrot.lane.b32.xlu1 %v7019_v33, %s6256_s9 }
0x120e   :  { %2716 = vrot.lane.b32.xlu1 %v7031_v50, %s6256_s9 }
0x1212   :  { %2708 = vrot.lane.b32.xlu1 %v2447_v25, %s6257_s13 }
0x122e   :  { %v5955_v10 = vpop.permute.xlu0 %5954 }
0x122f   :  { %v5957_v52 = vunpack.i.h.bf16 %v5955_v10  ;;  %v5956_v54 = vunpack.i.l.bf16 %v5955_v10 }
0x1231   :  { %v5747_v55 = vpack.c.bf16 %v5957_v52, %v5956_v54 }
0x1232   :  { %v2707_v32 = vpop.permute.xlu0 %2706 }
0x1233   :  { %5749 = vmatpush3.bf16.xpose.msk.msra.mxu0 %vm6569_vm5, %v5747_v55 }
0x1234   :  { %5378 = vmatprep.subr.mxu0 %v6250_v13 }
0x1278   :  { %v2482_v51 = vpop.permute.xlu1 %2481  ;;  %v2711_v15 = vpop.permute.xlu0 %2710 }
0x1279   :  { %5379 = vmatpush3.xpose.msk.msra.mxu0 %vm546_vm4, %v2482_v51 }
0x127a   :  { %5753 = vmatprep.subr.bf16.mxu0 %v6251_v62 }
0x127c   :  { %v5960_v4 = vpop.permute.xlu1 %5959  ;;  %5381 = vmatmul.mubr.msk.f32.vlgmr.msra.gmra.mrb[40].mxu0 %vm546_vm4, %v2442_v31 }
0x127d   :  { %v5962_v63 = vunpack.i.h.bf16 %v5960_v4  ;;  %v5961_v53 = vunpack.i.l.bf16 %v5960_v4  ;;  %5383 = vmatprep.mubr.msk.f32.mxu0 %vm6253_vm3, %v6250_v13 }
0x127f   :  { %v5754_v42 = vpack.c.bf16 %v5962_v63, %v5961_v53 }
0x1280   :  { %5384 = vmatmul.mubr.msk.f32.gmra.mrb[42].mxu0 %vm546_vm4, %v2447_v25  ;;  %v2717_v56 = vpop.permute.xlu1 %2716 }
0x1281   :  { %5756 = vmatpush3.bf16.xpose.msk.msra.mxu0 %vm6569_vm5, %v5754_v42  ;;  %5386 = vmatprep.mubr.msk.f32.mxu0 %vm6253_vm3, %v6250_v13 }
0x1282   :  { %5408 = vmatprep.subr.mxu0 %v6250_v13 }
0x1284   :  { %5387 = vmatmul.mubr.msk.f32.gmra.mrb[44].mxu0 %vm546_vm4, %v7031_v50  ;;  %v2709_v7 = vpop.permute.xlu1 %2708 }
0x1285   :  { %5410 = vmatprep.mubr.msk.f32.mxu0 %vm6253_vm3, %v6250_v13 }
0x1289   :  { %5409 = vmatpush3.xpose.msk.msra.mxu0 %vm546_vm4, %v2717_v56 }
0x128a   :  { %5760 = vmatprep.subr.bf16.mxu0 %v6251_v62 }
0x128c   :  { %5411 = vmatmul.mubr.msk.f32.vlgmr.msra.gmra.mrb[46].mxu0 %vm546_vm4, %v2707_v32 }
0x128d   :  { %5413 = vmatprep.mubr.msk.f32.mxu0 %vm6253_vm3, %v6250_v13 }
0x1290   :  { %5414 = vmatmul.mubr.msk.f32.gmra.mrb[48].mxu0 %vm546_vm4, %v2709_v7 }
0x1291   :  { %5416 = vmatprep.mubr.msk.f32.mxu0 %vm6253_vm3, %v6250_v13 }
0x1294   :  { %5417 = vmatmul.mubr.msk.f32.gmra.mrb[50].mxu0 %vm546_vm4, %v2711_v15 }
0x1295   :  { %5438 = vmatprep.mubr.msk.f32.mxu0 %vm6253_vm3, %v6250_v13 }
0x129b   :  { %v7071_v16 = vpop.f32.mrb[38].mxu0 }
0x129c   :  { %v7073_v57 = vpop.f32.mrb[39].mxu0 }
0x134f   :  { %v2561_v58 = vpop.f32.mrb[40].mxu0 }
0x1350   :  { %v2562_v2 = vadd.f32 %v2561_v58, %v6594_v20  ;;  %v5382_v37 = vpop.f32.mrb[41].mxu0 }
0x1352   :  { %v2575_v5 = vsel %vm639_vm7, %v2562_v2, -inf }
0x1353   :  { %2576 = vmax.xlane.f32.xlu1 %v2575_v5  ;;  %v2566_v59 = vpop.f32.mrb[42].mxu0 }
0x1354   :  { %v2567_v60 = vadd.f32 %v2566_v59, %v6594_v20  ;;  %v5385_v61 = vpop.f32.mrb[43].mxu0 }
0x1356   :  { %v2578_v0 = vsel %vm639_vm7, %v2567_v60, -inf }
0x1357   :  { %2579 = vmax.xlane.f32.xlu0 %v2578_v0  ;;  %v2571_v1 = vpop.f32.mrb[44].mxu0 }
0x1358   :  { %v2572_v3 = vadd.f32 %v2571_v1, %v6594_v20  ;;  %v5388_v6 = vpop.f32.mrb[45].mxu0 }
0x135a   :  { %v2581_v8 = vsel %vm639_vm7, %v2572_v3, -inf }
0x135b   :  { %2582 = vmax.xlane.f32.xlu0 %v2581_v8  ;;  %v7109_v8 = vadd.f32 %v7015_v29, %v7073_v57 }
0x135f   :  { %v2796_v12 = vpop.f32.mrb[46].mxu0 }
0x1360   :  { %v2797_v14 = vadd.f32 %v2796_v12, %v6594_v20  ;;  %v5412_v18 = vpop.f32.mrb[47].mxu0  ;;  %v7113_v12 = vadd.f32 %v7071_v16, %v7015_v29 }
0x1362   :  { %v2810_v9 = vsel %vm639_vm7, %v2797_v14, -inf }
0x1363   :  { %2811 = vmax.xlane.f32.xlu0 %v2810_v9  ;;  %v2801_v21 = vpop.f32.mrb[48].mxu0 }
0x1364   :  { %v2802_v19 = vadd.f32 %v2801_v21, %v6594_v20  ;;  %v5415_v44 = vpop.f32.mrb[49].mxu0 }
0x1366   :  { %v2813_v26 = vsel %vm639_vm7, %v2802_v19, -inf }
0x1367   :  { %2814 = vmax.xlane.f32.xlu1 %v2813_v26  ;;  %v2806_v27 = vpop.f32.mrb[50].mxu0 }
0x1368   :  { %v2807_v28 = vadd.f32 %v2806_v27, %v6594_v20  ;;  %v5418_v23 = vpop.f32.mrb[51].mxu0 }
0x136a   :  { %v2816_v25 = vsel %vm639_vm7, %v2807_v28, -inf }
0x136b   :  { %2817 = vmax.xlane.f32.xlu0 %v2816_v25 }
0x1378   :  { %2612 = vrot.lane.b32.xlu1 %v7031_v50, %s6255_s5 }
0x1381   :  { %5964 = vrot.lane.b32.xlu0 %v7019_v33, %s6255_s5 }
0x13e0   :  { %v2577_v30 = vpop.xlane.xlu1 %2576 }
0x13e1   :  { %v2584_v31 = vsub.f32 %v2562_v2, %v2577_v30 }
0x13e3   :  { %v2587_v39 = vmul.f32 1.442695, %v2584_v31 }
0x13e4   :  { %v2580_v17 = vpop.xlane.xlu0 %2579 }
0x13e5   :  { %6089 = vpow2.f32 %v2587_v39  ;;  %v2585_v36 = vsub.f32 %v2567_v60, %v2580_v17 }
0x13e7   :  { %v2589_v40 = vmul.f32 1.442695, %v2585_v36 }
0x13e8   :  { %v2583_v41 = vpop.xlane.xlu0 %2582 }
0x13e9   :  { %6091 = vpow2.f32 %v2589_v40  ;;  %v2586_v43 = vsub.f32 %v2572_v3, %v2583_v41 }
0x13eb   :  { %v2591_v49 = vmul.f32 1.442695, %v2586_v43 }
0x13ed   :  { %6093 = vpow2.f32 %v2591_v49 }
0x13ef   :  { %v6090_v22 = vpop.eup %6089 }
0x13f0   :  { %v2812_v48 = vpop.xlane.xlu0 %2811  ;;  %v2593_v10 = vsel %vm639_vm7, %v6090_v22, 0.0 }
0x13f1   :  { %v2819_v52 = vsub.f32 %v2797_v14, %v2812_v48  ;;  %2594 = vadd.xlane.f32.xlu1 %v2593_v10  ;;  %v7117_v14 = vadd.f32 %v7028_v47, %v7015_v29 }
0x13f3   :  { %v6092_v54 = vpop.eup %6091  ;;  %v2822_v55 = vmul.f32 1.442695, %v2819_v52 }
0x13f4   :  { %v2815_v51 = vpop.xlane.xlu1 %2814  ;;  %v2596_v4 = vsel %vm639_vm7, %v6092_v54, 0.0 }
0x13f5   :  { %6095 = vpow2.f32 %v2822_v55  ;;  %v2820_v63 = vsub.f32 %v2802_v19, %v2815_v51  ;;  %2597 = vadd.xlane.f32.xlu0 %v2596_v4  ;;  %v2473_v55 = vld [vmem:[%s7535_s24 + $0x18] sm:$0xff] }
0x13f7   :  { %v6094_v53 = vpop.eup %6093  ;;  %v2824_v42 = vmul.f32 1.442695, %v2820_v63 }
0x13f8   :  { %v2818_v56 = vpop.xlane.xlu0 %2817  ;;  %v2599_v32 = vsel %vm639_vm7, %v6094_v53, 0.0  ;;  %v2613_v0 = vpop.permute.xlu1 %2612 }
0x13f9   :  { %6097 = vpow2.f32 %v2824_v42  ;;  %v2821_v7 = vsub.f32 %v2807_v28, %v2818_v56  ;;  %2600 = vadd.xlane.f32.xlu1 %v2599_v32 }
0x13fb   :  { %v2826_v15 = vmul.f32 1.442695, %v2821_v7  ;;  %v2470_v7 = vld [vmem:[%s7535_s24] sm:$0xff] }
0x13fc   :  { %v5965_v58 = vpop.permute.xlu0 %5964 }
0x13fd   :  { %6099 = vpow2.f32 %v2826_v15  ;;  %v5967_v2 = vunpack.i.h.bf16 %v5965_v58  ;;  %v5966_v37 = vunpack.i.l.bf16 %v5965_v58  ;;  %v2471_v15 = vld [vmem:[%s7535_s24 + $0x8] sm:$0xff] }
0x13fe   :  { %v7183_v58 = vpack.c.bf16 %v2471_v15, %v2470_v7 }
0x13ff   :  { %v6096_v5 = vpop.eup %6095  ;;  %v5751_v59 = vpack.c.bf16 %v5967_v2, %v5966_v37 }
0x1400   :  { %v2828_v60 = vsel %vm639_vm7, %v6096_v5, 0.0 }
0x1401   :  { %2829 = vadd.xlane.f32.xlu0 %v2828_v60  ;;  %5752 = vmatpush3.bf16.msra.mxu1 %v5751_v59 }
0x1402   :  { %5393 = vmatprep.subr.mxu1 %v6250_v13 }
0x1403   :  { %v7096_v61 = vpop.eup %6097 }
0x1404   :  { %v2831_v1 = vsel %vm639_vm7, %v7096_v61, 0.0 }
0x1405   :  { %2832 = vadd.xlane.f32.xlu1 %v2831_v1  ;;  %5394 = vmatpush3.msra.mxu1 %v2613_v0 }
0x1406   :  { %5757 = vmatprep.subr.bf16.mxu1 %v6251_v62 }
0x1407   :  { %v7101_v3 = vpop.eup %6099 }
0x1408   :  { %v2834_v6 = vsel %vm639_vm7, %v7101_v3, 0.0 }
0x1409   :  { %2835 = vadd.xlane.f32.xlu1 %v2834_v6 }
0x1417   :  { %2847 = vrot.lane.b32.xlu0 %v7031_v50, %s6258_s17  ;;  %v7125_v50 = vpack.i.bf16 %v7109_v8, %v7117_v14 }
0x141a   :  { %5969 = vrot.lane.b32.xlu1 %v7019_v33, %s6258_s17 }
0x141b   :  { %3129 = vrot.lane.b32.xlu0 %v7113_v12, %s6252_s0 }
0x141e   :  { %5974 = vrot.lane.b32.xlu1 %v7125_v50, %s6252_s0 }
0x141f   :  { %3364 = vrot.lane.b32.xlu0 %v7113_v12, %s6256_s9 }
0x1422   :  { %5979 = vrot.lane.b32.xlu1 %v7125_v50, %s6256_s9 }
0x1423   :  { %3356 = vrot.lane.b32.xlu0 %v7109_v8, %s6257_s13 }
0x1426   :  { %3354 = vrot.lane.b32.xlu1 %v7117_v14, %s6257_s13 }
0x142a   :  { %3358 = vrot.lane.b32.xlu1 %v7113_v12, %s6257_s13 }
0x147e   :  { %v2595_v29 = vpop.xlane.xlu1 %2594 }
0x147f   :  { %6101 = vrcp.f32 %v2595_v29 }
0x1482   :  { %v2598_v33 = vpop.xlane.xlu0 %2597 }
0x1483   :  { %6103 = vrcp.f32 %v2598_v33 }
0x1486   :  { %v2601_v47 = vpop.xlane.xlu1 %2600 }
0x1487   :  { %6105 = vrcp.f32 %v2601_v47 }
0x1489   :  { %v6102_v16 = vpop.eup %6101 }
0x148a   :  { %v2603_v57 = vmul.f32 %v6102_v16, %v6090_v22 }
0x148c   :  { %5396 = vmatmul.mubr.msk.f32.vlgmr.msra.gmra.mrb[48].mxu1 %vm639_vm7, %v2603_v57 }
0x148d   :  { %v6104_v18 = vpop.eup %6103  ;;  %5398 = vmatprep.mubr.msk.f32.mxu1 %vm6253_vm3, %v6250_v13 }
0x148e   :  { %v2605_v9 = vmul.f32 %v6104_v18, %v6092_v54  ;;  %v2830_v19 = vpop.xlane.xlu0 %2829  ;;  %v2472_v54 = vld [vmem:[%s7535_s24 + $0x10] sm:$0xff] }
0x148f   :  { %6107 = vrcp.f32 %v2830_v19  ;;  %v5761_v51 = vpack.c.bf16 %v2473_v55, %v2472_v54 }
0x1490   :  { %5399 = vmatmul.mubr.msk.f32.gmra.mrb[50].mxu1 %vm639_vm7, %v2605_v9 }
0x1491   :  { %v6106_v21 = vpop.eup %6105  ;;  %5401 = vmatprep.mubr.msk.f32.mxu1 %vm6253_vm3, %v6250_v13  ;;  %5762 = vmatpush3.bf16.msra.mxu0 %v5761_v51 }
0x1492   :  { %v2833_v44 = vpop.xlane.xlu1 %2832  ;;  %v2607_v26 = vmul.f32 %v6106_v21, %v6094_v53  ;;  %v2848_v36 = vpop.permute.xlu0 %2847  ;;  %5763 = vmatprep.subr.bf16.mxu0 %v6251_v62 }
0x1493   :  { %6109 = vrcp.f32 %v2833_v44 }
0x1494   :  { %5402 = vmatmul.mubr.msk.f32.gmra.mrb[52].mxu1 %vm639_vm7, %v2607_v26 }
0x1495   :  { %5425 = vmatprep.mubr.msk.f32.mxu1 %vm6253_vm3, %v6250_v13 }
0x1496   :  { %v2836_v27 = vpop.xlane.xlu1 %2835  ;;  %v3130_v52 = vpop.permute.xlu0 %3129 }
0x1497   :  { %6111 = vrcp.f32 %v2836_v27 }
0x1499   :  { %v6108_v31 = vpop.eup %6107 }
0x149a   :  { %v5970_v28 = vpop.permute.xlu1 %5969  ;;  %v2838_v17 = vmul.f32 %v6108_v31, %v6096_v5  ;;  %v3365_v47 = vpop.permute.xlu0 %3364 }
0x149b   :  { %v5972_v23 = vunpack.i.h.bf16 %v5970_v28  ;;  %v5971_v25 = vunpack.i.l.bf16 %v5970_v28 }
0x149d   :  { %v5758_v30 = vpack.c.bf16 %v5972_v23, %v5971_v25  ;;  %v6110_v40 = vpop.eup %6109 }
0x149e   :  { %v5975_v39 = vpop.permute.xlu1 %5974  ;;  %v2840_v49 = vmul.f32 %v6110_v40, %v7096_v61  ;;  %v3357_v26 = vpop.permute.xlu0 %3356 }
0x149f   :  { %5759 = vmatpush3.bf16.msra.mxu1 %v5758_v30  ;;  %v5977_v41 = vunpack.i.h.bf16 %v5975_v39  ;;  %v5976_v43 = vunpack.i.l.bf16 %v5975_v39 }
0x14a0   :  { %5423 = vmatprep.subr.mxu1 %v6250_v13 }
0x14a1   :  { %v6112_v22 = vpop.eup %6111  ;;  %v5767_v48 = vpack.c.bf16 %v5977_v41, %v5976_v43 }
0x14a2   :  { %v2842_v10 = vmul.f32 %v6112_v22, %v7101_v3  ;;  %v5980_v59 = vpop.permute.xlu1 %5979 }
0x14a3   :  { %5424 = vmatpush3.msra.mxu1 %v2848_v36  ;;  %v5982_v61 = vunpack.i.h.bf16 %v5980_v59  ;;  %v5981_v0 = vunpack.i.l.bf16 %v5980_v59 }
0x14a4   :  { %5426 = vmatmul.mubr.msk.f32.vlgmr.msra.gmra.mrb[54].mxu1 %vm639_vm7, %v2838_v17  ;;  %5766 = vmatprep.subr.bf16.mxu1 %v6251_v62 }
0x14a5   :  { %5428 = vmatprep.mubr.msk.f32.mxu1 %vm6253_vm3, %v6250_v13  ;;  %v5774_v6 = vpack.c.bf16 %v5982_v61, %v5981_v0 }
0x14a6   :  { %v3355_v18 = vpop.permute.xlu1 %3354 }
0x14a8   :  { %5429 = vmatmul.mubr.msk.f32.gmra.mrb[56].mxu1 %vm639_vm7, %v2840_v49 }
0x14a9   :  { %5431 = vmatprep.mubr.msk.f32.mxu1 %vm6253_vm3, %v6250_v13 }
0x14aa   :  { %5769 = vmatpush3.bf16.xpose.msk.msra.mxu1 %vm6569_vm5, %v5767_v48  ;;  %v3359_v28 = vpop.permute.xlu1 %3358 }
0x14ab   :  { %5464 = vmatprep.subr.mxu1 %v6250_v13 }
0x14ac   :  { %5432 = vmatmul.mubr.msk.f32.gmra.mrb[58].mxu1 %vm639_vm7, %v2842_v10 }
0x14ad   :  { %5466 = vmatprep.mubr.msk.f32.mxu1 %vm6253_vm3, %v6250_v13 }
0x14b2   :  { %5465 = vmatpush3.xpose.msk.msra.mxu1 %vm546_vm4, %v3130_v52 }
0x14b3   :  { %5770 = vmatprep.subr.bf16.mxu1 %v6251_v62 }
0x14b5   :  { %5467 = vmatmul.mubr.msk.f32.vlgmr.msra.gmra.mrb[60].mxu1 %vm546_vm4, %v7117_v14 }
0x14b6   :  { %5469 = vmatprep.mubr.msk.f32.mxu1 %vm6253_vm3, %v6250_v13 }
0x14b9   :  { %5470 = vmatmul.mubr.msk.f32.gmra.mrb[62].mxu1 %vm546_vm4, %v7109_v8 }
0x14ba   :  { %5472 = vmatprep.mubr.msk.f32.mxu1 %vm6253_vm3, %v6250_v13 }
0x14bd   :  { %5473 = vmatmul.mubr.msk.f32.gmra.mrb[64].mxu1 %vm546_vm4, %v7113_v12 }
0x14be   :  { %5481 = vmatprep.mubr.msk.f32.mxu1 %vm6253_vm3, %v6250_v13 }
0x155f   :  { %v2692_v4 = vpop.f32.mrb[48].mxu1 }
0x1560   :  { %v5397_v63 = vpop.f32.mrb[49].mxu1 }
0x1563   :  { %v2697_v53 = vpop.f32.mrb[50].mxu1 }
0x1564   :  { %v5400_v42 = vpop.f32.mrb[51].mxu1 }
0x1567   :  { %v2702_v56 = vpop.f32.mrb[52].mxu1 }
0x1568   :  { %v5403_v32 = vpop.f32.mrb[53].mxu1 }
0x1577   :  { %v2927_v2 = vpop.f32.mrb[54].mxu1 }
0x1578   :  { %v5427_v37 = vpop.f32.mrb[55].mxu1  ;;  %5439 = vmatmul.mubr.msk.f32.vlgmr.msra.gmra.mrb[52].mxu0 %vm546_vm4, %v2927_v2 }
0x1579   :  { %5441 = vmatprep.mubr.msk.f32.mxu0 %vm6253_vm3, %v6250_v13  ;;  %5765 = vmatpush3.bf16.msra.mxu0 %v7183_v58 }
0x157a   :  { %5773 = vmatprep.subr.bf16.mxu0 %v6251_v62 }
0x157b   :  { %v2932_v5 = vpop.f32.mrb[56].mxu1 }
0x157c   :  { %v5430_v60 = vpop.f32.mrb[57].mxu1  ;;  %5442 = vmatmul.mubr.msk.f32.gmra.mrb[54].mxu0 %vm546_vm4, %v2932_v5 }
0x157d   :  { %5444 = vmatprep.mubr.msk.f32.mxu0 %vm6253_vm3, %v6250_v13 }
0x157f   :  { %v2937_v1 = vpop.f32.mrb[58].mxu1 }
0x1580   :  { %v5433_v3 = vpop.f32.mrb[59].mxu1  ;;  %5445 = vmatmul.mubr.msk.f32.gmra.mrb[56].mxu0 %vm546_vm4, %v2937_v1 }
0x1581   :  { %5451 = vmatprep.mubr.msk.f32.mxu0 %vm6253_vm3, %v6250_v13 }
0x1584   :  { %5452 = vmatmul.mubr.msk.f32.vlgmr.msra.gmra.mrb[52].mxu0 %vm546_vm4, %v2692_v4 }
0x1585   :  { %5776 = vmatpush3.bf16.xpose.msk.msra.mxu0 %vm6569_vm5, %v5774_v6  ;;  %5454 = vmatprep.mubr.msk.f32.mxu0 %vm6253_vm3, %v6250_v13 }
0x1586   :  { %5494 = vmatprep.subr.mxu0 %v6250_v13 }
0x1588   :  { %5455 = vmatmul.mubr.msk.f32.gmra.mrb[54].mxu0 %vm546_vm4, %v2697_v53  ;;  %v3209_v8 = vpop.f32.mrb[60].mxu1 }
0x1589   :  { %v3210_v14 = vadd.f32 %v3209_v8, %v6594_v20  ;;  %v5468_v29 = vpop.f32.mrb[61].mxu1  ;;  %5457 = vmatprep.mubr.msk.f32.mxu0 %vm6253_vm3, %v6250_v13 }
0x158b   :  { %v3223_v33 = vsel %vm639_vm7, %v3210_v14, -inf }
0x158c   :  { %5458 = vmatmul.mubr.msk.f32.gmra.mrb[56].mxu0 %vm546_vm4, %v2702_v56  ;;  %3224 = vmax.xlane.f32.xlu0 %v3223_v33  ;;  %v3214_v11 = vpop.f32.mrb[62].mxu1 }
0x158d   :  { %5495 = vmatpush3.xpose.msk.msra.mxu0 %vm546_vm4, %v3365_v47  ;;  %v3215_v16 = vadd.f32 %v3214_v11, %v6594_v20  ;;  %v5471_v57 = vpop.f32.mrb[63].mxu1  ;;  %5496 = vmatprep.mubr.msk.f32.mxu0 %vm6253_vm3, %v6250_v13 }
0x158e   :  { %5780 = vmatprep.subr.bf16.mxu0 %v6251_v62 }
0x158f   :  { %v3226_v9 = vsel %vm639_vm7, %v3215_v16, -inf }
0x1590   :  { %5497 = vmatmul.mubr.msk.f32.vlgmr.msra.gmra.mrb[58].mxu0 %vm546_vm4, %v3355_v18  ;;  %3227 = vmax.xlane.f32.xlu1 %v3226_v9  ;;  %v3219_v21 = vpop.f32.mrb[64].mxu1 }
0x1591   :  { %v3220_v19 = vadd.f32 %v3219_v21, %v6594_v20  ;;  %v5474_v44 = vpop.f32.mrb[65].mxu1  ;;  %5499 = vmatprep.mubr.msk.f32.mxu0 %vm6253_vm3, %v6250_v13  ;;  %5782 = vmatpush3.bf16.msra.mxu0 %v5761_v51 }
0x1592   :  { %5783 = vmatprep.subr.bf16.mxu0 %v6251_v62 }
0x1593   :  { %v3229_v27 = vsel %vm639_vm7, %v3220_v19, -inf }
0x1594   :  { %5500 = vmatmul.mubr.msk.f32.gmra.mrb[60].mxu0 %vm546_vm4, %v3357_v26  ;;  %3230 = vmax.xlane.f32.xlu0 %v3229_v27 }
0x1595   :  { %5502 = vmatprep.mubr.msk.f32.mxu0 %vm6253_vm3, %v6250_v13 }
0x1598   :  { %5503 = vmatmul.mubr.msk.f32.gmra.mrb[62].mxu0 %vm546_vm4, %v3359_v28 }
0x1599   :  { %5524 = vmatprep.mubr.msk.f32.mxu0 %vm6253_vm3, %v6250_v13 }
0x1619   :  { %v3225_v23 = vpop.xlane.xlu0 %3224 }
0x161a   :  { %v3232_v31 = vsub.f32 %v3210_v14, %v3225_v23 }
0x161c   :  { %v3235_v43 = vmul.f32 1.442695, %v3232_v31 }
0x161d   :  { %v3228_v39 = vpop.xlane.xlu1 %3227 }
0x161e   :  { %v3233_v40 = vsub.f32 %v3215_v16, %v3228_v39  ;;  %6113 = vpow2.f32 %v3235_v43 }
0x1620   :  { %v3237_v48 = vmul.f32 1.442695, %v3233_v40 }
0x1621   :  { %v3231_v17 = vpop.xlane.xlu0 %3230 }
0x1622   :  { %v3234_v49 = vsub.f32 %v3220_v19, %v3231_v17  ;;  %6115 = vpow2.f32 %v3237_v48 }
0x1624   :  { %v3239_v52 = vmul.f32 1.442695, %v3234_v49 }
0x1626   :  { %6117 = vpow2.f32 %v3239_v52 }
0x1628   :  { %v7233_v32 = vpop.eup %6113 }
0x1629   :  { %v3241_v5 = vsel %vm639_vm7, %v7233_v32, 0.0 }
0x162c   :  { %v7236_v37 = vpop.eup %6115 }
0x162d   :  { %v3244_v0 = vsel %vm639_vm7, %v7236_v37, 0.0 }
0x1630   :  { %v7241_v60 = vpop.eup %6117 }
0x1631   :  { %v3247_v61 = vsel %vm639_vm7, %v7241_v60, 0.0 }
0x1657   :  { %v3105_v25 = vpop.f32.mrb[52].mxu0 }
0x1658   :  { %3119 = vst.msk [vmem:[#allocation3] sm:$0xff] %vm270_vm1, %v3105_v25  ;;  %v5453_v30 = vpop.f32.mrb[53].mxu0 }
0x1659   :  { %v7270_v30 = vld [vmem:[%s7536_s30] ss:$0 sm:$0xff] }
0x165b   :  { %v3110_v36 = vpop.f32.mrb[54].mxu0 }
0x165c   :  { %3120 = vst.msk [vmem:[#allocation3 + $0x8] sm:$0xff] %vm270_vm1, %v3110_v36  ;;  %v5456_v41 = vpop.f32.mrb[55].mxu0 }
0x165f   :  { %v3115_v22 = vpop.f32.mrb[56].mxu0  ;;  %v3770_v23 = vld [vmem:[#allocation3] sm:$0xff] }
0x1660   :  { %3121 = vst.msk [vmem:[#allocation3 + $0x10] sm:$0xff] %vm270_vm1, %v3115_v22  ;;  %v5459_v10 = vpop.f32.mrb[57].mxu0  ;;  %v3776_v25 = vadd.f32 %v3770_v23, %v6959_v46 }
0x1662   :  { %v7273_v39 = vadd.f32 %v7270_v30, %v3776_v25 }
0x1663   :  { %v3444_v54 = vpop.f32.mrb[58].mxu0  ;;  %v3771_v31 = vld [vmem:[#allocation3 + $0x8] sm:$0xff] }
0x1664   :  { %v3445_v55 = vadd.f32 %v3444_v54, %v6594_v20  ;;  %v5498_v51 = vpop.f32.mrb[59].mxu0  ;;  %v3777_v17 = vadd.f32 %v3771_v31, %v6956_v45 }
0x1666   :  { %v3458_v4 = vsel %vm639_vm7, %v3445_v55, -inf  ;;  %v7279_v40 = vadd.f32 %v7270_v30, %v3777_v17 }
0x1667   :  { %3459 = vmax.xlane.f32.xlu0 %v3458_v4  ;;  %v3449_v63 = vpop.f32.mrb[60].mxu0  ;;  %v3772_v36 = vld [vmem:[#allocation3 + $0x10] sm:$0xff] }
0x1668   :  { %v3450_v53 = vadd.f32 %v3449_v63, %v6594_v20  ;;  %v5501_v42 = vpop.f32.mrb[61].mxu0  ;;  %v3800_v46 = vsel %vm270_vm1, %v7279_v40, 0.0 }
0x166a   :  { %v3461_v56 = vsel %vm639_vm7, %v3450_v53, -inf }
0x166b   :  { %3462 = vmax.xlane.f32.xlu0 %v3461_v56  ;;  %v3454_v7 = vpop.f32.mrb[62].mxu0 }
0x166c   :  { %v3455_v15 = vadd.f32 %v3454_v7, %v6594_v20  ;;  %v5504_v2 = vpop.f32.mrb[63].mxu0 }
0x166e   :  { %v3464_v59 = vsel %vm639_vm7, %v3455_v15, -inf }
0x166f   :  { %3242 = vadd.xlane.f32.xlu0 %v3241_v5  ;;  %3465 = vmax.xlane.f32.xlu1 %v3464_v59 }
0x1673   :  { %3248 = vadd.xlane.f32.xlu0 %v3247_v61  ;;  %3245 = vadd.xlane.f32.xlu1 %v3244_v0 }
0x1684   :  { %5984 = vrot.lane.b32.xlu1 %v7125_v50, %s6255_s5 }
0x16f4   :  { %v3460_v20 = vpop.xlane.xlu0 %3459 }
0x16f5   :  { %v3467_v1 = vsub.f32 %v3445_v55, %v3460_v20 }
0x16f7   :  { %v3470_v3 = vmul.f32 1.442695, %v3467_v1 }
0x16f8   :  { %v3463_v6 = vpop.xlane.xlu0 %3462 }
0x16f9   :  { %6119 = vpow2.f32 %v3470_v3  ;;  %v3468_v8 = vsub.f32 %v3450_v53, %v3463_v6 }
0x16fb   :  { %v3472_v14 = vmul.f32 1.442695, %v3468_v8 }
0x16fc   :  { %v3466_v29 = vpop.xlane.xlu1 %3465  ;;  %v3243_v43 = vpop.xlane.xlu0 %3242 }
0x16fd   :  { %6121 = vpow2.f32 %v3472_v14  ;;  %v3469_v33 = vsub.f32 %v3455_v15, %v3466_v29 }
0x16ff   :  { %v3474_v47 = vmul.f32 1.442695, %v3469_v33 }
0x1700   :  { %v3246_v11 = vpop.xlane.xlu1 %3245  ;;  %v3249_v49 = vpop.xlane.xlu0 %3248 }
0x1701   :  { %6123 = vpow2.f32 %v3474_v47 }
0x1702   :  { %6125 = vrcp.f32 %v3243_v43 }
0x1703   :  { %v7249_v16 = vpop.eup %6119  ;;  %6127 = vrcp.f32 %v3246_v11 }
0x1704   :  { %v5985_v57 = vpop.permute.xlu1 %5984  ;;  %v3476_v18 = vsel %vm639_vm7, %v7249_v16, 0.0  ;;  %6129 = vrcp.f32 %v3249_v49 }
0x1705   :  { %v5987_v9 = vunpack.i.h.bf16 %v5985_v57  ;;  %v5986_v21 = vunpack.i.l.bf16 %v5985_v57  ;;  %3477 = vadd.xlane.f32.xlu1 %v3476_v18 }
0x1707   :  { %v7253_v19 = vpop.eup %6121  ;;  %v5771_v44 = vpack.c.bf16 %v5987_v9, %v5986_v21 }
0x1708   :  { %v3479_v26 = vsel %vm639_vm7, %v7253_v19, 0.0 }
0x1709   :  { %3480 = vadd.xlane.f32.xlu0 %v3479_v26  ;;  %5772 = vmatpush3.bf16.msra.mxu1 %v5771_v44 }
0x170a   :  { %5479 = vmatprep.subr.mxu1 %v6250_v13 }
0x170b   :  { %v7258_v27 = vpop.eup %6123 }
0x170c   :  { %v3482_v28 = vsel %vm639_vm7, %v7258_v27, 0.0  ;;  %v6126_v52 = vpop.eup %6125 }
0x170d   :  { %3483 = vadd.xlane.f32.xlu0 %v3482_v28  ;;  %v3251_v51 = vmul.f32 %v6126_v52, %v7233_v32  ;;  %v6128_v63 = vpop.eup %6127 }
0x170e   :  { %v3253_v42 = vmul.f32 %v6128_v63, %v7236_v37  ;;  %v6130_v56 = vpop.eup %6129  ;;  %v3902_v63 = vld [vmem:[%s7537_s6 + $0x18] sm:$0xff] }
0x1716   :  { %5989 = vrot.lane.b32.xlu1 %v7125_v50, %s6258_s17  ;;  %v3797_v50 = vsel %vm270_vm1, %v7273_v39, 0.0 }
0x171a   :  { %3495 = vrot.lane.b32.xlu1 %v7113_v12, %s6258_s17 }
0x1723   :  { %3260 = vrot.lane.b32.xlu0 %v7113_v12, %s6255_s5  ;;  %v3778_v12 = vadd.f32 %v3772_v36, %v6973_v24 }
0x1725   :  { %v7285_v41 = vadd.f32 %v7270_v30, %v3778_v12 }
0x1727   :  { %v3803_v45 = vsel %vm270_vm1, %v7285_v41, 0.0 }
0x173e   :  { %3798 = vadd.xlane.f32.xlu1 %v3797_v50 }
0x1742   :  { %3801 = vadd.xlane.f32.xlu0 %v3800_v46 }
0x1746   :  { %3804 = vadd.xlane.f32.xlu0 %v3803_v45 }
0x1792   :  { %v3478_v22 = vpop.xlane.xlu1 %3477 }
0x1793   :  { %6131 = vrcp.f32 %v3478_v22 }
0x1796   :  { %v3481_v48 = vpop.xlane.xlu0 %3480  ;;  %v5990_v10 = vpop.permute.xlu1 %5989 }
0x1797   :  { %v5992_v54 = vunpack.i.h.bf16 %v5990_v10  ;;  %v5991_v55 = vunpack.i.l.bf16 %v5990_v10  ;;  %6133 = vrcp.f32 %v3481_v48 }
0x1799   :  { %v5778_v53 = vpack.c.bf16 %v5992_v54, %v5991_v55  ;;  %v3899_v54 = vld [vmem:[%s7537_s6] sm:$0xff]  ;;  %v3900_v55 = vld [vmem:[%s7537_s6 + $0x8] sm:$0xff] }
0x179a   :  { %v3484_v24 = vpop.xlane.xlu0 %3483  ;;  %v3496_v7 = vpop.permute.xlu1 %3495 }
0x179b   :  { %6135 = vrcp.f32 %v3484_v24 }
0x179d   :  { %v6132_v32 = vpop.eup %6131 }
0x179e   :  { %v3261_v4 = vpop.permute.xlu0 %3260  ;;  %v3486_v15 = vmul.f32 %v6132_v32, %v7249_v16 }
0x179f   :  { %5480 = vmatpush3.msra.mxu1 %v3261_v4  ;;  %v3901_v4 = vld [vmem:[%s7537_s6 + $0x10] sm:$0xff] }
0x17a0   :  { %5482 = vmatmul.mubr.msk.f32.vlgmr.msra.gmra.mrb[66].mxu1 %vm639_vm7, %v3251_v51  ;;  %5777 = vmatprep.subr.bf16.mxu1 %v6251_v62  ;;  %v3255_v62 = vmul.f32 %v6130_v56, %v7241_v60  ;;  %v5786_v51 = vpack.c.bf16 %v3900_v55, %v3899_v54  ;;  %v4063_v55 = vld [vmem:[%s7540_s11 + $0x50] sm:$0xff] }
0x17a1   :  { %5779 = vmatpush3.bf16.msra.mxu1 %v5778_v53  ;;  %5484 = vmatprep.mubr.msk.f32.mxu1 %vm6253_vm3, %v6250_v13  ;;  %v6134_v2 = vpop.eup %6133  ;;  %v5790_v53 = vpack.c.bf16 %v3902_v63, %v3901_v4  ;;  %v4065_v63 = vld [vmem:[%s7540_s11 + $0x60] sm:$0xff] }
0x17a2   :  { %5509 = vmatprep.subr.mxu1 %v6250_v13  ;;  %v3488_v37 = vmul.f32 %v6134_v2, %v7253_v19 }
0x17a4   :  { %5485 = vmatmul.mubr.msk.f32.gmra.mrb[68].mxu1 %vm639_vm7, %v3253_v42 }
0x17a5   :  { %5510 = vmatpush3.msra.mxu1 %v3496_v7  ;;  %5487 = vmatprep.mubr.msk.f32.mxu1 %vm6253_vm3, %v6250_v13  ;;  %v6136_v5 = vpop.eup %6135 }
0x17a6   :  { %v3490_v59 = vmul.f32 %v6136_v5, %v7258_v27  ;;  %5787 = vmatprep.subr.bf16.mxu1 %v5786_v51 }
0x17a8   :  { %5488 = vmatmul.mubr.msk.f32.gmra.mrb[70].mxu1 %vm639_vm7, %v3255_v62 }
0x17a9   :  { %5511 = vmatprep.mubr.msk.f32.mxu1 %vm6253_vm3, %v6250_v13 }
0x17ac   :  { %5512 = vmatmul.mubr.msk.f32.vlgmr.msra.gmra.mrb[72].mxu1 %vm639_vm7, %v3486_v15 }
0x17ad   :  { %5514 = vmatprep.mubr.msk.f32.mxu1 %vm6253_vm3, %v6250_v13  ;;  %5789 = vmatpush3.bf16.msra.mxu1 %v5786_v51  ;;  %v4064_v51 = vld [vmem:[%s7540_s11 + $0x58] sm:$0xff] }
0x17ae   :  { %5791 = vmatprep.subr.bf16.mxu1 %v5790_v53  ;;  %v5814_v4 = vpack.c.bf16 %v4064_v51, %v4063_v55 }
0x17b0   :  { %5515 = vmatmul.mubr.msk.f32.gmra.mrb[74].mxu1 %vm639_vm7, %v3488_v37 }
0x17b1   :  { %5517 = vmatprep.mubr.msk.f32.mxu1 %vm6253_vm3, %v6250_v13  ;;  %5793 = vmatpush3.bf16.msra.mxu1 %v5790_v53  ;;  %v4066_v53 = vld [vmem:[%s7540_s11 + $0x68] sm:$0xff] }
0x17b4   :  { %5518 = vmatmul.mubr.msk.f32.gmra.mrb[76].mxu1 %vm639_vm7, %v3490_v59 }
0x17cb   :  { %v3799_v18 = vpop.xlane.xlu1 %3798 }
0x17cc   :  { %v3815_v21 = vmul.f32 0.03125, %v3799_v18 }
0x17ce   :  { %v7338_v23 = vsub.f32 %v7273_v39, %v3815_v21 }
0x17cf   :  { %v3802_v16 = vpop.xlane.xlu0 %3801 }
0x17d0   :  { %v3816_v31 = vmul.f32 0.03125, %v3802_v16 }
0x17d2   :  { %v7349_v45 = vsub.f32 %v7279_v40, %v3816_v31 }
0x17d3   :  { %v3805_v27 = vpop.xlane.xlu0 %3804 }
0x17d4   :  { %v3817_v17 = vmul.f32 0.03125, %v3805_v27  ;;  %v3828_v52 = vmul.f32 %v7349_v45, %v7349_v45 }
0x17d6   :  { %v7352_v43 = vsub.f32 %v7285_v41, %v3817_v17 }
0x17d8   :  { %v3829_v24 = vmul.f32 %v7352_v43, %v7352_v43 }
0x1873   :  { %v3340_v60 = vpop.f32.mrb[66].mxu1 }
0x1874   :  { %v5483_v61 = vpop.f32.mrb[67].mxu1 }
0x1877   :  { %v3345_v0 = vpop.f32.mrb[68].mxu1 }
0x1878   :  { %v5486_v20 = vpop.f32.mrb[69].mxu1 }
0x187b   :  { %v3350_v1 = vpop.f32.mrb[70].mxu1 }
0x187c   :  { %v5489_v3 = vpop.f32.mrb[71].mxu1 }
0x187f   :  { %v3575_v6 = vpop.f32.mrb[72].mxu1 }
0x1880   :  { %v5513_v8 = vpop.f32.mrb[73].mxu1  ;;  %5525 = vmatmul.mubr.msk.f32.vlgmr.msra.gmra.mrb[64].mxu0 %vm546_vm4, %v3575_v6 }
0x1881   :  { %5527 = vmatprep.mubr.msk.f32.mxu0 %vm6253_vm3, %v6250_v13  ;;  %5785 = vmatpush3.bf16.msra.mxu0 %v7183_v58 }
0x1883   :  { %v3580_v14 = vpop.f32.mrb[74].mxu1 }
0x1884   :  { %v5516_v29 = vpop.f32.mrb[75].mxu1  ;;  %5528 = vmatmul.mubr.msk.f32.gmra.mrb[66].mxu0 %vm546_vm4, %v3580_v14 }
0x1885   :  { %5530 = vmatprep.mubr.msk.f32.mxu0 %vm6253_vm3, %v6250_v13 }
0x1887   :  { %v3585_v33 = vpop.f32.mrb[76].mxu1 }
0x1888   :  { %v5519_v47 = vpop.f32.mrb[77].mxu1  ;;  %5531 = vmatmul.mubr.msk.f32.gmra.mrb[68].mxu0 %vm546_vm4, %v3585_v33 }
0x1889   :  { %5537 = vmatprep.mubr.msk.f32.mxu0 %vm6253_vm3, %v6250_v13 }
0x188c   :  { %5538 = vmatmul.mubr.msk.f32.vlgmr.msra.gmra.mrb[64].mxu0 %vm546_vm4, %v3340_v60 }
0x188d   :  { %5540 = vmatprep.mubr.msk.f32.mxu0 %vm6253_vm3, %v6250_v13 }
0x1890   :  { %5541 = vmatmul.mubr.msk.f32.gmra.mrb[66].mxu0 %vm546_vm4, %v3345_v0 }
0x1891   :  { %5543 = vmatprep.mubr.msk.f32.mxu0 %vm6253_vm3, %v6250_v13 }
0x1894   :  { %5544 = vmatmul.mubr.msk.f32.gmra.mrb[68].mxu0 %vm546_vm4, %v3350_v1 }
0x195f   :  { %v3753_v58 = vpop.f32.mrb[64].mxu0 }
0x1960   :  { %3767 = vst.msk [vmem:[#allocation3 + $0x18] sm:$0xff] %vm270_vm1, %v3753_v58  ;;  %v5539_v11 = vpop.f32.mrb[65].mxu0 }
0x1963   :  { %v3758_v57 = vpop.f32.mrb[66].mxu0 }
0x1964   :  { %3768 = vst.msk [vmem:[#allocation3 + $0x20] sm:$0xff] %vm270_vm1, %v3758_v57  ;;  %v5542_v9 = vpop.f32.mrb[67].mxu0  ;;  %v7392_v57 = vld [vmem:[%s7538_s7] ss:$0 sm:$0xff] }
0x1965   :  { %v7396_v9 = vld [vmem:[%s7539_s10] ss:$0 sm:$0xff] }
0x1967   :  { %v3763_v19 = vpop.f32.mrb[68].mxu0  ;;  %v3773_v44 = vld [vmem:[#allocation3 + $0x18] sm:$0xff] }
0x1968   :  { %3769 = vst.msk [vmem:[#allocation3 + $0x28] sm:$0xff] %vm270_vm1, %v3763_v19  ;;  %v5545_v26 = vpop.f32.mrb[69].mxu0  ;;  %v3779_v13 = vadd.f32 %v3773_v44, %v6970_v34  ;;  %v3827_v34 = vmul.f32 %v7338_v23, %v7338_v23 }
0x196a   :  { %v7335_v28 = vadd.f32 %v7270_v30, %v3779_v13  ;;  %v3833_v48 = vsel %vm270_vm1, %v3827_v34, 0.0  ;;  %v4055_v34 = vld [vmem:[%s7540_s11 + $0x10] sm:$0xff] }
0x196b   :  { %v3774_v25 = vld [vmem:[#allocation3 + $0x20] sm:$0xff] }
0x196c   :  { %v3806_v36 = vsel %vm270_vm1, %v7335_v28, 0.0  ;;  %v3780_v50 = vadd.f32 %v3774_v25, %v6998_v38 }
0x196d   :  { %3807 = vadd.xlane.f32.xlu1 %v3806_v36  ;;  %v4053_v36 = vld [vmem:[%s7540_s11] sm:$0xff] }
0x196e   :  { %v7344_v12 = vadd.f32 %v7270_v30, %v3780_v50  ;;  %v4054_v50 = vld [vmem:[%s7540_s11 + $0x8] sm:$0xff] }
0x196f   :  { %v3775_v46 = vld [vmem:[#allocation3 + $0x28] sm:$0xff] }
0x1970   :  { %v3809_v49 = vsel %vm270_vm1, %v7344_v12, 0.0  ;;  %v3781_v38 = vadd.f32 %v3775_v46, %v6995_v35  ;;  %v3839_v35 = vsel %vm270_vm1, %v3829_v24, 0.0  ;;  %v5794_v46 = vpack.c.bf16 %v4054_v50, %v4053_v36  ;;  %v4060_v24 = vld [vmem:[%s7540_s11 + $0x38] sm:$0xff] }
0x1971   :  { %3810 = vadd.xlane.f32.xlu0 %v3809_v49  ;;  %v4057_v49 = vld [vmem:[%s7540_s11 + $0x20] sm:$0xff] }
0x1972   :  { %v7358_v22 = vadd.f32 %v7270_v30, %v3781_v38  ;;  %v3836_v30 = vsel %vm270_vm1, %v3828_v52, 0.0  ;;  %v4058_v38 = vld [vmem:[%s7540_s11 + $0x28] sm:$0xff]  ;;  %5795 = vmatprep.subr.bf16.mxu1 %v5794_v46 }
0x1974   :  { %v3812_v10 = vsel %vm270_vm1, %v7358_v22, 0.0 }
0x1975   :  { %3834 = vadd.xlane.f32.xlu0 %v3833_v48  ;;  %3813 = vadd.xlane.f32.xlu1 %v3812_v10  ;;  %v5802_v48 = vpack.c.bf16 %v4058_v38, %v4057_v49  ;;  %v4059_v10 = vld [vmem:[%s7540_s11 + $0x30] sm:$0xff] }
0x1976   :  { %v5806_v52 = vpack.c.bf16 %v4060_v24, %v4059_v10 }
0x1979   :  { %3840 = vadd.xlane.f32.xlu0 %v3839_v35  ;;  %3837 = vadd.xlane.f32.xlu1 %v3836_v30  ;;  %v4061_v35 = vld [vmem:[%s7540_s11 + $0x40] sm:$0xff]  ;;  %v4062_v30 = vld [vmem:[%s7540_s11 + $0x48] sm:$0xff] }
0x197a   :  { %v5810_v54 = vpack.c.bf16 %v4062_v30, %v4061_v35 }
0x19fa   :  { %v3808_v42 = vpop.xlane.xlu1 %3807 }
0x19fb   :  { %v3818_v56 = vmul.f32 0.03125, %v3808_v42  ;;  %v5818_v42 = vpack.c.bf16 %v4066_v53, %v4065_v63 }
0x19fd   :  { %v7374_v7 = vsub.f32 %v7335_v28, %v3818_v56  ;;  %v4067_v56 = vld [vmem:[%s7540_s11 + $0x70] sm:$0xff] }
0x19fe   :  { %v3811_v62 = vpop.xlane.xlu0 %3810 }
0x19ff   :  { %v3819_v32 = vmul.f32 0.03125, %v3811_v62  ;;  %v3830_v15 = vmul.f32 %v7374_v7, %v7374_v7  ;;  %v4068_v62 = vld [vmem:[%s7540_s11 + $0x78] sm:$0xff] }
0x1a01   :  { %v7379_v2 = vsub.f32 %v7344_v12, %v3819_v32  ;;  %v3842_v37 = vsel %vm270_vm1, %v3830_v15, 0.0  ;;  %v5822_v32 = vpack.c.bf16 %v4068_v62, %v4067_v56 }
0x1a02   :  { %v3835_v5 = vpop.xlane.xlu0 %3834  ;;  %3843 = vadd.xlane.f32.xlu1 %v3842_v37  ;;  %v3814_v59 = vpop.xlane.xlu1 %3813 }
0x1a03   :  { %v3851_v60 = vmul.f32 0.03125, %v3835_v5  ;;  %v3820_v61 = vmul.f32 0.03125, %v3814_v59  ;;  %v3831_v0 = vmul.f32 %v7379_v2, %v7379_v2 }
0x1a05   :  { %v3857_v20 = vadd.f32 1e-06, %v3851_v60  ;;  %v7385_v1 = vsub.f32 %v7358_v22, %v3820_v61  ;;  %v3845_v3 = vsel %vm270_vm1, %v3831_v0, 0.0 }
0x1a06   :  { %3846 = vadd.xlane.f32.xlu0 %v3845_v3  ;;  %v3841_v6 = vpop.xlane.xlu0 %3840  ;;  %v3838_v8 = vpop.xlane.xlu1 %3837 }
0x1a07   :  { %6137 = vrsqrt.f32 %v3857_v20  ;;  %v3853_v14 = vmul.f32 0.03125, %v3841_v6  ;;  %v3852_v29 = vmul.f32 0.03125, %v3838_v8  ;;  %v3832_v33 = vmul.f32 %v7385_v1, %v7385_v1 }
0x1a09   :  { %v3859_v47 = vadd.f32 1e-06, %v3853_v14  ;;  %v3858_v58 = vadd.f32 1e-06, %v3852_v29  ;;  %v3848_v11 = vsel %vm270_vm1, %v3832_v33, 0.0 }
0x1a0a   :  { %3849 = vadd.xlane.f32.xlu1 %v3848_v11 }
0x1a0b   :  { %6139 = vrsqrt.f32 %v3859_v47 }
0x1a0c   :  { %6141 = vrsqrt.f32 %v3858_v58 }
0x1a11   :  { %v6138_v16 = vpop.eup %6137 }
0x1a12   :  { %v3869_v18 = vmul.f32 %v6138_v16, %v7338_v23 }
0x1a14   :  { %v3881_v21 = vmul.f32 %v7392_v57, %v3869_v18 }
0x1a15   :  { %v6140_v19 = vpop.eup %6139 }
0x1a16   :  { %v6142_v44 = vpop.eup %6141  ;;  %v3893_v26 = vadd.f32 %v7396_v9, %v3881_v21  ;;  %v3871_v13 = vmul.f32 %v6140_v19, %v7352_v43  ;;  %v4816_v19 = vld [vmem:[%s7541_s15] ss:$0 sm:$0xff] }
0x1a17   :  { %v3870_v27 = vmul.f32 %v6142_v44, %v7349_v45  ;;  %v4056_v45 = vld [vmem:[%s7540_s11 + $0x18] sm:$0xff] }
0x1a18   :  { %5554 = vmatprep.mubr.msk.f32.mxu1 %vm270_vm1, %v3893_v26  ;;  %v3883_v23 = vmul.f32 %v7392_v57, %v3871_v13  ;;  %v5798_v43 = vpack.c.bf16 %v4056_v45, %v4055_v34 }
0x1a19   :  { %v3882_v25 = vmul.f32 %v7392_v57, %v3870_v27 }
0x1a1a   :  { %v3895_v31 = vadd.f32 %v7396_v9, %v3883_v23 }
0x1a1b   :  { %v3894_v17 = vadd.f32 %v7396_v9, %v3882_v25 }
0x1a1d   :  { %5555 = vmatmul.mubr.msk.f32.vlgmr.msra.gmra.mrb[78].mxu1 %vm270_vm1, %v3894_v17 }
0x1a1e   :  { %5557 = vmatprep.mubr.msk.f32.mxu1 %vm270_vm1, %v3895_v31  ;;  %5797 = vmatpush3.bf16.msra.mxu1 %v5794_v46 }
0x1a1f   :  { %5799 = vmatprep.subr.bf16.mxu1 %v5798_v43 }
0x1a22   :  { %5801 = vmatpush3.bf16.msra.mxu1 %v5798_v43 }
0x1a23   :  { %5803 = vmatprep.subr.bf16.mxu1 %v5802_v48 }
0x1a26   :  { %5805 = vmatpush3.bf16.msra.mxu1 %v5802_v48 }
0x1a27   :  { %5807 = vmatprep.subr.bf16.mxu1 %v5806_v52 }
0x1a2a   :  { %5809 = vmatpush3.bf16.msra.mxu1 %v5806_v52 }
0x1a2b   :  { %5811 = vmatprep.subr.bf16.mxu1 %v5810_v54 }
0x1a2e   :  { %5813 = vmatpush3.bf16.msra.mxu1 %v5810_v54 }
0x1a2f   :  { %5815 = vmatprep.subr.bf16.mxu1 %v5814_v4 }
0x1a32   :  { %5817 = vmatpush3.bf16.msra.mxu1 %v5814_v4 }
0x1a33   :  { %5819 = vmatprep.subr.bf16.mxu1 %v5818_v42 }
0x1a36   :  { %5821 = vmatpush3.bf16.msra.mxu1 %v5818_v42 }
0x1a37   :  { %5823 = vmatprep.subr.bf16.mxu1 %v5822_v32 }
0x1a3a   :  { %5825 = vmatpush3.bf16.msra.mxu1 %v5822_v32 }
0x1a8f   :  { %v3844_v15 = vpop.xlane.xlu1 %3843 }
0x1a90   :  { %v3854_v37 = vmul.f32 0.03125, %v3844_v15 }
0x1a92   :  { %v3860_v5 = vadd.f32 1e-06, %v3854_v37 }
0x1a93   :  { %v3847_v59 = vpop.xlane.xlu0 %3846 }
0x1a94   :  { %6143 = vrsqrt.f32 %v3860_v5  ;;  %v3855_v60 = vmul.f32 0.03125, %v3847_v59 }
0x1a96   :  { %v3861_v61 = vadd.f32 1e-06, %v3855_v60 }
0x1a97   :  { %v3850_v0 = vpop.xlane.xlu1 %3849 }
0x1a98   :  { %6145 = vrsqrt.f32 %v3861_v61  ;;  %v3856_v20 = vmul.f32 0.03125, %v3850_v0  ;;  %v4823_v0 = vld [vmem:[%s7542_s16] ss:$0 sm:$0xff] }
0x1a9a   :  { %v3862_v3 = vadd.f32 1e-06, %v3856_v20 }
0x1a9c   :  { %6147 = vrsqrt.f32 %v3862_v3 }
0x1a9e   :  { %v6144_v6 = vpop.eup %6143 }
0x1a9f   :  { %v3872_v8 = vmul.f32 %v6144_v6, %v7374_v7 }
0x1aa1   :  { %v3884_v14 = vmul.f32 %v7392_v57, %v3872_v8 }
0x1aa2   :  { %v6146_v29 = vpop.eup %6145 }
0x1aa3   :  { %v3896_v33 = vadd.f32 %v7396_v9, %v3884_v14  ;;  %v3873_v47 = vmul.f32 %v6146_v29, %v7379_v2 }
0x1aa5   :  { %5558 = vmatmul.mubr.msk.f32.gmra.mrb[80].mxu1 %vm270_vm1, %v3896_v33  ;;  %v3885_v58 = vmul.f32 %v7392_v57, %v3873_v47 }
0x1aa6   :  { %v6148_v11 = vpop.eup %6147 }
0x1aa7   :  { %v3897_v16 = vadd.f32 %v7396_v9, %v3885_v58  ;;  %v3874_v18 = vmul.f32 %v6148_v11, %v7385_v1 }
0x1aa9   :  { %5560 = vmatprep.mubr.msk.f32.mxu1 %vm270_vm1, %v3897_v16  ;;  %v3886_v7 = vmul.f32 %v7392_v57, %v3874_v18 }
0x1aab   :  { %v3898_v21 = vadd.f32 %v7396_v9, %v3886_v7 }
0x1aad   :  { %5561 = vmatmul.mubr.msk.f32.gmra.mrb[82].mxu1 %vm270_vm1, %v3898_v21 }
0x1af0   :  { %v5556_v44 = vpop.f32.mrb[78].mxu1 }
0x1af1   :  { %v4000_v2 = vadd.f32 %v5556_v44, %v4816_v19  ;;  %v3994_v26 = vpop.f32.mrb[79].mxu1 }
0x1af2   :  { %v3995_v13 = vadd.f32 %v4816_v19, %v3994_v26 }
0x1af3   :  { %v4030_v27 = vmul.f32 0.70710677, %v4000_v2  ;;  %v4024_v50 = vmul.f32 0.5, %v4000_v2 }
0x1af4   :  { %v4029_v23 = vmul.f32 0.70710677, %v3995_v13  ;;  %v4023_v17 = vmul.f32 0.5, %v3995_v13 }
0x1af5   :  { %6149 = verf.f32 %v4030_v27 }
0x1af6   :  { %6151 = verf.f32 %v4029_v23 }
0x1aff   :  { %v6150_v25 = vpop.eup %6149 }
0x1b00   :  { %v6152_v31 = vpop.eup %6151  ;;  %v4042_v1 = vadd.f32 1.0, %v6150_v25 }
0x1b01   :  { %v4041_v36 = vadd.f32 1.0, %v6152_v31 }
0x1b02   :  { %v4048_v34 = vmul.f32 %v4042_v1, %v4024_v50 }
0x1b03   :  { %v4047_v57 = vmul.f32 %v4041_v36, %v4023_v17 }
0x1b05   :  { %5595 = vmatprep.mubr.f32.mxu1 %v4047_v57 }
0x1b06   :  { %5596 = vmatmul.mubr.f32.vlgmr.msra.gmra.mrb[84].mxu1 %v4048_v34  ;;  %v4281_v34 = vld [vmem:[%s7543_s18] sm:$0xff] }
0x1b78   :  { %v5559_v9 = vpop.f32.mrb[80].mxu1 }
0x1b79   :  { %v4010_v46 = vadd.f32 %v5559_v9, %v4816_v19  ;;  %v4004_v45 = vpop.f32.mrb[81].mxu1  ;;  %v4282_v9 = vld [vmem:[%s7543_s18 + $0x8] sm:$0xff] }
0x1b7a   :  { %v4005_v43 = vadd.f32 %v4816_v19, %v4004_v45  ;;  %v4283_v45 = vld [vmem:[%s7543_s18 + $0x10] sm:$0xff] }
0x1b7b   :  { %v4032_v49 = vmul.f32 0.70710677, %v4010_v46  ;;  %v4026_v53 = vmul.f32 0.5, %v4010_v46  ;;  %v5826_v46 = vpack.c.bf16 %v4282_v9, %v4281_v34 }
0x1b7c   :  { %v4031_v38 = vmul.f32 0.70710677, %v4005_v43  ;;  %v4025_v4 = vmul.f32 0.5, %v4005_v43  ;;  %v4284_v43 = vld [vmem:[%s7543_s18 + $0x18] sm:$0xff] }
0x1b7d   :  { %6153 = verf.f32 %v4032_v49  ;;  %5827 = vmatprep.subr.bf16.mxu0 %v5826_v46  ;;  %v5830_v49 = vpack.c.bf16 %v4284_v43, %v4283_v45 }
0x1b7e   :  { %6155 = verf.f32 %v4031_v38  ;;  %5829 = vmatpush3.bf16.msra.mxu0 %v5826_v46 }
0x1b7f   :  { %5831 = vmatprep.subr.bf16.mxu0 %v5830_v49 }
0x1b80   :  { %v5562_v48 = vpop.f32.mrb[82].mxu1 }
0x1b81   :  { %v4020_v10 = vadd.f32 %v5562_v48, %v4816_v19  ;;  %v4014_v24 = vpop.f32.mrb[83].mxu1 }
0x1b82   :  { %v4015_v52 = vadd.f32 %v4816_v19, %v4014_v24  ;;  %5833 = vmatpush3.bf16.msra.mxu0 %v5830_v49 }
0x1b83   :  { %v4034_v35 = vmul.f32 0.70710677, %v4020_v10  ;;  %v4028_v59 = vmul.f32 0.5, %v4020_v10 }
0x1b84   :  { %v4033_v30 = vmul.f32 0.70710677, %v4015_v52  ;;  %v4027_v37 = vmul.f32 0.5, %v4015_v52 }
0x1b85   :  { %6157 = verf.f32 %v4034_v35 }
0x1b86   :  { %6159 = verf.f32 %v4033_v30 }
0x1b87   :  { %v6154_v54 = vpop.eup %6153 }
0x1b88   :  { %v6156_v55 = vpop.eup %6155  ;;  %v4044_v51 = vadd.f32 1.0, %v6154_v54 }
0x1b89   :  { %v4043_v63 = vadd.f32 1.0, %v6156_v55 }
0x1b8a   :  { %v4050_v56 = vmul.f32 %v4044_v51, %v4026_v53 }
0x1b8b   :  { %v4049_v42 = vmul.f32 %v4043_v63, %v4025_v4 }
0x1b8d   :  { %5598 = vmatprep.mubr.f32.mxu1 %v4049_v42 }
0x1b8e   :  { %5599 = vmatmul.mubr.f32.gmra.mrb[86].mxu1 %v4050_v56 }
0x1b8f   :  { %v6158_v62 = vpop.eup %6157 }
0x1b90   :  { %v6160_v32 = vpop.eup %6159  ;;  %v4046_v15 = vadd.f32 1.0, %v6158_v62 }
0x1b91   :  { %v4045_v5 = vadd.f32 1.0, %v6160_v32 }
0x1b92   :  { %v4052_v61 = vmul.f32 %v4046_v15, %v4028_v59 }
0x1b93   :  { %v4051_v60 = vmul.f32 %v4045_v5, %v4027_v37 }
0x1b95   :  { %5601 = vmatprep.mubr.f32.mxu1 %v4051_v60 }
0x1b96   :  { %5602 = vmatmul.mubr.f32.gmra.mrb[88].mxu1 %v4052_v61 }
0x1bd9   :  { %v5597_v20 = vpop.f32.mrb[84].mxu1 }
0x1bda   :  { %v4148_v3 = vadd.f32 %v5597_v20, %v4823_v0  ;;  %v4142_v6 = vpop.f32.mrb[85].mxu1 }
0x1bdb   :  { %v4143_v8 = vadd.f32 %v4823_v0, %v4142_v6 }
0x1bdc   :  { %v4172_v14 = vadd.f32 %v4148_v3, %v7279_v40 }
0x1bdd   :  { %v4171_v29 = vadd.f32 %v4143_v8, %v7273_v39  ;;  %v4824_v8 = vld [vmem:[%s7544_s22] ss:$0 sm:$0xff] }
0x1bde   :  { %v4182_v33 = vsel %vm270_vm1, %v4172_v14, 0.0 }
0x1bdf   :  { %4183 = vadd.xlane.f32.xlu1 %v4182_v33  ;;  %v4179_v47 = vsel %vm270_vm1, %v4171_v29, 0.0 }
0x1be0   :  { %4180 = vadd.xlane.f32.xlu0 %v4179_v47  ;;  %v4825_v47 = vld [vmem:[%s7545_s23] ss:$0 sm:$0xff] }
0x1c61   :  { %v5600_v58 = vpop.f32.mrb[86].mxu1 }
0x1c62   :  { %v4158_v11 = vadd.f32 %v5600_v58, %v4823_v0  ;;  %v4152_v16 = vpop.f32.mrb[87].mxu1 }
0x1c63   :  { %v4153_v18 = vadd.f32 %v4823_v0, %v4152_v16 }
0x1c64   :  { %v4174_v7 = vadd.f32 %v4158_v11, %v7335_v28 }
0x1c65   :  { %v4173_v21 = vadd.f32 %v4153_v18, %v7285_v41 }
0x1c66   :  { %v4188_v19 = vsel %vm270_vm1, %v4174_v7, 0.0 }
0x1c67   :  { %4189 = vadd.xlane.f32.xlu1 %v4188_v19  ;;  %v4185_v40 = vsel %vm270_vm1, %v4173_v21, 0.0 }
0x1c68   :  { %4186 = vadd.xlane.f32.xlu0 %v4185_v40 }
0x1c69   :  { %v5603_v39 = vpop.f32.mrb[88].mxu1 }
0x1c6a   :  { %v4168_v44 = vadd.f32 %v5603_v39, %v4823_v0  ;;  %v4162_v2 = vpop.f32.mrb[89].mxu1 }
0x1c6b   :  { %v4163_v26 = vadd.f32 %v4823_v0, %v4162_v2 }
0x1c6c   :  { %v4176_v13 = vadd.f32 %v4168_v44, %v7358_v22  ;;  %v4184_v27 = vpop.xlane.xlu1 %4183 }
0x1c6d   :  { %v4175_v23 = vadd.f32 %v4163_v26, %v7344_v12  ;;  %v4198_v25 = vmul.f32 0.03125, %v4184_v27  ;;  %v4181_v28 = vpop.xlane.xlu0 %4180 }
0x1c6e   :  { %v4197_v41 = vmul.f32 0.03125, %v4181_v28  ;;  %v4194_v31 = vsel %vm270_vm1, %v4176_v13, 0.0 }
0x1c6f   :  { %v4204_v1 = vsub.f32 %v4172_v14, %v4198_v25  ;;  %4195 = vadd.xlane.f32.xlu1 %v4194_v31  ;;  %v4191_v17 = vsel %vm270_vm1, %v4175_v23, 0.0 }
0x1c70   :  { %v4203_v36 = vsub.f32 %v4171_v29, %v4197_v41  ;;  %4192 = vadd.xlane.f32.xlu0 %v4191_v17 }
0x1c71   :  { %v4210_v50 = vmul.f32 %v4204_v1, %v4204_v1 }
0x1c72   :  { %v4209_v22 = vmul.f32 %v4203_v36, %v4203_v36 }
0x1c73   :  { %v4218_v57 = vsel %vm270_vm1, %v4210_v50, 0.0 }
0x1c74   :  { %4219 = vadd.xlane.f32.xlu1 %v4218_v57  ;;  %v4215_v12 = vsel %vm270_vm1, %v4209_v22, 0.0 }
0x1c75   :  { %4216 = vadd.xlane.f32.xlu0 %v4215_v12 }
0x1cf4   :  { %v4190_v38 = vpop.xlane.xlu1 %4189 }
0x1cf5   :  { %v4200_v48 = vmul.f32 0.03125, %v4190_v38  ;;  %v4187_v10 = vpop.xlane.xlu0 %4186  ;;  %v4826_v38 = vld [vmem:[%s7546_s26] ss:$0 sm:$0xff] }
0x1cf6   :  { %v4199_v24 = vmul.f32 0.03125, %v4187_v10 }
0x1cf7   :  { %v4206_v52 = vsub.f32 %v4174_v7, %v4200_v48 }
0x1cf8   :  { %v4205_v35 = vsub.f32 %v4173_v21, %v4199_v24 }
0x1cf9   :  { %v4212_v30 = vmul.f32 %v4206_v52, %v4206_v52 }
0x1cfa   :  { %v4211_v54 = vmul.f32 %v4205_v35, %v4205_v35 }
0x1cfb   :  { %v4224_v55 = vsel %vm270_vm1, %v4212_v30, 0.0 }
0x1cfc   :  { %4225 = vadd.xlane.f32.xlu1 %v4224_v55  ;;  %v4196_v51 = vpop.xlane.xlu1 %4195  ;;  %v4221_v4 = vsel %vm270_vm1, %v4211_v54, 0.0 }
0x1cfd   :  { %v4202_v63 = vmul.f32 0.03125, %v4196_v51  ;;  %4222 = vadd.xlane.f32.xlu0 %v4221_v4  ;;  %v4193_v53 = vpop.xlane.xlu0 %4192 }
0x1cfe   :  { %v4201_v42 = vmul.f32 0.03125, %v4193_v53 }
0x1cff   :  { %v4208_v56 = vsub.f32 %v4176_v13, %v4202_v63 }
0x1d00   :  { %v4207_v62 = vsub.f32 %v4175_v23, %v4201_v42 }
0x1d01   :  { %v4220_v32 = vpop.xlane.xlu1 %4219  ;;  %v4214_v15 = vmul.f32 %v4208_v56, %v4208_v56 }
0x1d02   :  { %v4234_v37 = vmul.f32 0.03125, %v4220_v32  ;;  %v4217_v5 = vpop.xlane.xlu0 %4216  ;;  %v4213_v59 = vmul.f32 %v4207_v62, %v4207_v62 }
0x1d03   :  { %v4233_v60 = vmul.f32 0.03125, %v4217_v5  ;;  %v4230_v61 = vsel %vm270_vm1, %v4214_v15, 0.0 }
0x1d04   :  { %v4240_v0 = vadd.f32 1e-06, %v4234_v37  ;;  %4231 = vadd.xlane.f32.xlu1 %v4230_v61  ;;  %v4227_v20 = vsel %vm270_vm1, %v4213_v59, 0.0 }
0x1d05   :  { %v4239_v3 = vadd.f32 1e-06, %v4233_v60  ;;  %4228 = vadd.xlane.f32.xlu0 %v4227_v20 }
0x1d06   :  { %6161 = vrsqrt.f32 %v4240_v0 }
0x1d07   :  { %6163 = vrsqrt.f32 %v4239_v3 }
0x1d10   :  { %v6162_v6 = vpop.eup %6161 }
0x1d11   :  { %v6164_v14 = vpop.eup %6163  ;;  %v4252_v29 = vmul.f32 %v6162_v6, %v4204_v1 }
0x1d12   :  { %v4251_v33 = vmul.f32 %v6164_v14, %v4203_v36 }
0x1d13   :  { %v4264_v58 = vmul.f32 %v4824_v8, %v4252_v29  ;;  %v4509_v29 = vld [vmem:[%s6443_s20] sm:$0xff] }
0x1d14   :  { %v4263_v11 = vmul.f32 %v4824_v8, %v4251_v33  ;;  %v4510_v33 = vld [vmem:[%s6443_s20 + $0x8] sm:$0xff] }
0x1d15   :  { %v4276_v18 = vadd.f32 %v4825_v47, %v4264_v58  ;;  %v4511_v58 = vld [vmem:[%s6443_s20 + $0x10] sm:$0xff] }
0x1d16   :  { %v4275_v16 = vadd.f32 %v4825_v47, %v4263_v11  ;;  %v4512_v11 = vld [vmem:[%s6443_s20 + $0x18] sm:$0xff]  ;;  %s7547_s20 = sld [smem:[#allocation26_spill]] }
0x1d18   :  { %5612 = vmatprep.mubr.msk.f32.mxu0 %vm270_vm1, %v4275_v16  ;;  %v5838_v16 = vpack.c.bf16 %v4512_v11, %v4511_v58 }
0x1d19   :  { %5613 = vmatmul.mubr.msk.f32.vlgmr.msra.gmra.mrb[70].mxu0 %vm270_vm1, %v4276_v18 }
0x1d89   :  { %v4226_v7 = vpop.xlane.xlu1 %4225 }
0x1d8a   :  { %v4236_v21 = vmul.f32 0.03125, %v4226_v7  ;;  %v4223_v19 = vpop.xlane.xlu0 %4222 }
0x1d8b   :  { %v4235_v40 = vmul.f32 0.03125, %v4223_v19 }
0x1d8c   :  { %v4242_v39 = vadd.f32 1e-06, %v4236_v21 }
0x1d8d   :  { %v4241_v44 = vadd.f32 1e-06, %v4235_v40 }
0x1d8e   :  { %6165 = vrsqrt.f32 %v4242_v39 }
0x1d8f   :  { %6167 = vrsqrt.f32 %v4241_v44 }
0x1d91   :  { %v4232_v2 = vpop.xlane.xlu1 %4231 }
0x1d92   :  { %v4238_v26 = vmul.f32 0.03125, %v4232_v2  ;;  %v4229_v13 = vpop.xlane.xlu0 %4228 }
0x1d93   :  { %v4237_v27 = vmul.f32 0.03125, %v4229_v13 }
0x1d94   :  { %v4244_v23 = vadd.f32 1e-06, %v4238_v26 }
0x1d95   :  { %v4243_v25 = vadd.f32 1e-06, %v4237_v27 }
0x1d96   :  { %6169 = vrsqrt.f32 %v4244_v23 }
0x1d97   :  { %6171 = vrsqrt.f32 %v4243_v25 }
0x1d98   :  { %v6166_v28 = vpop.eup %6165 }
0x1d99   :  { %v6168_v41 = vpop.eup %6167  ;;  %v4254_v31 = vmul.f32 %v6166_v28, %v4206_v52 }
0x1d9a   :  { %v4253_v1 = vmul.f32 %v6168_v41, %v4205_v35 }
0x1d9b   :  { %v4266_v17 = vmul.f32 %v4824_v8, %v4254_v31 }
0x1d9c   :  { %v4265_v36 = vmul.f32 %v4824_v8, %v4253_v1 }
0x1d9d   :  { %v4278_v22 = vadd.f32 %v4825_v47, %v4266_v17 }
0x1d9e   :  { %v4277_v50 = vadd.f32 %v4825_v47, %v4265_v36 }
0x1da0   :  { %v6170_v57 = vpop.eup %6169  ;;  %5615 = vmatprep.mubr.msk.f32.mxu0 %vm270_vm1, %v4277_v50 }
0x1da1   :  { %v6172_v12 = vpop.eup %6171  ;;  %5616 = vmatmul.mubr.msk.f32.gmra.mrb[72].mxu0 %vm270_vm1, %v4278_v22  ;;  %v4256_v34 = vmul.f32 %v6170_v57, %v4208_v56 }
0x1da2   :  { %v4255_v9 = vmul.f32 %v6172_v12, %v4207_v62 }
0x1da3   :  { %v4268_v46 = vmul.f32 %v4824_v8, %v4256_v34 }
0x1da4   :  { %v4267_v45 = vmul.f32 %v4824_v8, %v4255_v9 }
0x1da5   :  { %v4280_v49 = vadd.f32 %v4825_v47, %v4268_v46 }
0x1da6   :  { %v4279_v43 = vadd.f32 %v4825_v47, %v4267_v45  ;;  %v5834_v47 = vpack.c.bf16 %v4510_v33, %v4509_v29 }
0x1da8   :  { %5618 = vmatprep.mubr.msk.f32.mxu0 %vm270_vm1, %v4279_v43  ;;  %5835 = vmatprep.subr.bf16.mxu0 %v5834_v47  ;;  %v4833_v43 = vld [vmem:[%s7547_s20] ss:$0 sm:$0xff] }
0x1da9   :  { %5619 = vmatmul.mubr.msk.f32.gmra.mrb[74].mxu0 %vm270_vm1, %v4280_v49 }
0x1daa   :  { %5837 = vmatpush3.bf16.msra.mxu0 %v5834_v47 }
0x1dab   :  { %5839 = vmatprep.subr.bf16.mxu0 %v5838_v16 }
0x1dae   :  { %5841 = vmatpush3.bf16.msra.mxu0 %v5838_v16 }
0x1dec   :  { %v5614_v48 = vpop.f32.mrb[70].mxu0 }
0x1ded   :  { %v4382_v10 = vadd.f32 %v5614_v48, %v4826_v38  ;;  %v4376_v24 = vpop.f32.mrb[71].mxu0 }
0x1dee   :  { %v4377_v52 = vadd.f32 %v4826_v38, %v4376_v24 }
0x1def   :  { %v4410_v35 = vsel %vm270_vm1, %v4382_v10, 0.0 }
0x1df0   :  { %4411 = vadd.xlane.f32.xlu1 %v4410_v35  ;;  %v4407_v30 = vsel %vm270_vm1, %v4377_v52, 0.0 }
0x1df1   :  { %4408 = vadd.xlane.f32.xlu0 %v4407_v30 }
0x1e74   :  { %v5617_v54 = vpop.f32.mrb[72].mxu0 }
0x1e75   :  { %v4392_v55 = vadd.f32 %v5617_v54, %v4826_v38  ;;  %v4386_v51 = vpop.f32.mrb[73].mxu0 }
0x1e76   :  { %v4387_v4 = vadd.f32 %v4826_v38, %v4386_v51 }
0x1e77   :  { %v4416_v63 = vsel %vm270_vm1, %v4392_v55, 0.0 }
0x1e78   :  { %4417 = vadd.xlane.f32.xlu1 %v4416_v63  ;;  %v4413_v53 = vsel %vm270_vm1, %v4387_v4, 0.0 }
0x1e79   :  { %4414 = vadd.xlane.f32.xlu0 %v4413_v53 }
0x1e7c   :  { %v5620_v42 = vpop.f32.mrb[74].mxu0 }
0x1e7d   :  { %v4412_v56 = vpop.xlane.xlu1 %4411  ;;  %v4402_v62 = vadd.f32 %v5620_v42, %v4826_v38  ;;  %v4396_v32 = vpop.f32.mrb[75].mxu0 }
0x1e7e   :  { %v4426_v15 = vmul.f32 0.03125, %v4412_v56  ;;  %v4397_v37 = vadd.f32 %v4826_v38, %v4396_v32  ;;  %v4409_v5 = vpop.xlane.xlu0 %4408 }
0x1e7f   :  { %v4425_v59 = vmul.f32 0.03125, %v4409_v5  ;;  %v4422_v60 = vsel %vm270_vm1, %v4402_v62, 0.0 }
0x1e80   :  { %v4432_v61 = vsub.f32 %v4382_v10, %v4426_v15  ;;  %4423 = vadd.xlane.f32.xlu1 %v4422_v60  ;;  %v4419_v0 = vsel %vm270_vm1, %v4397_v37, 0.0  ;;  %v4834_v10 = vld [vmem:[%s6438_s12] ss:$0 sm:$0xff]  ;;  %s6259_s12 = smov [#allocation4]  }
0x1e81   :  { %v4431_v20 = vsub.f32 %v4377_v52, %v4425_v59  ;;  %4420 = vadd.xlane.f32.xlu0 %v4419_v0  ;;  %s4638_s28 = sshll.u32 %s6259_s12, 4  ;;  %s4639_s28 = int_to_ptr.vmem [resolvable:$true] %s4638_s28 }
0x1e82   :  { %v4438_v3 = vmul.f32 %v4432_v61, %v4432_v61  ;;  %s6189_s1 = scalar_lea.vmem %s4639_s28, 32  ;;  %p6194_p1 = scmp.lt.s32.totalorder %s4639_s28, %s4639_s28 }
0x1e83   :  { %v4437_v6 = vmul.f32 %v4431_v20, %v4431_v20  ;;  %p6190_p0 = scmp.ne.s32.totalorder %s4639_s28, %s6189_s1  ;;  %p6195_p2 = scmp.lt.s32.totalorder %s6189_s1, %s6189_s1 }
0x1e84   :  { %v4446_v8 = vsel %vm270_vm1, %v4438_v3, 0.0 }
0x1e85   :  { %4447 = vadd.xlane.f32.xlu1 %v4446_v8  ;;  %v4443_v14 = vsel %vm270_vm1, %v4437_v6, 0.0  ;;  %p6196_p3 = por %p6195_p2, %p6194_p1 }
0x1e86   :  { %4444 = vadd.xlane.f32.xlu0 %v4443_v14 }
0x1e87   :  { %p6197_p4 = pnand %p6196_p3, %p6190_p0 }
0x1f05   :  { %v4418_v18 = vpop.xlane.xlu1 %4417 }
0x1f06   :  { %v4428_v7 = vmul.f32 0.03125, %v4418_v18  ;;  %v4415_v21 = vpop.xlane.xlu0 %4414 }
0x1f07   :  { %v4427_v19 = vmul.f32 0.03125, %v4415_v21  ;;  %v4835_v21 = vld [vmem:[%s6448_s27] ss:$0 sm:$0xff] }
0x1f08   :  { %v4434_v40 = vsub.f32 %v4392_v55, %v4428_v7 }
0x1f09   :  { %v4433_v39 = vsub.f32 %v4387_v4, %v4427_v19 }
0x1f0a   :  { %v4440_v44 = vmul.f32 %v4434_v40, %v4434_v40 }
0x1f0b   :  { %v4439_v2 = vmul.f32 %v4433_v39, %v4433_v39 }
0x1f0c   :  { %v4452_v26 = vsel %vm270_vm1, %v4440_v44, 0.0 }
0x1f0d   :  { %4453 = vadd.xlane.f32.xlu1 %v4452_v26  ;;  %v4424_v13 = vpop.xlane.xlu1 %4423  ;;  %v4449_v27 = vsel %vm270_vm1, %v4439_v2, 0.0 }
0x1f0e   :  { %v4430_v23 = vmul.f32 0.03125, %v4424_v13  ;;  %4450 = vadd.xlane.f32.xlu0 %v4449_v27  ;;  %v4421_v25 = vpop.xlane.xlu0 %4420 }
0x1f0f   :  { %v4429_v28 = vmul.f32 0.03125, %v4421_v25 }
0x1f10   :  { %v4436_v41 = vsub.f32 %v4402_v62, %v4430_v23 }
0x1f11   :  { %v4435_v31 = vsub.f32 %v4397_v37, %v4429_v28 }
0x1f12   :  { %v4448_v1 = vpop.xlane.xlu1 %4447  ;;  %v4442_v17 = vmul.f32 %v4436_v41, %v4436_v41 }
0x1f13   :  { %v4462_v36 = vmul.f32 0.03125, %v4448_v1  ;;  %v4445_v50 = vpop.xlane.xlu0 %4444  ;;  %v4441_v22 = vmul.f32 %v4435_v31, %v4435_v31 }
0x1f14   :  { %v4461_v57 = vmul.f32 0.03125, %v4445_v50  ;;  %v4458_v12 = vsel %vm270_vm1, %v4442_v17, 0.0 }
0x1f15   :  { %v4468_v34 = vadd.f32 1e-05, %v4462_v36  ;;  %4459 = vadd.xlane.f32.xlu1 %v4458_v12  ;;  %v4455_v9 = vsel %vm270_vm1, %v4441_v22, 0.0 }
0x1f16   :  { %v4467_v46 = vadd.f32 1e-05, %v4461_v57  ;;  %4456 = vadd.xlane.f32.xlu0 %v4455_v9 }
0x1f17   :  { %6173 = vrsqrt.f32 %v4468_v34 }
0x1f18   :  { %6175 = vrsqrt.f32 %v4467_v46 }
0x1f21   :  { %v6174_v45 = vpop.eup %6173 }
0x1f22   :  { %v6176_v49 = vpop.eup %6175  ;;  %v4480_v38 = vmul.f32 %v6174_v45, %v4432_v61 }
0x1f23   :  { %v4479_v48 = vmul.f32 %v6176_v49, %v4431_v20 }
0x1f24   :  { %v4492_v24 = vmul.f32 %v4833_v43, %v4480_v38 }
0x1f25   :  { %v4491_v52 = vmul.f32 %v4833_v43, %v4479_v48 }
0x1f26   :  { %v4504_v30 = vadd.f32 %v4834_v10, %v4492_v24 }
0x1f27   :  { %v4503_v35 = vadd.f32 %v4834_v10, %v4491_v52 }
0x1f29   :  { %5629 = vmatprep.mubr.msk.f32.mxu0 %vm270_vm1, %v4503_v35 }
0x1f2a   :  { %5630 = vmatmul.mubr.msk.f32.vlgmr.msra.gmra.mrb[76].mxu0 %vm270_vm1, %v4504_v30 }
0x1f9a   :  { %v4454_v54 = vpop.xlane.xlu1 %4453 }
0x1f9b   :  { %v4464_v55 = vmul.f32 0.03125, %v4454_v54  ;;  %v4451_v51 = vpop.xlane.xlu0 %4450 }
0x1f9c   :  { %v4463_v4 = vmul.f32 0.03125, %v4451_v51 }
0x1f9d   :  { %v4470_v63 = vadd.f32 1e-05, %v4464_v55 }
0x1f9e   :  { %v4469_v53 = vadd.f32 1e-05, %v4463_v4 }
0x1f9f   :  { %6177 = vrsqrt.f32 %v4470_v63 }
0x1fa0   :  { %6179 = vrsqrt.f32 %v4469_v53 }
0x1fa2   :  { %v4460_v42 = vpop.xlane.xlu1 %4459 }
0x1fa3   :  { %v4466_v56 = vmul.f32 0.03125, %v4460_v42  ;;  %v4457_v62 = vpop.xlane.xlu0 %4456 }
0x1fa4   :  { %v4465_v32 = vmul.f32 0.03125, %v4457_v62 }
0x1fa5   :  { %v4472_v15 = vadd.f32 1e-05, %v4466_v56 }
0x1fa6   :  { %v4471_v37 = vadd.f32 1e-05, %v4465_v32 }
0x1fa7   :  { %6181 = vrsqrt.f32 %v4472_v15 }
0x1fa8   :  { %6183 = vrsqrt.f32 %v4471_v37 }
0x1fa9   :  { %v6178_v5 = vpop.eup %6177 }
0x1faa   :  { %v6180_v59 = vpop.eup %6179  ;;  %v4482_v60 = vmul.f32 %v6178_v5, %v4434_v40 }
0x1fab   :  { %v4481_v61 = vmul.f32 %v6180_v59, %v4433_v39 }
0x1fac   :  { %v4494_v0 = vmul.f32 %v4833_v43, %v4482_v60 }
0x1fad   :  { %v4493_v20 = vmul.f32 %v4833_v43, %v4481_v61 }
0x1fae   :  { %v4506_v6 = vadd.f32 %v4834_v10, %v4494_v0 }
0x1faf   :  { %v4505_v3 = vadd.f32 %v4834_v10, %v4493_v20 }
0x1fb1   :  { %v6182_v8 = vpop.eup %6181  ;;  %5632 = vmatprep.mubr.msk.f32.mxu0 %vm270_vm1, %v4505_v3 }
0x1fb2   :  { %v6184_v14 = vpop.eup %6183  ;;  %5633 = vmatmul.mubr.msk.f32.gmra.mrb[78].mxu0 %vm270_vm1, %v4506_v6  ;;  %v4484_v29 = vmul.f32 %v6182_v8, %v4436_v41 }
0x1fb3   :  { %v4483_v33 = vmul.f32 %v6184_v14, %v4435_v31 }
0x1fb4   :  { %v4496_v47 = vmul.f32 %v4833_v43, %v4484_v29 }
0x1fb5   :  { %v4495_v58 = vmul.f32 %v4833_v43, %v4483_v33 }
0x1fb6   :  { %v4508_v16 = vadd.f32 %v4834_v10, %v4496_v47 }
0x1fb7   :  { %v4507_v11 = vadd.f32 %v4834_v10, %v4495_v58 }
0x1fb9   :  { %5635 = vmatprep.mubr.msk.f32.mxu0 %vm270_vm1, %v4507_v11 }
0x1fba   :  { %5636 = vmatmul.mubr.msk.f32.gmra.mrb[80].mxu0 %vm270_vm1, %v4508_v16 }
0x1ffd   :  { %v5631_v18 = vpop.f32.mrb[76].mxu0 }
0x1ffe   :  { %v4604_v7 = vpop.f32.mrb[77].mxu0 }
0x2085   :  { %v5634_v19 = vpop.f32.mrb[78].mxu0 }
0x2086   :  { %v4612_v40 = vpop.f32.mrb[79].mxu0 }
0x2087   :  { %v4613_v39 = vadd.f32 %v4835_v21, %v4612_v40 }
0x2089   :  { %4630 = vst.msk [vmem:[#allocation4] sm:$0x1] %vm4629_vm8, %v4613_v39 }
0x208d   :  { %v5637_v44 = vpop.f32.mrb[80].mxu0 }
0x208e   :  { %v4626_v2 = vadd.f32 %v5637_v44, %v4835_v21  ;;  %v4621_v26 = vpop.f32.mrb[81].mxu0 }
0x2090   :  { %4631 = vst.msk [vmem:[#allocation4 + $0x1] sm:$0x1] %vm4629_vm8, %v4626_v2 }
0x2091   :  { %6200 = shalt.err (!%p6197_p4)
}
0x2092   :  { %s6201_s27 = scalar_lea.hbm %s6453_s4, 32 }
0x2093   :  { %p6202_p5 = scmp.ne.s32.totalorder %s6453_s4, %s6201_s27  ;;  %p6205_p6 = scmp.lt.u32.totalorder %s6201_s27, %s6453_s4 }
0x2095   :  { %p6207_p7 = pnand %p6205_p6, %p6202_p5 }
0x2097   :  { %6210 = shalt.err (!%p6207_p7)
}
0x2098   :  { %4641 = dma.vmem_to_hbm [thread:$0]  %s4639_s28, 32, %s6453_s4, [#allocation5]  }
0x2099   :  { %6211 = dma.done.wait [#allocation5], 32  }
0x209a   :  { %6212 = vsyncadd [#allocation5], 4294967264 }
0x209b   :  { %4645 = vsyncpa [#allocation5], 1 }

</bundles_post_ra>
